<compile_context>
chip_gen: v7x
topology: tpu7x:2x2x1
jax: 0.10.0
libtpu: 0.0.40
codegen_flags: <defaults>
</compile_context>

<pallas_src>
import jax
import jax.numpy as jnp
from jax.experimental import pallas as pl
from jax.experimental.pallas import tpu as pltpu

LATENT_DIM = 100
LATENT_PAD = 128            # 100 zero-padded to a full lane tile
IMG_SHAPE = (1, 28, 28)
IMG_FLAT = 1 * 28 * 28      # 784
IMG_PAD = 896               # 7 * 128, lane-dense output width
BN_EPS = 0.8                # nn.BatchNorm1d(out_feat, 0.8): 0.8 lands in the eps slot
LEAKY_SLOPE = 0.2


def _lrelu(x):
    return jnp.maximum(x, LEAKY_SLOPE * x)


def _bn_lrelu(y, inv_b, g, be):
    """Train-mode BatchNorm1d (batch stats, biased var) folded with LeakyReLU.

    Centered two-pass variance: numerically safer than E[y^2] - mean^2.
    """
    mean = jnp.sum(y, axis=0, keepdims=True) * inv_b
    d = y - mean
    var = jnp.sum(d * d, axis=0, keepdims=True) * inv_b
    a = g * jax.lax.rsqrt(var + BN_EPS)
    return _lrelu(d * a + be)


def generator_kernel(
    z_ref,
    w1_ref, b1_ref,
    w2_ref, g2_ref, be2_ref,
    w3_ref, g3_ref, be3_ref,
    w4q_ref, s4_ref, g4_ref, be4_ref,
    w5q_ref, s5_ref, b5_ref,
    out_ref,
):
    # Inverse batch size is a compile-time constant (static shapes).
    inv_b = jnp.float32(1.0 / z_ref.shape[0])

    # Block 1: Linear(100->128, K padded to 128) -> LeakyReLU.  bf16 MXU, f32 acc.
    x = z_ref[...].astype(jnp.bfloat16)
    h = jnp.dot(x, w1_ref[...], preferred_element_type=jnp.float32) + b1_ref[...]
    h = _lrelu(h)

    # Block 2: Linear(128,256) -> BN -> LReLU  (bf16 weights; bias cancelled by BN).
    y = jnp.dot(h.astype(jnp.bfloat16), w2_ref[...],
                preferred_element_type=jnp.float32)
    h = _bn_lrelu(y, inv_b, g2_ref[...], be2_ref[...])

    # Block 3: Linear(256,512) -> BN -> LReLU  (bf16 weights).
    y = jnp.dot(h.astype(jnp.bfloat16), w3_ref[...],
                preferred_element_type=jnp.float32)
    h = _bn_lrelu(y, inv_b, g3_ref[...], be3_ref[...])

    # Block 4: Linear(512,1024) -> BN -> LReLU.  int8 weight streamed from HBM,
    # cast exactly to bf16 (|q| <= 127 is exact in bf16) for the MXU; the
    # per-output-channel dequant scale is applied once after the matmul.
    w4 = w4q_ref[...].astype(jnp.float32).astype(jnp.bfloat16)
    y = jnp.dot(h.astype(jnp.bfloat16), w4,
                preferred_element_type=jnp.float32) * s4_ref[...]
    h = _bn_lrelu(y, inv_b, g4_ref[...], be4_ref[...])

    # Output: Linear(1024, 896-padded) int8 -> Tanh.  Lane-dense (B, 896) store;
    # the wrapper slices back to 784 columns.
    w5 = w5q_ref[...].astype(jnp.float32).astype(jnp.bfloat16)
    o = jnp.dot(h.astype(jnp.bfloat16), w5,
                preferred_element_type=jnp.float32) * s5_ref[...] + b5_ref[...]
    out_ref[...] = jnp.tanh(o)


def _quantize_int8(w):
    """Symmetric per-output-channel int8 quantization of a (K, N) weight."""
    max_abs = jnp.max(jnp.abs(w), axis=0, keepdims=True)          # (1, N)
    scale = jnp.where(max_abs > 0, max_abs / 127.0, 1.0)
    q = jnp.clip(jnp.round(w / scale), -127, 127).astype(jnp.int8)
    return q, scale.astype(jnp.float32)


def init_params(key):
    """Deterministic params; PyTorch-style uniform(-1/sqrt(fan_in), 1/sqrt(fan_in)).

    Storage layout chosen for the kernel:
      * w1, w2, w3: bfloat16 (small).
      * w4, w5: int8 + per-output-channel f32 scale (largest weights, DMA-bound).
      * w1 rows padded 100->128 with zeros; w5/b5 columns padded 784->896 with zeros.
      * b2/b3/b4 omitted: exactly cancelled by the following train-mode BatchNorm.
    """
    keys = jax.random.split(key, 8)

    def uniform(k, shape, fan_in):
        bound = 1.0 / jnp.sqrt(jnp.float32(fan_in))
        return jax.random.uniform(k, shape, jnp.float32, -bound, bound)

    params = {}

    # Layer 1: Linear(100,128) + bias, K zero-padded to 128.
    w1 = uniform(keys[0], (LATENT_DIM, 128), LATENT_DIM)
    w1 = jnp.pad(w1, ((0, LATENT_PAD - LATENT_DIM), (0, 0)))
    params["w1"] = w1.astype(jnp.bfloat16)
    params["b1"] = uniform(keys[1], (1, 128), LATENT_DIM)

    # Layers 2-3: bf16 weights (biases cancelled by BN).
    params["w2"] = uniform(keys[2], (128, 256), 128).astype(jnp.bfloat16)
    params["w3"] = uniform(keys[3], (256, 512), 256).astype(jnp.bfloat16)

    # Layer 4: int8 per-output-channel quantized (bias cancelled by BN).
    w4 = uniform(keys[4], (512, 1024), 512)
    params["w4q"], params["s4"] = _quantize_int8(w4)

    # Layer 5: int8 weight + bias, N zero-padded 784 -> 896.
    w5 = uniform(keys[5], (1024, IMG_FLAT), 1024)
    w5q, s5 = _quantize_int8(w5)
    params["w5q"] = jnp.pad(w5q, ((0, 0), (0, IMG_PAD - IMG_FLAT)))
    params["s5"] = jnp.pad(s5, ((0, 0), (0, IMG_PAD - IMG_FLAT)))
    b5 = uniform(keys[6], (1, IMG_FLAT), 1024)
    params["b5"] = jnp.pad(b5, ((0, 0), (0, IMG_PAD - IMG_FLAT)))

    # BatchNorm affine params (PyTorch init: gamma=1, beta=0).
    for idx, n in zip((2, 3, 4), (256, 512, 1024)):
        params[f"g{idx}"] = jnp.ones((1, n), jnp.float32)
        params[f"be{idx}"] = jnp.zeros((1, n), jnp.float32)
    return params


def _vmem_limit_bytes():
    """Generation-aware VMEM cap: ~3/4 of physical, never above ~100 MiB."""
    try:
        cap = int(pltpu.get_tpu_info().vmem_capacity_bytes)
    except Exception:
        cap = 64 * 1024 * 1024  # conservative (v7x-sized) fallback
    return min(100 * 1024 * 1024, (cap * 3) // 4)


def generator_forward(z, params):
    B = z.shape[0]
    # Zero-pad the latent K 100 -> 128 so the first matmul has clean lane tiles.
    z_pad = jnp.pad(z, ((0, 0), (0, LATENT_PAD - LATENT_DIM)))

    args = (
        z_pad,
        params["w1"], params["b1"],
        params["w2"], params["g2"], params["be2"],
        params["w3"], params["g3"], params["be3"],
        params["w4q"], params["s4"], params["g4"], params["be4"],
        params["w5q"], params["s5"], params["b5"],
    )
    vmem = pl.BlockSpec(memory_space=pltpu.MemorySpace.VMEM)

    # Advisory cost hint: this call is dominated by the weight DMA at small B.
    matmul_flops = 2 * B * (LATENT_PAD * 128 + 128 * 256 + 256 * 512
                            + 512 * 1024 + 1024 * IMG_PAD)
    bytes_accessed = sum(int(a.size) * a.dtype.itemsize for a in args) \
        + B * IMG_PAD * 4
    transcendentals = B * IMG_PAD + 3 * (256 + 512 + 1024)  # tanh + rsqrt

    flat = pl.pallas_call(
        generator_kernel,
        out_shape=jax.ShapeDtypeStruct((B, IMG_PAD), jnp.float32),
        in_specs=[vmem] * len(args),
        out_specs=pl.BlockSpec(memory_space=pltpu.MemorySpace.VMEM),
        compiler_params=pltpu.CompilerParams(vmem_limit_bytes=_vmem_limit_bytes()),
        cost_estimate=pl.CostEstimate(
            flops=matmul_flops,
            transcendentals=transcendentals,
            bytes_accessed=bytes_accessed,
        ),
    )(*args)
    # Drop the lane padding, then img.view(B, *img_shape) -> NCHW.
    return flat[:, :IMG_FLAT].reshape(B, *IMG_SHAPE)


if __name__ == "__main__":
    key = jax.random.PRNGKey(0)
    pkey, zkey = jax.random.split(key)
    params = init_params(pkey)

    B = 16
    z = jax.random.normal(zkey, (B, LATENT_DIM), jnp.float32)

    img = generator_forward(z, params)
    jax.block_until_ready(img)

    assert img.shape == (B, 1, 28, 28), img.shape
    assert bool(jnp.all(jnp.isfinite(img)))
    assert bool(jnp.all(jnp.abs(img) <= 1.0 + 1e-6))  # tanh output range
    print("KERNEL_OK")
</pallas_src>

<mosaic_0001>
module attributes {stable_mosaic.version = 11 : i64} {
  func.func @generator_kernel(%arg0: memref<16x128xf32, #tpu.memory_space<vmem>>, %arg1: memref<128x128xbf16, #tpu.memory_space<vmem>>, %arg2: memref<1x128xf32, #tpu.memory_space<vmem>>, %arg3: memref<128x256xbf16, #tpu.memory_space<vmem>>, %arg4: memref<1x256xf32, #tpu.memory_space<vmem>>, %arg5: memref<1x256xf32, #tpu.memory_space<vmem>>, %arg6: memref<256x512xbf16, #tpu.memory_space<vmem>>, %arg7: memref<1x512xf32, #tpu.memory_space<vmem>>, %arg8: memref<1x512xf32, #tpu.memory_space<vmem>>, %arg9: memref<512x1024xi8, #tpu.memory_space<vmem>>, %arg10: memref<1x1024xf32, #tpu.memory_space<vmem>>, %arg11: memref<1x1024xf32, #tpu.memory_space<vmem>>, %arg12: memref<1x1024xf32, #tpu.memory_space<vmem>>, %arg13: memref<1024x896xi8, #tpu.memory_space<vmem>>, %arg14: memref<1x896xf32, #tpu.memory_space<vmem>>, %arg15: memref<1x896xf32, #tpu.memory_space<vmem>>, %arg16: memref<16x896xf32, #tpu.memory_space<vmem>>) attributes {dimension_semantics = [], scalar_prefetch = 0 : i64, scratch_operands = 0 : i64, tpu.core_type = #tpu.core_type<tc>} {
    %c0 = arith.constant 0 : index
    %c0_0 = arith.constant 0 : index
    %0 = vector.load %arg0[%c0, %c0_0] : memref<16x128xf32, #tpu.memory_space<vmem>>, vector<16x128xf32>
    %1 = arith.truncf %0 : vector<16x128xf32> to vector<16x128xbf16>
    %c0_1 = arith.constant 0 : index
    %c0_2 = arith.constant 0 : index
    %2 = vector.load %arg1[%c0_1, %c0_2] : memref<128x128xbf16, #tpu.memory_space<vmem>>, vector<128x128xbf16>
    %cst = arith.constant dense<0.000000e+00> : vector<16x128xf32>
    %3 = tpu.matmul %1, %2, %cst {dimension_numbers = #tpu.dot_dimension_numbers<[1], [0], [0], [1], [0, 0, 1, 1], [], []>} : vector<16x128xbf16>, vector<128x128xbf16>, vector<16x128xf32> -> vector<16x128xf32>
    %c0_3 = arith.constant 0 : index
    %c0_4 = arith.constant 0 : index
    %4 = vector.load %arg2[%c0_3, %c0_4] : memref<1x128xf32, #tpu.memory_space<vmem>>, vector<1x128xf32>
    %5 = vector.broadcast %4 : vector<1x128xf32> to vector<16x128xf32>
    %6 = arith.addf %3, %5 : vector<16x128xf32>
    %cst_5 = arith.constant 2.000000e-01 : f32
    %7 = vector.broadcast %cst_5 : f32 to vector<16x128xf32>
    %8 = arith.mulf %7, %6 : vector<16x128xf32>
    %9 = arith.maximumf %6, %8 : vector<16x128xf32>
    %10 = arith.truncf %9 : vector<16x128xf32> to vector<16x128xbf16>
    %c0_6 = arith.constant 0 : index
    %c0_7 = arith.constant 0 : index
    %11 = vector.load %arg3[%c0_6, %c0_7] : memref<128x256xbf16, #tpu.memory_space<vmem>>, vector<128x256xbf16>
    %cst_8 = arith.constant dense<0.000000e+00> : vector<16x256xf32>
    %12 = tpu.matmul %10, %11, %cst_8 {dimension_numbers = #tpu.dot_dimension_numbers<[1], [0], [0], [1], [0, 0, 1, 1], [], []>} : vector<16x128xbf16>, vector<128x256xbf16>, vector<16x256xf32> -> vector<16x256xf32>
    %c0_9 = arith.constant 0 : index
    %c0_10 = arith.constant 0 : index
    %13 = vector.load %arg4[%c0_9, %c0_10] : memref<1x256xf32, #tpu.memory_space<vmem>>, vector<1x256xf32>
    %c0_11 = arith.constant 0 : index
    %c0_12 = arith.constant 0 : index
    %14 = vector.load %arg5[%c0_11, %c0_12] : memref<1x256xf32, #tpu.memory_space<vmem>>, vector<1x256xf32>
    %cst_13 = arith.constant dense<0.000000e+00> : vector<256xf32>
    %15 = vector.multi_reduction <add>, %12, %cst_13 [0] : vector<16x256xf32> to vector<256xf32>
    %16 = vector.shape_cast %15 : vector<256xf32> to vector<1x256xf32>
    %cst_14 = arith.constant 6.250000e-02 : f32
    %17 = vector.broadcast %cst_14 : f32 to vector<1x256xf32>
    %18 = arith.mulf %16, %17 : vector<1x256xf32>
    %19 = vector.broadcast %18 : vector<1x256xf32> to vector<16x256xf32>
    %20 = arith.subf %12, %19 : vector<16x256xf32>
    %21 = arith.mulf %20, %20 : vector<16x256xf32>
    %cst_15 = arith.constant dense<0.000000e+00> : vector<256xf32>
    %22 = vector.multi_reduction <add>, %21, %cst_15 [0] : vector<16x256xf32> to vector<256xf32>
    %23 = vector.shape_cast %22 : vector<256xf32> to vector<1x256xf32>
    %cst_16 = arith.constant 6.250000e-02 : f32
    %24 = vector.broadcast %cst_16 : f32 to vector<1x256xf32>
    %25 = arith.mulf %23, %24 : vector<1x256xf32>
    %cst_17 = arith.constant 8.000000e-01 : f32
    %26 = vector.broadcast %cst_17 : f32 to vector<1x256xf32>
    %27 = arith.addf %25, %26 : vector<1x256xf32>
    %28 = math.rsqrt %27 : vector<1x256xf32>
    %29 = arith.mulf %13, %28 : vector<1x256xf32>
    %30 = vector.broadcast %29 : vector<1x256xf32> to vector<16x256xf32>
    %31 = arith.mulf %20, %30 : vector<16x256xf32>
    %32 = vector.broadcast %14 : vector<1x256xf32> to vector<16x256xf32>
    %33 = arith.addf %31, %32 : vector<16x256xf32>
    %cst_18 = arith.constant 2.000000e-01 : f32
    %34 = vector.broadcast %cst_18 : f32 to vector<16x256xf32>
    %35 = arith.mulf %34, %33 : vector<16x256xf32>
    %36 = arith.maximumf %33, %35 : vector<16x256xf32>
    %37 = arith.truncf %36 : vector<16x256xf32> to vector<16x256xbf16>
    %c0_19 = arith.constant 0 : index
    %c0_20 = arith.constant 0 : index
    %38 = vector.load %arg6[%c0_19, %c0_20] : memref<256x512xbf16, #tpu.memory_space<vmem>>, vector<256x512xbf16>
    %cst_21 = arith.constant dense<0.000000e+00> : vector<16x512xf32>
    %39 = tpu.matmul %37, %38, %cst_21 {dimension_numbers = #tpu.dot_dimension_numbers<[1], [0], [0], [1], [0, 0, 1, 1], [], []>} : vector<16x256xbf16>, vector<256x512xbf16>, vector<16x512xf32> -> vector<16x512xf32>
    %c0_22 = arith.constant 0 : index
    %c0_23 = arith.constant 0 : index
    %40 = vector.load %arg7[%c0_22, %c0_23] : memref<1x512xf32, #tpu.memory_space<vmem>>, vector<1x512xf32>
    %c0_24 = arith.constant 0 : index
    %c0_25 = arith.constant 0 : index
    %41 = vector.load %arg8[%c0_24, %c0_25] : memref<1x512xf32, #tpu.memory_space<vmem>>, vector<1x512xf32>
    %cst_26 = arith.constant dense<0.000000e+00> : vector<512xf32>
    %42 = vector.multi_reduction <add>, %39, %cst_26 [0] : vector<16x512xf32> to vector<512xf32>
    %43 = vector.shape_cast %42 : vector<512xf32> to vector<1x512xf32>
    %cst_27 = arith.constant 6.250000e-02 : f32
    %44 = vector.broadcast %cst_27 : f32 to vector<1x512xf32>
    %45 = arith.mulf %43, %44 : vector<1x512xf32>
    %46 = vector.broadcast %45 : vector<1x512xf32> to vector<16x512xf32>
    %47 = arith.subf %39, %46 : vector<16x512xf32>
    %48 = arith.mulf %47, %47 : vector<16x512xf32>
    %cst_28 = arith.constant dense<0.000000e+00> : vector<512xf32>
    %49 = vector.multi_reduction <add>, %48, %cst_28 [0] : vector<16x512xf32> to vector<512xf32>
    %50 = vector.shape_cast %49 : vector<512xf32> to vector<1x512xf32>
    %cst_29 = arith.constant 6.250000e-02 : f32
    %51 = vector.broadcast %cst_29 : f32 to vector<1x512xf32>
    %52 = arith.mulf %50, %51 : vector<1x512xf32>
    %cst_30 = arith.constant 8.000000e-01 : f32
    %53 = vector.broadcast %cst_30 : f32 to vector<1x512xf32>
    %54 = arith.addf %52, %53 : vector<1x512xf32>
    %55 = math.rsqrt %54 : vector<1x512xf32>
    %56 = arith.mulf %40, %55 : vector<1x512xf32>
    %57 = vector.broadcast %56 : vector<1x512xf32> to vector<16x512xf32>
    %58 = arith.mulf %47, %57 : vector<16x512xf32>
    %59 = vector.broadcast %41 : vector<1x512xf32> to vector<16x512xf32>
    %60 = arith.addf %58, %59 : vector<16x512xf32>
    %cst_31 = arith.constant 2.000000e-01 : f32
    %61 = vector.broadcast %cst_31 : f32 to vector<16x512xf32>
    %62 = arith.mulf %61, %60 : vector<16x512xf32>
    %63 = arith.maximumf %60, %62 : vector<16x512xf32>
    %c0_32 = arith.constant 0 : index
    %c0_33 = arith.constant 0 : index
    %64 = vector.load %arg9[%c0_32, %c0_33] : memref<512x1024xi8, #tpu.memory_space<vmem>>, vector<512x1024xi8>
    %65 = arith.sitofp %64 : vector<512x1024xi8> to vector<512x1024xf32>
    %66 = arith.truncf %65 : vector<512x1024xf32> to vector<512x1024xbf16>
    %67 = arith.truncf %63 : vector<16x512xf32> to vector<16x512xbf16>
    %cst_34 = arith.constant dense<0.000000e+00> : vector<16x1024xf32>
    %68 = tpu.matmul %67, %66, %cst_34 {dimension_numbers = #tpu.dot_dimension_numbers<[1], [0], [0], [1], [0, 0, 1, 1], [], []>} : vector<16x512xbf16>, vector<512x1024xbf16>, vector<16x1024xf32> -> vector<16x1024xf32>
    %c0_35 = arith.constant 0 : index
    %c0_36 = arith.constant 0 : index
    %69 = vector.load %arg10[%c0_35, %c0_36] : memref<1x1024xf32, #tpu.memory_space<vmem>>, vector<1x1024xf32>
    %70 = vector.broadcast %69 : vector<1x1024xf32> to vector<16x1024xf32>
    %71 = arith.mulf %68, %70 : vector<16x1024xf32>
    %c0_37 = arith.constant 0 : index
    %c0_38 = arith.constant 0 : index
    %72 = vector.load %arg11[%c0_37, %c0_38] : memref<1x1024xf32, #tpu.memory_space<vmem>>, vector<1x1024xf32>
    %c0_39 = arith.constant 0 : index
    %c0_40 = arith.constant 0 : index
    %73 = vector.load %arg12[%c0_39, %c0_40] : memref<1x1024xf32, #tpu.memory_space<vmem>>, vector<1x1024xf32>
    %cst_41 = arith.constant dense<0.000000e+00> : vector<1024xf32>
    %74 = vector.multi_reduction <add>, %71, %cst_41 [0] : vector<16x1024xf32> to vector<1024xf32>
    %75 = vector.shape_cast %74 : vector<1024xf32> to vector<1x1024xf32>
    %cst_42 = arith.constant 6.250000e-02 : f32
    %76 = vector.broadcast %cst_42 : f32 to vector<1x1024xf32>
    %77 = arith.mulf %75, %76 : vector<1x1024xf32>
    %78 = vector.broadcast %77 : vector<1x1024xf32> to vector<16x1024xf32>
    %79 = arith.subf %71, %78 : vector<16x1024xf32>
    %80 = arith.mulf %79, %79 : vector<16x1024xf32>
    %cst_43 = arith.constant dense<0.000000e+00> : vector<1024xf32>
    %81 = vector.multi_reduction <add>, %80, %cst_43 [0] : vector<16x1024xf32> to vector<1024xf32>
    %82 = vector.shape_cast %81 : vector<1024xf32> to vector<1x1024xf32>
    %cst_44 = arith.constant 6.250000e-02 : f32
    %83 = vector.broadcast %cst_44 : f32 to vector<1x1024xf32>
    %84 = arith.mulf %82, %83 : vector<1x1024xf32>
    %cst_45 = arith.constant 8.000000e-01 : f32
    %85 = vector.broadcast %cst_45 : f32 to vector<1x1024xf32>
    %86 = arith.addf %84, %85 : vector<1x1024xf32>
    %87 = math.rsqrt %86 : vector<1x1024xf32>
    %88 = arith.mulf %72, %87 : vector<1x1024xf32>
    %89 = vector.broadcast %88 : vector<1x1024xf32> to vector<16x1024xf32>
    %90 = arith.mulf %79, %89 : vector<16x1024xf32>
    %91 = vector.broadcast %73 : vector<1x1024xf32> to vector<16x1024xf32>
    %92 = arith.addf %90, %91 : vector<16x1024xf32>
    %cst_46 = arith.constant 2.000000e-01 : f32
    %93 = vector.broadcast %cst_46 : f32 to vector<16x1024xf32>
    %94 = arith.mulf %93, %92 : vector<16x1024xf32>
    %95 = arith.maximumf %92, %94 : vector<16x1024xf32>
    %c0_47 = arith.constant 0 : index
    %c0_48 = arith.constant 0 : index
    %96 = vector.load %arg13[%c0_47, %c0_48] : memref<1024x896xi8, #tpu.memory_space<vmem>>, vector<1024x896xi8>
    %97 = arith.sitofp %96 : vector<1024x896xi8> to vector<1024x896xf32>
    %98 = arith.truncf %97 : vector<1024x896xf32> to vector<1024x896xbf16>
    %99 = arith.truncf %95 : vector<16x1024xf32> to vector<16x1024xbf16>
    %cst_49 = arith.constant dense<0.000000e+00> : vector<16x896xf32>
    %100 = tpu.matmul %99, %98, %cst_49 {dimension_numbers = #tpu.dot_dimension_numbers<[1], [0], [0], [1], [0, 0, 1, 1], [], []>} : vector<16x1024xbf16>, vector<1024x896xbf16>, vector<16x896xf32> -> vector<16x896xf32>
    %c0_50 = arith.constant 0 : index
    %c0_51 = arith.constant 0 : index
    %101 = vector.load %arg14[%c0_50, %c0_51] : memref<1x896xf32, #tpu.memory_space<vmem>>, vector<1x896xf32>
    %102 = vector.broadcast %101 : vector<1x896xf32> to vector<16x896xf32>
    %103 = arith.mulf %100, %102 : vector<16x896xf32>
    %c0_52 = arith.constant 0 : index
    %c0_53 = arith.constant 0 : index
    %104 = vector.load %arg15[%c0_52, %c0_53] : memref<1x896xf32, #tpu.memory_space<vmem>>, vector<1x896xf32>
    %105 = vector.broadcast %104 : vector<1x896xf32> to vector<16x896xf32>
    %106 = arith.addf %103, %105 : vector<16x896xf32>
    %107 = math.tanh %106 : vector<16x896xf32>
    %c0_54 = arith.constant 0 : index
    %c0_55 = arith.constant 0 : index
    %108 = vector.load %arg16[%c0_54, %c0_55] : memref<16x896xf32, #tpu.memory_space<vmem>>, vector<16x896xf32>
    tpu.vector_store %arg16[%c0_54, %c0_55], %107 {strides = array<i32>} : memref<16x896xf32, #tpu.memory_space<vmem>>, vector<16x896xf32>,
    return
  }
}

</mosaic_0001>

<bundles_post_ra>
// kernel: tpu_custom_call.1
= control target key start
LH: loop header
LB: loop body
LE: loop exit
PB: predicated region body
PF: predicated region fallthrough
CT: control target
= control target key end

     0   :  { %s5247_s0 = inlined_call_operand.hbm [shape: f32[16,128], index: 0, kind: input, shape index: {}]   ;;  %s5248_s1 = inlined_call_operand.hbm [shape: bf16[128,128], index: 1, kind: input, shape index: {}]   ;;  %s5249_s2 = inlined_call_operand.hbm [shape: f32[1,128], index: 2, kind: input, shape index: {}]   ;;  %s5250_s3 = inlined_call_operand.hbm [shape: bf16[128,256], index: 3, kind: input, shape index: {}]   ;;  %s5251_s4 = inlined_call_operand.vmem [shape: f32[1,256], index: 4, kind: input, shape index: {}]   ;;  %s5252_s5 = inlined_call_operand.hbm [shape: f32[1,256], index: 5, kind: input, shape index: {}]   ;;  %s5253_s6 = inlined_call_operand.hbm [shape: bf16[256,512], index: 6, kind: input, shape index: {}]   ;;  %s5254_s7 = inlined_call_operand.hbm [shape: f32[1,512], index: 7, kind: input, shape index: {}]   ;;  %s5255_s8 = inlined_call_operand.hbm [shape: f32[1,512], index: 8, kind: input, shape index: {}]   ;;  %s5256_s9 = inlined_call_operand.hbm [shape: s8[512,1024], index: 9, kind: input, shape index: {}]   ;;  %s5257_s10 = inlined_call_operand.vmem [shape: f32[1,1024], index: 10, kind: input, shape index: {}]   ;;  %s5258_s11 = inlined_call_operand.vmem [shape: f32[1,1024], index: 11, kind: input, shape index: {}]   ;;  %s5259_s12 = inlined_call_operand.vmem [shape: f32[1,1024], index: 12, kind: input, shape index: {}]   ;;  %s5260_s13 = inlined_call_operand.hbm [shape: s8[1024,896], index: 13, kind: input, shape index: {}]   ;;  %s5261_s14 = inlined_call_operand.vmem [shape: f32[1,896], index: 14, kind: input, shape index: {}]   ;;  %s5262_s15 = inlined_call_operand.vmem [shape: f32[1,896], index: 15, kind: input, shape index: {}]   ;;  %s5263_s16 = inlined_call_operand.hbm [shape: f32[16,896], index: 16, kind: output, shape index: {}]  }
   0x1   :  { %5267 = sst [smem:[#allocation27_spill]] %s5247_s0 }
   0x2   :  { %5268 = sst [smem:[#allocation28_spill]] %s5263_s16 }
   0x3   :  { %21 = vsyncpa [#allocation3], 0 }
   0x4   :  { %22 = vsyncpa [#allocation6], 0 }
   0x5   :  { %23 = vsyncpa [#allocation9], 0 }
   0x6   :  { %24 = vsyncpa [#allocation12], 0 }
   0x7   :  { %25 = vsyncpa [#allocation15], 0 }
   0x8   :  { %26 = vsyncpa [#allocation18], 0 }
   0x9   :  { %27 = vsyncpa [#allocation4], 0  ;;  %s4618_s21 = smov [#allocation5]   ;;  %s4362_s25 = scalar_lea.hbm %s5248_s1, 1024 }
   0xa   :  { %s45_s22 = sshll.u32 %s4618_s21, 4  ;;  %p4363_p0 = scmp.ne.s32.totalorder %s5248_s1, %s4362_s25  ;;  %s46_s22 = int_to_ptr.vmem [resolvable:$true] %s45_s22 }
   0xb   :  { %p4366_p1 = scmp.lt.u32.totalorder %s4362_s25, %s5248_s1 }
   0xd   :  { %p4368_p2 = pnand %p4366_p1, %p4363_p0 }
   0xf   :  { %4371 = shalt.err (!%p4368_p2)
}
  0x10   :  { %s4372_s30 = scalar_lea.vmem %s46_s22, 1024  ;;  %p4377_p4 = scmp.lt.s32.totalorder %s46_s22, %s46_s22 }
  0x11   :  { %p4373_p3 = scmp.ne.s32.totalorder %s46_s22, %s4372_s30  ;;  %p4378_p5 = scmp.lt.s32.totalorder %s4372_s30, %s4372_s30 }
  0x13   :  { %p4379_p6 = por %p4378_p5, %p4377_p4 }
  0x15   :  { %p4380_p7 = pnand %p4379_p6, %p4373_p3 }
  0x17   :  { %4383 = shalt.err (!%p4380_p7)
}
  0x18   :  { %s5266_s0 = smov 64   ;;  %s4620_s17 = smov 4  }
  0x19   :  { %51 = dma.hbm_to_vmem [thread:$0]  %s5248_s1, 1024, %s46_s22, [#allocation6], %s5266_s0, %s5266_s0, %s4620_s17  }
  0x1a   :  { %s4621_s20 = smov [#allocation8]   ;;  %s4622_s23 = smov [#allocation11]  }
  0x1b   :  { %s67_s21 = sshll.u32 %s4621_s20, 4  ;;  %s91_s24 = sshll.u32 %s4622_s23, 4  ;;  %s68_s21 = int_to_ptr.vmem [resolvable:$true] %s67_s21  ;;  %s92_s24 = int_to_ptr.vmem [resolvable:$true] %s91_s24 }
  0x1c   :  { %s4384_s27 = scalar_lea.hbm %s5250_s3, 2048 }
  0x1d   :  { %p4385_p8 = scmp.ne.s32.totalorder %s5250_s3, %s4384_s27  ;;  %p4388_p9 = scmp.lt.u32.totalorder %s4384_s27, %s5250_s3 }
  0x1f   :  { %p4390_p10 = pnand %p4388_p9, %p4385_p8 }
  0x21   :  { %4393 = shalt.err (!%p4390_p10)
}
  0x22   :  { %s4394_s1 = scalar_lea.vmem %s68_s21, 2048  ;;  %p4399_p12 = scmp.lt.s32.totalorder %s68_s21, %s68_s21 }
  0x23   :  { %p4395_p11 = scmp.ne.s32.totalorder %s68_s21, %s4394_s1  ;;  %p4400_p13 = scmp.lt.s32.totalorder %s4394_s1, %s4394_s1 }
  0x25   :  { %p4401_p0 = por %p4400_p13, %p4399_p12 }
  0x27   :  { %p4402_p1 = pnand %p4401_p0, %p4395_p11 }
  0x29   :  { %4405 = shalt.err (!%p4402_p1)
}
  0x2a   :  { %s4623_s22 = smov 128   ;;  %s4624_s17 = smov 8  }
  0x2b   :  { %73 = dma.hbm_to_vmem [thread:$0]  %s5250_s3, 2048, %s68_s21, [#allocation9], %s4623_s22, %s4623_s22, %s4624_s17  }
  0x2c   :  { %s4406_s23 = scalar_lea.hbm %s5253_s6, 8192 }
  0x2d   :  { %p4407_p2 = scmp.ne.s32.totalorder %s5253_s6, %s4406_s23  ;;  %p4410_p3 = scmp.lt.u32.totalorder %s4406_s23, %s5253_s6 }
  0x2f   :  { %p4412_p4 = pnand %p4410_p3, %p4407_p2 }
  0x31   :  { %4415 = shalt.err (!%p4412_p4)
}
  0x32   :  { %s4416_s29 = scalar_lea.vmem %s92_s24, 8192  ;;  %p4421_p6 = scmp.lt.s32.totalorder %s92_s24, %s92_s24 }
  0x33   :  { %p4417_p5 = scmp.ne.s32.totalorder %s92_s24, %s4416_s29  ;;  %p4422_p7 = scmp.lt.s32.totalorder %s4416_s29, %s4416_s29 }
  0x35   :  { %p4423_p8 = por %p4422_p7, %p4421_p6 }
  0x37   :  { %p4424_p9 = pnand %p4423_p8, %p4417_p5 }
  0x39   :  { %4427 = shalt.err (!%p4424_p9)
}
  0x3a   :  { %s4625_s3 = smov 256   ;;  %s4626_s21 = smov 16  }
  0x3b   :  { %97 = dma.hbm_to_vmem [thread:$0]  %s5253_s6, 8192, %s92_s24, [#allocation12], %s4625_s3, %s4625_s3, %s4626_s21  }
  0x3c   :  { %s4627_s18 = smov [#allocation14]   ;;  %s4628_s16 = smov [#allocation2]  }
  0x3d   :  { %s114_s19 = sshll.u32 %s4627_s18, 4  ;;  %s33_s20 = sshll.u32 %s4628_s16, 4  ;;  %s115_s19 = int_to_ptr.vmem [resolvable:$true] %s114_s19  ;;  %s34_s20 = int_to_ptr.vmem [resolvable:$true] %s33_s20 }
  0x3e   :  { %s4428_s26 = scalar_lea.hbm %s5255_s8, 64 }
  0x3f   :  { %p4429_p10 = scmp.ne.s32.totalorder %s5255_s8, %s4428_s26  ;;  %p4432_p11 = scmp.lt.u32.totalorder %s4428_s26, %s5255_s8 }
  0x41   :  { %p4434_p12 = pnand %p4432_p11, %p4429_p10 }
  0x43   :  { %4437 = shalt.err (!%p4434_p12)
}
  0x44   :  { %s4438_s6 = scalar_lea.vmem %s115_s19, 64  ;;  %p4443_p0 = scmp.lt.s32.totalorder %s115_s19, %s115_s19 }
  0x45   :  { %p4439_p13 = scmp.ne.s32.totalorder %s115_s19, %s4438_s6  ;;  %p4444_p1 = scmp.lt.s32.totalorder %s4438_s6, %s4438_s6 }
  0x47   :  { %p4445_p2 = por %p4444_p1, %p4443_p0 }
  0x49   :  { %p4446_p3 = pnand %p4445_p2, %p4439_p13 }
  0x4b   :  { %4449 = shalt.err (!%p4446_p3)
}
  0x4c   :  { %117 = dma.hbm_to_vmem [thread:$0]  %s5255_s8, 64, %s115_s19, [#allocation15]  }
  0x4d   :  { %s5269_s1 = sld [smem:[#allocation27_spill]] }
  0x53   :  { %s4450_s18 = scalar_lea.hbm %s5269_s1, 256 }
  0x54   :  { %p4451_p4 = scmp.ne.s32.totalorder %s5269_s1, %s4450_s18  ;;  %p4454_p5 = scmp.lt.u32.totalorder %s4450_s18, %s5269_s1 }
  0x56   :  { %p4456_p6 = pnand %p4454_p5, %p4451_p4 }
  0x58   :  { %4459 = shalt.err (!%p4456_p6)
}
  0x59   :  { %s4460_s26 = scalar_lea.vmem %s34_s20, 256  ;;  %p4465_p8 = scmp.lt.s32.totalorder %s34_s20, %s34_s20 }
  0x5a   :  { %p4461_p7 = scmp.ne.s32.totalorder %s34_s20, %s4460_s26  ;;  %p4466_p9 = scmp.lt.s32.totalorder %s4460_s26, %s4460_s26 }
  0x5c   :  { %p4467_p10 = por %p4466_p9, %p4465_p8 }
  0x5e   :  { %p4468_p11 = pnand %p4467_p10, %p4461_p7 }
  0x60   :  { %4471 = shalt.err (!%p4468_p11)
}
  0x61   :  { %39 = dma.hbm_to_vmem [thread:$0]  %s5269_s1, 256, %s34_s20, [#allocation3], %s4623_s22, %s4623_s22, %s4624_s17  }
  0x62   :  { %s4629_s27 = smov [#allocation7]   ;;  %s4630_s29 = smov [#allocation10]  }
  0x63   :  { %s58_s28 = sshll.u32 %s4629_s27, 4  ;;  %s82_s6 = sshll.u32 %s4630_s29, 4  ;;  %s59_s28 = int_to_ptr.vmem [resolvable:$true] %s58_s28  ;;  %s83_s6 = int_to_ptr.vmem [resolvable:$true] %s82_s6 }
  0x64   :  { %s4472_s21 = scalar_lea.hbm %s5249_s2, 16 }
  0x65   :  { %p4473_p12 = scmp.ne.s32.totalorder %s5249_s2, %s4472_s21  ;;  %p4476_p13 = scmp.lt.u32.totalorder %s4472_s21, %s5249_s2 }
  0x67   :  { %p4478_p0 = pnand %p4476_p13, %p4473_p12 }
  0x69   :  { %4481 = shalt.err (!%p4478_p0)
}
  0x6a   :  { %s4482_s22 = scalar_lea.vmem %s59_s28, 16  ;;  %s4486_s17 = scalar_lea.vmem %s59_s28, 32 }
  0x6b   :  { %p4483_p1 = scmp.ne.s32.totalorder %s59_s28, %s4482_s22  ;;  %p4487_p2 = scmp.lt.s32.totalorder %s59_s28, %s59_s28 }
  0x6c   :  { %p4488_p3 = scmp.lt.s32.totalorder %s4486_s17, %s4482_s22 }
  0x6e   :  { %p4489_p4 = por %p4488_p3, %p4487_p2 }
  0x70   :  { %p4490_p5 = pnand %p4489_p4, %p4483_p1 }
  0x72   :  { %4493 = shalt.err (!%p4490_p5)
}
  0x73   :  { %61 = dma.hbm_to_vmem [thread:$0]  %s5249_s2, 16, %s59_s28, [#allocation6]  }
  0x74   :  { %s4494_s26 = scalar_lea.hbm %s5252_s5, 32 }
  0x75   :  { %p4495_p6 = scmp.ne.s32.totalorder %s5252_s5, %s4494_s26  ;;  %p4498_p7 = scmp.lt.u32.totalorder %s4494_s26, %s5252_s5 }
  0x77   :  { %p4500_p8 = pnand %p4498_p7, %p4495_p6 }
  0x79   :  { %4503 = shalt.err (!%p4500_p8)
}
  0x7a   :  { %s4504_s24 = scalar_lea.vmem %s83_s6, 32  ;;  %p4509_p10 = scmp.lt.s32.totalorder %s83_s6, %s83_s6 }
  0x7b   :  { %p4505_p9 = scmp.ne.s32.totalorder %s83_s6, %s4504_s24  ;;  %p4510_p11 = scmp.lt.s32.totalorder %s4504_s24, %s4504_s24 }
  0x7d   :  { %p4511_p12 = por %p4510_p11, %p4509_p10 }
  0x7f   :  { %p4512_p13 = pnand %p4511_p12, %p4505_p9 }
  0x81   :  { %4515 = shalt.err (!%p4512_p13)
}
  0x82   :  { %85 = dma.hbm_to_vmem [thread:$0]  %s5252_s5, 32, %s83_s6, [#allocation9]  }
  0x83   :  { %s4631_s3 = smov [#allocation13]   ;;  %s4632_s30 = smov [#allocation16]  }
  0x84   :  { %s104_s21 = sshll.u32 %s4631_s3, 4  ;;  %s123_s18 = sshll.u32 %s4632_s30, 4  ;;  %s105_s21 = int_to_ptr.vmem [resolvable:$true] %s104_s21  ;;  %s124_s18 = int_to_ptr.vmem [resolvable:$true] %s123_s18 }
  0x85   :  { %s4516_s22 = scalar_lea.hbm %s5254_s7, 64 }
  0x86   :  { %p4517_p0 = scmp.ne.s32.totalorder %s5254_s7, %s4516_s22  ;;  %p4520_p1 = scmp.lt.u32.totalorder %s4516_s22, %s5254_s7 }
  0x88   :  { %p4522_p2 = pnand %p4520_p1, %p4517_p0 }
  0x8a   :  { %4525 = shalt.err (!%p4522_p2)
}
  0x8b   :  { %s4526_s5 = scalar_lea.vmem %s105_s21, 64  ;;  %p4531_p4 = scmp.lt.s32.totalorder %s105_s21, %s105_s21 }
  0x8c   :  { %p4527_p3 = scmp.ne.s32.totalorder %s105_s21, %s4526_s5  ;;  %p4532_p5 = scmp.lt.s32.totalorder %s4526_s5, %s4526_s5 }
  0x8e   :  { %p4533_p6 = por %p4532_p5, %p4531_p4 }
  0x90   :  { %p4534_p7 = pnand %p4533_p6, %p4527_p3 }
  0x92   :  { %4537 = shalt.err (!%p4534_p7)
}
  0x93   :  { %107 = dma.hbm_to_vmem [thread:$0]  %s5254_s7, 64, %s105_s21, [#allocation12]  }
  0x94   :  { %s4538_s19 = scalar_lea.hbm %s5256_s9, 16384 }
  0x95   :  { %p4539_p8 = scmp.ne.s32.totalorder %s5256_s9, %s4538_s19  ;;  %p4542_p9 = scmp.lt.u32.totalorder %s4538_s19, %s5256_s9 }
  0x97   :  { %p4544_p10 = pnand %p4542_p9, %p4539_p8 }
  0x99   :  { %4547 = shalt.err (!%p4544_p10)
}
  0x9a   :  { %s4548_s28 = scalar_lea.vmem %s124_s18, 16384  ;;  %p4553_p12 = scmp.lt.s32.totalorder %s124_s18, %s124_s18 }
  0x9b   :  { %p4549_p11 = scmp.ne.s32.totalorder %s124_s18, %s4548_s28  ;;  %p4554_p13 = scmp.lt.s32.totalorder %s4548_s28, %s4548_s28 }
  0x9d   :  { %p4555_p0 = por %p4554_p13, %p4553_p12 }
  0x9f   :  { %p4556_p1 = pnand %p4555_p0, %p4549_p11 }
  0xa1   :  { %4559 = shalt.err (!%p4556_p1)
}
  0xa2   :  { %s4633_s7 = smov 1024   ;;  %s5270_s3 = smov 64  }
  0xa3   :  { %129 = dma.hbm_to_vmem [thread:$0]  %s5256_s9, 16384, %s124_s18, [#allocation15], %s4633_s7, %s4633_s7, %s5270_s3  }
  0xa4   :  { %s4634_s0 = smov [#allocation17]   ;;  %s4560_s20 = scalar_lea.hbm %s5260_s13, 28672 }
  0xa5   :  { %s141_s16 = sshll.u32 %s4634_s0, 4  ;;  %p4561_p2 = scmp.ne.s32.totalorder %s5260_s13, %s4560_s20  ;;  %s142_s16 = int_to_ptr.vmem [resolvable:$true] %s141_s16 }
  0xa6   :  { %p4564_p3 = scmp.lt.u32.totalorder %s4560_s20, %s5260_s13 }
  0xa8   :  { %p4566_p4 = pnand %p4564_p3, %p4561_p2 }
  0xaa   :  { %4569 = shalt.err (!%p4566_p4)
}
  0xab   :  { %s4570_s25 = scalar_lea.vmem %s142_s16, 28672  ;;  %p4575_p6 = scmp.lt.s32.totalorder %s142_s16, %s142_s16 }
  0xac   :  { %p4571_p5 = scmp.ne.s32.totalorder %s142_s16, %s4570_s25  ;;  %p4576_p7 = scmp.lt.s32.totalorder %s4570_s25, %s4570_s25 }
  0xae   :  { %p4577_p8 = por %p4576_p7, %p4575_p6 }
  0xb0   :  { %p4578_p9 = pnand %p4577_p8, %p4571_p5 }
  0xb2   :  { %4581 = shalt.err (!%p4578_p9)
}
  0xb3   :  { %s4635_s9 = smov 896   ;;  %s4636_s18 = smov 56  }
  0xb4   :  { %147 = dma.hbm_to_vmem [thread:$0]  %s5260_s13, 28672, %s142_s16, [#allocation18], %s4635_s9, %s4635_s9, %s4636_s18  }
  0xb5   :  { %4604 = dma.done.wait [#allocation3], 256  }
  0xb6   :  { %4605 = vsyncadd [#allocation3], 4294967040 }
  0xb7   :  { %4606 = dma.done.wait [#allocation6], 1040  }
  0xb8   :  { %4607 = vsyncadd [#allocation6], 4294966256 }
  0xb9   :  { %4608 = dma.done.wait [#allocation9], 2080  }
  0xba   :  { %4609 = vsyncadd [#allocation9], 4294965216 }
  0xbb   :  { %4610 = dma.done.wait [#allocation12], 8256  }
  0xbc   :  { %4611 = vsyncadd [#allocation12], 4294959040 }
  0xbd   :  { %4612 = dma.done.wait [#allocation15], 16448  }
  0xbe   :  { %4613 = vsyncadd [#allocation15], 4294950848 }
  0xbf   :  { %4614 = dma.done.wait [#allocation18], 28672  }
  0xc0   :  { %4615 = vsyncadd [#allocation18], 4294938624  ;;  %v4637_v0 = vmov 0.0   ;;  %vm4638_vm0 = vmmov 0   ;;  %v4178_v1 = vld [vmem:[#allocation5] sm:$0xff]   ;;  %v4179_v2 = vld [vmem:[#allocation5 + $0x8] sm:$0xff]  }
  0xc1   :  { %4082 = vmatprep.subr.bf16.mxu0 %v4637_v0  ;;  %4098 = vmatprep.mubr.msk.bf16.mxu0 %vm4638_vm0, %v4637_v0  ;;  %v4180_v3 = vld [vmem:[#allocation5 + $0x10] sm:$0xff]   ;;  %v4181_v4 = vld [vmem:[#allocation5 + $0x18] sm:$0xff]   ;;  %v4188_v6 = vld [vmem:[#allocation8] ss:$8 sps:$4 sm:$0xff]   ;;  %v4639_v28 = vmov 0  }
  0xc2   :  { %4083 = vmatpush3.bf16.msra.mxu0 %v4178_v1  ;;  %v4186_v5 = vld [vmem:[#allocation8 + $0x4] ss:$8 sps:$4 sm:$0xff]   ;;  %v4189_v7 = vld [vmem:[#allocation8 + $0x14] ss:$8 sps:$4 sm:$0xff]   ;;  %v4191_v8 = vld [vmem:[#allocation8 + $0x10] ss:$8 sps:$4 sm:$0xff]   ;;  %431 = vmatprep.mubr.bf16.mxu1 %v4639_v28 }
  0xc3   :  { %4084 = vmatprep.subr.bf16.mxu0 %v4637_v0  ;;  %399 = vmatprep.subr.bf16.mxu1 %v4186_v5  ;;  %v4192_v9 = vld [vmem:[#allocation8 + $0x24] ss:$8 sps:$4 sm:$0xff]   ;;  %v4194_v12 = vld [vmem:[#allocation8 + $0x20] ss:$8 sps:$4 sm:$0xff]   ;;  %v4195_v13 = vld [vmem:[#allocation8 + $0x34] ss:$8 sps:$4 sm:$0xff]  }
  0xc4   :  { %400 = vmatpush1.bf16.msra.mxu1 %v4188_v6  ;;  %v4182_v10 = vld [vmem:[#allocation5 + $0x20] sm:$0xff]   ;;  %v4183_v11 = vld [vmem:[#allocation5 + $0x28] sm:$0xff]   ;;  %v4197_v14 = vld [vmem:[#allocation8 + $0x30] ss:$8 sps:$4 sm:$0xff]  }
  0xc5   :  { %401 = vmatprep.subr.bf16.mxu1 %v4189_v7  ;;  %v4198_v15 = vld [vmem:[#allocation8 + $0x44] ss:$8 sps:$4 sm:$0xff]   ;;  %v4200_v17 = vld [vmem:[#allocation8 + $0x40] ss:$8 sps:$4 sm:$0xff]   ;;  %v4201_v18 = vld [vmem:[#allocation8 + $0x54] ss:$8 sps:$4 sm:$0xff]  }
  0xc6   :  { %4085 = vmatpush3.bf16.msra.mxu0 %v4179_v2  ;;  %v4184_v16 = vld [vmem:[#allocation5 + $0x30] sm:$0xff]   ;;  %v4185_v19 = vld [vmem:[#allocation5 + $0x38] sm:$0xff]   ;;  %v4206_v25 = vld [vmem:[#allocation8 + $0x60] ss:$8 sps:$4 sm:$0xff]  }
  0xc7   :  { %4086 = vmatprep.subr.bf16.mxu0 %v4637_v0  ;;  %v183_v20 = vld [vmem:[#allocation2] sm:$0xff]  ;;  %v184_v21 = vld [vmem:[#allocation2 + $0x8] sm:$0xff]  ;;  %v3896_v29 = vld [vmem:[#allocation7] ss:$0 sm:$0xff] }
  0xc8   :  { %402 = vmatpush1.bf16.msra.mxu1 %v4191_v8  ;;  %v185_v22 = vpack.c.bf16 %v184_v21, %v183_v20  ;;  %v4203_v23 = vld [vmem:[#allocation8 + $0x50] ss:$8 sps:$4 sm:$0xff]   ;;  %v4204_v24 = vld [vmem:[#allocation8 + $0x64] ss:$8 sps:$4 sm:$0xff]   ;;  %v4207_v26 = vld [vmem:[#allocation8 + $0x74] ss:$8 sps:$4 sm:$0xff]  }
  0xc9   :  { %403 = vmatprep.subr.bf16.mxu1 %v4192_v9  ;;  %v4209_v27 = vld [vmem:[#allocation8 + $0x70] ss:$8 sps:$4 sm:$0xff]  }
  0xca   :  { %4087 = vmatpush3.bf16.msra.mxu0 %v4180_v3  ;;  %v4212_v41 = vld [vmem:[#allocation11 + $0x4] ss:$16 sps:$4 sm:$0xff]   ;;  %v4210_v42 = vld [vmem:[#allocation11] ss:$16 sps:$4 sm:$0xff]   ;;  %v4260_v9 = vld [vmem:[#allocation11 + $0xc] ss:$16 sps:$4 sm:$0xff]  }
  0xcb   :  { %4088 = vmatprep.subr.bf16.mxu0 %v4637_v0  ;;  %v4215_v43 = vld [vmem:[#allocation11 + $0x24] ss:$16 sps:$4 sm:$0xff]   ;;  %v4213_v44 = vld [vmem:[#allocation11 + $0x20] ss:$16 sps:$4 sm:$0xff]  }
  0xcc   :  { %404 = vmatpush1.bf16.msra.mxu1 %v4194_v12  ;;  %v4218_v45 = vld [vmem:[#allocation11 + $0x44] ss:$16 sps:$4 sm:$0xff]   ;;  %v4216_v46 = vld [vmem:[#allocation11 + $0x40] ss:$16 sps:$4 sm:$0xff]  }
  0xcd   :  { %405 = vmatprep.subr.bf16.mxu1 %v4195_v13  ;;  %v4221_v47 = vld [vmem:[#allocation11 + $0x64] ss:$16 sps:$4 sm:$0xff]   ;;  %v4219_v48 = vld [vmem:[#allocation11 + $0x60] ss:$16 sps:$4 sm:$0xff]  }
  0xce   :  { %4089 = vmatpush3.bf16.msra.mxu0 %v4181_v4  ;;  %v4224_v49 = vld [vmem:[#allocation11 + $0x84] ss:$16 sps:$4 sm:$0xff]   ;;  %v4222_v50 = vld [vmem:[#allocation11 + $0x80] ss:$16 sps:$4 sm:$0xff]  }
  0xcf   :  { %4090 = vmatprep.subr.bf16.mxu0 %v4637_v0  ;;  %v4227_v51 = vld [vmem:[#allocation11 + $0xa4] ss:$16 sps:$4 sm:$0xff]   ;;  %v4225_v52 = vld [vmem:[#allocation11 + $0xa0] ss:$16 sps:$4 sm:$0xff]  }
  0xd0   :  { %406 = vmatpush1.bf16.msra.mxu1 %v4197_v14  ;;  %v4230_v53 = vld [vmem:[#allocation11 + $0xc4] ss:$16 sps:$4 sm:$0xff]   ;;  %v4228_v54 = vld [vmem:[#allocation11 + $0xc0] ss:$16 sps:$4 sm:$0xff]  }
  0xd1   :  { %407 = vmatprep.subr.bf16.mxu1 %v4198_v15  ;;  %v4233_v55 = vld [vmem:[#allocation11 + $0xe4] ss:$16 sps:$4 sm:$0xff]   ;;  %v4231_v56 = vld [vmem:[#allocation11 + $0xe0] ss:$16 sps:$4 sm:$0xff]  }
  0xd2   :  { %4091 = vmatpush3.bf16.msra.mxu0 %v4182_v10  ;;  %v4236_v57 = vld [vmem:[#allocation11 + $0x104] ss:$16 sps:$4 sm:$0xff]   ;;  %v4234_v58 = vld [vmem:[#allocation11 + $0x100] ss:$16 sps:$4 sm:$0xff]  }
  0xd3   :  { %4092 = vmatprep.subr.bf16.mxu0 %v4637_v0  ;;  %v4239_v59 = vld [vmem:[#allocation11 + $0x124] ss:$16 sps:$4 sm:$0xff]   ;;  %v4237_v60 = vld [vmem:[#allocation11 + $0x120] ss:$16 sps:$4 sm:$0xff]  }
  0xd4   :  { %408 = vmatpush1.bf16.msra.mxu1 %v4200_v17  ;;  %v4242_v61 = vld [vmem:[#allocation11 + $0x144] ss:$16 sps:$4 sm:$0xff]   ;;  %v4240_v62 = vld [vmem:[#allocation11 + $0x140] ss:$16 sps:$4 sm:$0xff]  }
  0xd5   :  { %409 = vmatprep.subr.bf16.mxu1 %v4201_v18  ;;  %v4245_v63 = vld [vmem:[#allocation11 + $0x164] ss:$16 sps:$4 sm:$0xff]   ;;  %v4246_v2 = vld [vmem:[#allocation11 + $0x180] ss:$16 sps:$4 sm:$0xff]  }
  0xd6   :  { %4093 = vmatpush3.bf16.msra.mxu0 %v4183_v11  ;;  %v4248_v1 = vld [vmem:[#allocation11 + $0x184] ss:$16 sps:$4 sm:$0xff]   ;;  %v4249_v4 = vld [vmem:[#allocation11 + $0x1a0] ss:$16 sps:$4 sm:$0xff]  }
  0xd7   :  { %4094 = vmatprep.subr.bf16.mxu0 %v4637_v0  ;;  %v4251_v3 = vld [vmem:[#allocation11 + $0x1a4] ss:$16 sps:$4 sm:$0xff]   ;;  %v4252_v6 = vld [vmem:[#allocation11 + $0x1c0] ss:$16 sps:$4 sm:$0xff]  }
  0xd8   :  { %410 = vmatpush1.bf16.msra.mxu1 %v4203_v23  ;;  %v4254_v5 = vld [vmem:[#allocation11 + $0x1c4] ss:$16 sps:$4 sm:$0xff]   ;;  %v4255_v7 = vld [vmem:[#allocation11 + $0x1e0] ss:$16 sps:$4 sm:$0xff]  }
  0xd9   :  { %411 = vmatprep.subr.bf16.mxu1 %v4204_v24  ;;  %v4257_v8 = vld [vmem:[#allocation11 + $0x1e4] ss:$16 sps:$4 sm:$0xff]  }
  0xda   :  { %4095 = vmatpush3.bf16.msra.mxu0 %v4184_v16 }
  0xdb   :  { %4096 = vmatprep.subr.bf16.mxu0 %v4637_v0  ;;  %v4243_v0 = vld [vmem:[#allocation11 + $0x160] ss:$16 sps:$4 sm:$0xff]  }
  0xdc   :  { %412 = vmatpush1.bf16.msra.mxu1 %v4206_v25 }
  0xdd   :  { %413 = vmatprep.subr.bf16.mxu1 %v4207_v26 }
  0xde   :  { %4097 = vmatpush3.bf16.msra.mxu0 %v4185_v19 }
  0xe0   :  { %414 = vmatpush1.bf16.msra.mxu1 %v4209_v27 }
  0xe1   :  { %4099 = vmatmul.mubr.bf16.vlgmr.msra.gmra.mrb[0].mxu0 %v185_v22  ;;  %931 = vmatprep.subr.bf16.mxu1 %v4212_v41 }
 0x1b4   :  { %v291_v30 = vpop.f32.mrb[0].mxu0 }
 0x1b5   :  { %v292_v31 = vadd.f32 %v3896_v29, %v291_v30  ;;  %v4100_v32 = vpop.f32.mrb[1].mxu0 }
 0x1b6   :  { %v294_v33 = vpop.f32.mrb[2].mxu0 }
 0x1b7   :  { %v298_v34 = vmul.f32 0.2, %v292_v31  ;;  %v295_v35 = vadd.f32 %v3896_v29, %v294_v33  ;;  %v4101_v36 = vpop.f32.mrb[3].mxu0 }
 0x1b9   :  { %v299_v37 = vmul.f32 0.2, %v295_v35  ;;  %v300_v38 = vmax.f32 %v292_v31, %v298_v34 }
 0x1bb   :  { %v301_v39 = vmax.f32 %v295_v35, %v299_v37 }
 0x1bd   :  { %v302_v40 = vpack.c.bf16 %v301_v39, %v300_v38 }
 0x1bf   :  { %432 = vmatmul.mubr.bf16.vlgmr.msra.gmra.mrb[0].mxu1 %v302_v40 }
 0x1c0   :  { %932 = vmatpush1.bf16.msra.mxu1 %v4210_v42 }
 0x1c1   :  { %933 = vmatprep.subr.bf16.mxu1 %v4215_v43 }
 0x1c4   :  { %934 = vmatpush1.bf16.msra.mxu1 %v4213_v44 }
 0x1c5   :  { %935 = vmatprep.subr.bf16.mxu1 %v4218_v45 }
 0x1c8   :  { %936 = vmatpush1.bf16.msra.mxu1 %v4216_v46 }
 0x1c9   :  { %937 = vmatprep.subr.bf16.mxu1 %v4221_v47 }
 0x1cc   :  { %938 = vmatpush1.bf16.msra.mxu1 %v4219_v48 }
 0x1cd   :  { %939 = vmatprep.subr.bf16.mxu1 %v4224_v49 }
 0x1d0   :  { %940 = vmatpush1.bf16.msra.mxu1 %v4222_v50 }
 0x1d1   :  { %941 = vmatprep.subr.bf16.mxu1 %v4227_v51 }
 0x1d4   :  { %942 = vmatpush1.bf16.msra.mxu1 %v4225_v52 }
 0x1d5   :  { %943 = vmatprep.subr.bf16.mxu1 %v4230_v53 }
 0x1d8   :  { %944 = vmatpush1.bf16.msra.mxu1 %v4228_v54 }
 0x1d9   :  { %945 = vmatprep.subr.bf16.mxu1 %v4233_v55 }
 0x1dc   :  { %946 = vmatpush1.bf16.msra.mxu1 %v4231_v56  ;;  %v4640_v56 = vmov 1966171168  }
 0x1dd   :  { %947 = vmatprep.subr.bf16.mxu1 %v4236_v57  ;;  %v492_v57 = vunpack.c.l.s4 %v4640_v56  ;;  %v4297_v56 = vld [vmem:[#allocation11 + $0x1a8] ss:$16 sps:$4 sm:$0xff]  }
 0x1e0   :  { %948 = vmatpush1.bf16.msra.mxu1 %v4234_v58  ;;  %v494_v58 = vlaneseq }
 0x1e1   :  { %949 = vmatprep.subr.bf16.mxu1 %v4239_v59  ;;  %v493_v59 = vunpack.c.0.s8 %v492_v57  ;;  %v4302_v57 = vld [vmem:[#allocation11 + $0x1cc] ss:$16 sps:$4 sm:$0xff]  }
 0x1e4   :  { %950 = vmatpush1.bf16.msra.mxu1 %v4237_v60  ;;  %v4859_v60 = vshrl.u32 %v494_v58, 7  ;;  %v4300_v58 = vld [vmem:[#allocation11 + $0x1c8] ss:$16 sps:$4 sm:$0xff]  }
 0x1e5   :  { %951 = vmatprep.subr.bf16.mxu1 %v4242_v61 }
 0x1e8   :  { %952 = vmatpush1.bf16.msra.mxu1 %v4240_v62  ;;  %v4862_v62 = vsub.s32 %v493_v59, %v4859_v60  ;;  %v4305_v59 = vld [vmem:[#allocation11 + $0x1ec] ss:$16 sps:$4 sm:$0xff]  }
 0x1e9   :  { %953 = vmatprep.subr.bf16.mxu1 %v4245_v63 }
 0x1ec   :  { %954 = vmatpush1.bf16.msra.mxu1 %v4243_v0 }
 0x1ed   :  { %955 = vmatprep.subr.bf16.mxu1 %v4248_v1 }
 0x1f0   :  { %956 = vmatpush1.bf16.msra.mxu1 %v4246_v2  ;;  %v442_v2 = vld [vmem:[%s5251_s4] sm:$0x3] }
 0x1f1   :  { %957 = vmatprep.subr.bf16.mxu1 %v4251_v3 }
 0x1f4   :  { %958 = vmatpush1.bf16.msra.mxu1 %v4249_v4  ;;  %v4870_v4 = vsub.s32 0, %v4859_v60 }
 0x1f5   :  { %959 = vmatprep.subr.bf16.mxu1 %v4254_v5  ;;  %v4873_v5 = vsub.s32 1, %v4859_v60 }
 0x1f8   :  { %960 = vmatpush1.bf16.msra.mxu1 %v4252_v6  ;;  %v443_v6 = vld [vmem:[#allocation10] sm:$0x3] }
 0x1f9   :  { %961 = vmatprep.subr.bf16.mxu1 %v4257_v8 }
 0x1fc   :  { %962 = vmatpush1.bf16.msra.mxu1 %v4255_v7 }
 0x1fd   :  { %974 = vmatprep.subr.bf16.mxu1 %v4260_v9 }
 0x292   :  { %v433_v10 = vpop.f32.mrb[0].mxu1 }
 0x293   :  { %v435_v11 = vpop.f32.mrb[1].mxu1 }
 0x294   :  { %v437_v12 = vpop.f32.mrb[2].mxu1 }
 0x295   :  { %v444_v13 = vadd.f32 %v437_v12, %v433_v10  ;;  %v439_v14 = vpop.f32.mrb[3].mxu1 }
 0x296   :  { %v451_v15 = vadd.f32 %v439_v14, %v435_v11 }
 0x297   :  { %v445_v16 = vrot.slane %v444_v13, 4 }
 0x298   :  { %v452_v17 = vrot.slane %v451_v15, 4 }
 0x299   :  { %v446_v18 = vadd.f32 %v445_v16, %v444_v13 }
 0x29a   :  { %v453_v19 = vadd.f32 %v452_v17, %v451_v15 }
 0x29b   :  { %v447_v20 = vrot.slane %v446_v18, 2 }
 0x29c   :  { %v454_v21 = vrot.slane %v453_v19, 2 }
 0x29d   :  { %v448_v22 = vadd.f32 %v447_v20, %v446_v18 }
 0x29e   :  { %v455_v23 = vadd.f32 %v454_v21, %v453_v19 }
 0x29f   :  { %v449_v24 = vrot.slane %v448_v22, 1 }
 0x2a0   :  { %v456_v25 = vrot.slane %v455_v23, 1 }
 0x2a1   :  { %v450_v26 = vadd.f32 %v449_v24, %v448_v22 }
 0x2a2   :  { %v457_v27 = vadd.f32 %v456_v25, %v455_v23 }
 0x2a3   :  { %v458_v28 = vmul.f32 0.0625, %v450_v26 }
 0x2a4   :  { %v459_v29 = vmul.f32 0.0625, %v457_v27 }
 0x2a5   :  { %v460_v30 = vsub.f32 %v433_v10, %v458_v28  ;;  %v462_v31 = vsub.f32 %v437_v12, %v458_v28  ;;  %v526_v10 = vrot.slane %v443_v6, %v4870_v4 }
 0x2a6   :  { %v461_v32 = vsub.f32 %v435_v11, %v459_v29  ;;  %v463_v33 = vsub.f32 %v439_v14, %v459_v29  ;;  %v530_v11 = vrot.slane %v443_v6, %v4873_v5  ;;  %v4258_v29 = vld [vmem:[#allocation11 + $0x8] ss:$16 sps:$4 sm:$0xff]  }
 0x2a7   :  { %v464_v34 = vmul.f32 %v460_v30, %v460_v30  ;;  %v466_v35 = vmul.f32 %v462_v31, %v462_v31  ;;  %v1213_v6 = vld [vmem:[#allocation16 + $0x10] sm:$0xff] }
 0x2a8   :  { %v465_v36 = vmul.f32 %v461_v32, %v461_v32  ;;  %v467_v37 = vmul.f32 %v463_v33, %v463_v33 }
 0x2a9   :  { %v468_v38 = vadd.f32 %v466_v35, %v464_v34  ;;  %v4269_v35 = vld [vmem:[#allocation11 + $0x6c] ss:$16 sps:$4 sm:$0xff]  }
 0x2aa   :  { %v475_v39 = vadd.f32 %v467_v37, %v465_v36  ;;  %v4267_v36 = vld [vmem:[#allocation11 + $0x68] ss:$16 sps:$4 sm:$0xff]   ;;  %v4272_v37 = vld [vmem:[#allocation11 + $0x8c] ss:$16 sps:$4 sm:$0xff]  }
 0x2ab   :  { %v469_v40 = vrot.slane %v468_v38, 4 }
 0x2ac   :  { %v476_v41 = vrot.slane %v475_v39, 4 }
 0x2ad   :  { %v470_v42 = vadd.f32 %v469_v40, %v468_v38  ;;  %v4270_v38 = vld [vmem:[#allocation11 + $0x88] ss:$16 sps:$4 sm:$0xff]  }
 0x2ae   :  { %v477_v43 = vadd.f32 %v476_v41, %v475_v39  ;;  %v4275_v39 = vld [vmem:[#allocation11 + $0xac] ss:$16 sps:$4 sm:$0xff]   ;;  %v4273_v40 = vld [vmem:[#allocation11 + $0xa8] ss:$16 sps:$4 sm:$0xff]  }
 0x2af   :  { %v471_v44 = vrot.slane %v470_v42, 2  ;;  %v4278_v41 = vld [vmem:[#allocation11 + $0xcc] ss:$16 sps:$4 sm:$0xff]  }
 0x2b0   :  { %v478_v45 = vrot.slane %v477_v43, 2 }
 0x2b1   :  { %v472_v46 = vadd.f32 %v471_v44, %v470_v42  ;;  %v4276_v42 = vld [vmem:[#allocation11 + $0xc8] ss:$16 sps:$4 sm:$0xff]  }
 0x2b2   :  { %v479_v47 = vadd.f32 %v478_v45, %v477_v43  ;;  %v4281_v43 = vld [vmem:[#allocation11 + $0xec] ss:$16 sps:$4 sm:$0xff]   ;;  %v4279_v44 = vld [vmem:[#allocation11 + $0xe8] ss:$16 sps:$4 sm:$0xff]  }
 0x2b3   :  { %v473_v48 = vrot.slane %v472_v46, 1  ;;  %v4284_v45 = vld [vmem:[#allocation11 + $0x10c] ss:$16 sps:$4 sm:$0xff]  }
 0x2b4   :  { %v480_v49 = vrot.slane %v479_v47, 1 }
 0x2b5   :  { %v474_v50 = vadd.f32 %v473_v48, %v472_v46  ;;  %v4282_v46 = vld [vmem:[#allocation11 + $0x108] ss:$16 sps:$4 sm:$0xff]  }
 0x2b6   :  { %v481_v51 = vadd.f32 %v480_v49, %v479_v47  ;;  %v4287_v47 = vld [vmem:[#allocation11 + $0x12c] ss:$16 sps:$4 sm:$0xff]   ;;  %v4285_v48 = vld [vmem:[#allocation11 + $0x128] ss:$16 sps:$4 sm:$0xff]  }
 0x2b7   :  { %v482_v52 = vmul.f32 0.0625, %v474_v50  ;;  %v4290_v49 = vld [vmem:[#allocation11 + $0x14c] ss:$16 sps:$4 sm:$0xff]   ;;  %v4288_v50 = vld [vmem:[#allocation11 + $0x148] ss:$16 sps:$4 sm:$0xff]  }
 0x2b8   :  { %v483_v53 = vmul.f32 0.0625, %v481_v51  ;;  %v4293_v51 = vld [vmem:[#allocation11 + $0x16c] ss:$16 sps:$4 sm:$0xff]  }
 0x2b9   :  { %v484_v54 = vadd.f32 0.8, %v482_v52  ;;  %v4291_v52 = vld [vmem:[#allocation11 + $0x168] ss:$16 sps:$4 sm:$0xff]  }
 0x2ba   :  { %v485_v55 = vadd.f32 0.8, %v483_v53  ;;  %v4296_v53 = vld [vmem:[#allocation11 + $0x18c] ss:$16 sps:$4 sm:$0xff]  }
 0x2bb   :  { %4306 = vrsqrt.f32 %v484_v54  ;;  %v4294_v54 = vld [vmem:[#allocation11 + $0x188] ss:$16 sps:$4 sm:$0xff]  }
 0x2bc   :  { %4308 = vrsqrt.f32 %v485_v55  ;;  %v4299_v55 = vld [vmem:[#allocation11 + $0x1ac] ss:$16 sps:$4 sm:$0xff]  }
 0x2c5   :  { %v4307_v61 = vpop.eup %4306 }
 0x2c6   :  { %v4309_v63 = vpop.eup %4308 }
 0x2c7   :  { %v490_v0 = vcombine.low %v4307_v61, %v4309_v63  ;;  %v4303_v61 = vld [vmem:[#allocation11 + $0x1e8] ss:$16 sps:$4 sm:$0xff]   ;;  %v1212_v63 = vld [vmem:[#allocation16 + $0x8] sm:$0xff] }
 0x2c9   :  { %v497_v1 = vrot.slane %v490_v0, %v4862_v62  ;;  %v1214_v0 = vld [vmem:[#allocation16 + $0x18] sm:$0xff] }
 0x2cb   :  { %v504_v3 = vrot.slane %v497_v1, %v4862_v62  ;;  %v1340_v1 = vunpack.c.l.s8.bf16 %v1212_v63 }
 0x2cd   :  { %v506_v7 = vmul.f32 %v504_v3, %v442_v2  ;;  %v1342_v2 = vunpack.c.l.s8.bf16 %v1214_v0  ;;  %v1211_v3 = vld [vmem:[#allocation16] sm:$0xff]  ;;  %1599 = vmatprep.subr.bf16.mxu0 %v1340_v1 }
 0x2cf   :  { %v511_v8 = vrot.slane %v506_v7, %v4870_v4  ;;  %v515_v9 = vrot.slane %v506_v7, %v4873_v5  ;;  %v1339_v7 = vunpack.c.l.s8.bf16 %v1211_v3 }
 0x2d1   :  { %v518_v12 = vmul.f32 %v511_v8, %v460_v30  ;;  %v519_v13 = vmul.f32 %v515_v9, %v461_v32  ;;  %v520_v14 = vmul.f32 %v511_v8, %v462_v31  ;;  %v521_v15 = vmul.f32 %v515_v9, %v463_v33  ;;  %v4263_v30 = vld [vmem:[#allocation11 + $0x2c] ss:$16 sps:$4 sm:$0xff]   ;;  %v4261_v31 = vld [vmem:[#allocation11 + $0x28] ss:$16 sps:$4 sm:$0xff]   ;;  %1600 = vmatpush1.bf16.msra.mxu0 %v1339_v7 }
 0x2d2   :  { %v4266_v32 = vld [vmem:[#allocation11 + $0x4c] ss:$16 sps:$4 sm:$0xff]   ;;  %v4264_v33 = vld [vmem:[#allocation11 + $0x48] ss:$16 sps:$4 sm:$0xff]   ;;  %v1341_v8 = vunpack.c.l.s8.bf16 %v1213_v6  ;;  %v1348_v9 = vunpack.c.h.s8.bf16 %v1212_v63  ;;  %v1252_v63 = vld [vmem:[#allocation16 + $0x148] sm:$0xff] }
 0x2d3   :  { %v536_v16 = vadd.f32 %v530_v11, %v521_v15  ;;  %v534_v17 = vadd.f32 %v530_v11, %v519_v13  ;;  %v533_v18 = vadd.f32 %v526_v10, %v518_v12  ;;  %v535_v19 = vadd.f32 %v526_v10, %v520_v14  ;;  %v1220_v13 = vld [vmem:[#allocation16 + $0x48] sm:$0xff]  ;;  %v1222_v14 = vld [vmem:[#allocation16 + $0x58] sm:$0xff] }
 0x2d4   :  { %v1350_v10 = vunpack.c.h.s8.bf16 %v1214_v0  ;;  %v1347_v11 = vunpack.c.h.s8.bf16 %v1211_v3  ;;  %v1349_v12 = vunpack.c.h.s8.bf16 %v1213_v6  ;;  %1601 = vmatprep.subr.bf16.mxu0 %v1348_v9  ;;  %v1356_v15 = vunpack.c.l.s8.bf16 %v1220_v13  ;;  %v1254_v0 = vld [vmem:[#allocation16 + $0x158] sm:$0xff]  ;;  %v1251_v3 = vld [vmem:[#allocation16 + $0x140] sm:$0xff]  ;;  %v1253_v6 = vld [vmem:[#allocation16 + $0x150] sm:$0xff] }
 0x2d5   :  { %v540_v20 = vmul.f32 0.2, %v536_v16  ;;  %v538_v21 = vmul.f32 0.2, %v534_v17  ;;  %v537_v22 = vmul.f32 0.2, %v533_v18  ;;  %v1420_v1 = vunpack.c.l.s8.bf16 %v1252_v63 }
 0x2d6   :  { %v539_v23 = vmul.f32 0.2, %v535_v19  ;;  %1602 = vmatpush1.bf16.msra.mxu0 %v1347_v11  ;;  %v1419_v7 = vunpack.c.l.s8.bf16 %v1251_v3  ;;  %v1428_v9 = vunpack.c.h.s8.bf16 %v1252_v63  ;;  %v1427_v11 = vunpack.c.h.s8.bf16 %v1251_v3 }
 0x2d7   :  { %v542_v24 = vmax.f32 %v534_v17, %v538_v21  ;;  %v544_v25 = vmax.f32 %v536_v16, %v540_v20  ;;  %v541_v26 = vmax.f32 %v533_v18, %v537_v22  ;;  %v1358_v16 = vunpack.c.l.s8.bf16 %v1222_v14  ;;  %v1219_v17 = vld [vmem:[#allocation16 + $0x40] sm:$0xff]  ;;  %v1221_v18 = vld [vmem:[#allocation16 + $0x50] sm:$0xff]  ;;  %1603 = vmatprep.subr.bf16.mxu0 %v1356_v15 }
 0x2d8   :  { %v543_v27 = vmax.f32 %v535_v19, %v539_v23  ;;  %v1355_v19 = vunpack.c.l.s8.bf16 %v1219_v17  ;;  %v1357_v20 = vunpack.c.l.s8.bf16 %v1221_v18  ;;  %v1364_v21 = vunpack.c.h.s8.bf16 %v1220_v13  ;;  %v1260_v13 = vld [vmem:[#allocation16 + $0x188] sm:$0xff] }
 0x2d9   :  { %v546_v28 = vpack.c.bf16 %v544_v25, %v542_v24  ;;  %v1366_v22 = vunpack.c.h.s8.bf16 %v1222_v14  ;;  %v1363_v23 = vunpack.c.h.s8.bf16 %v1219_v17  ;;  %v1365_v24 = vunpack.c.h.s8.bf16 %v1221_v18  ;;  %v1228_v25 = vld [vmem:[#allocation16 + $0x88] sm:$0xff]  ;;  %v1262_v14 = vld [vmem:[#allocation16 + $0x198] sm:$0xff]  ;;  %v1259_v17 = vld [vmem:[#allocation16 + $0x180] sm:$0xff] }
 0x2da   :  { %v4879_v34 = vpack.c.bf16 %v543_v27, %v541_v26  ;;  %1604 = vmatpush1.bf16.msra.mxu0 %v1355_v19  ;;  %v1230_v26 = vld [vmem:[#allocation16 + $0x98] sm:$0xff]  ;;  %v1372_v27 = vunpack.c.l.s8.bf16 %v1228_v25  ;;  %v1436_v15 = vunpack.c.l.s8.bf16 %v1260_v13  ;;  %v1261_v18 = vld [vmem:[#allocation16 + $0x190] sm:$0xff]  ;;  %v1435_v19 = vunpack.c.l.s8.bf16 %v1259_v17 }
 0x2db   :  { %963 = vmatprep.mubr.bf16.mxu1 %v546_v28  ;;  %1605 = vmatprep.subr.bf16.mxu0 %v1364_v21  ;;  %v1444_v21 = vunpack.c.h.s8.bf16 %v1260_v13 }
 0x2dc   :  { %964 = vmatmul.mubr.bf16.vlgmr.msra.gmra.mrb[4].mxu1 %v4879_v34 }
 0x2dd   :  { %975 = vmatpush1.bf16.msra.mxu1 %v4258_v29  ;;  %1006 = vmatprep.mubr.bf16.mxu1 %v546_v28  ;;  %v1374_v28 = vunpack.c.l.s8.bf16 %v1230_v26  ;;  %v1227_v29 = vld [vmem:[#allocation16 + $0x80] sm:$0xff] }
 0x2de   :  { %976 = vmatprep.subr.bf16.mxu1 %v4263_v30  ;;  %1606 = vmatpush1.bf16.msra.mxu0 %v1363_v23  ;;  %v1371_v30 = vunpack.c.l.s8.bf16 %v1227_v29  ;;  %v1443_v23 = vunpack.c.h.s8.bf16 %v1259_v17 }
 0x2df   :  { %1607 = vmatprep.subr.bf16.mxu0 %v1372_v27  ;;  %v1270_v27 = vld [vmem:[#allocation16 + $0x1d8] sm:$0xff] }
 0x2e1   :  { %977 = vmatpush1.bf16.msra.mxu1 %v4261_v31 }
 0x2e2   :  { %978 = vmatprep.subr.bf16.mxu1 %v4266_v32  ;;  %1608 = vmatpush1.bf16.msra.mxu0 %v1371_v30  ;;  %v1380_v32 = vunpack.c.h.s8.bf16 %v1228_v25  ;;  %v1267_v30 = vld [vmem:[#allocation16 + $0x1c0] sm:$0xff] }
 0x2e4   :  { %1609 = vmatprep.subr.bf16.mxu0 %v1380_v32 }
 0x2e5   :  { %979 = vmatpush1.bf16.msra.mxu1 %v4264_v33  ;;  %v1382_v33 = vunpack.c.h.s8.bf16 %v1230_v26  ;;  %v1268_v26 = vld [vmem:[#allocation16 + $0x1c8] sm:$0xff] }
 0x2e6   :  { %980 = vmatprep.subr.bf16.mxu1 %v4269_v35  ;;  %v1379_v35 = vunpack.c.h.s8.bf16 %v1227_v29  ;;  %v1452_v29 = vunpack.c.l.s8.bf16 %v1268_v26 }
 0x2e8   :  { %1610 = vmatpush1.bf16.msra.mxu0 %v1379_v35 }
 0x2e9   :  { %981 = vmatpush1.bf16.msra.mxu1 %v4267_v36 }
 0x2ea   :  { %982 = vmatprep.subr.bf16.mxu1 %v4272_v37  ;;  %v1236_v37 = vld [vmem:[#allocation16 + $0xc8] sm:$0xff] }
 0x2ed   :  { %983 = vmatpush1.bf16.msra.mxu1 %v4270_v38  ;;  %v1238_v38 = vld [vmem:[#allocation16 + $0xd8] sm:$0xff] }
 0x2ee   :  { %984 = vmatprep.subr.bf16.mxu1 %v4275_v39  ;;  %v1388_v39 = vunpack.c.l.s8.bf16 %v1236_v37 }
 0x2f0   :  { %1611 = vmatprep.subr.bf16.mxu0 %v1388_v39 }
 0x2f1   :  { %985 = vmatpush1.bf16.msra.mxu1 %v4273_v40  ;;  %v1390_v40 = vunpack.c.l.s8.bf16 %v1238_v38 }
 0x2f2   :  { %986 = vmatprep.subr.bf16.mxu1 %v4278_v41  ;;  %v1235_v41 = vld [vmem:[#allocation16 + $0xc0] sm:$0xff] }
 0x2f5   :  { %987 = vmatpush1.bf16.msra.mxu1 %v4276_v42  ;;  %v1237_v42 = vld [vmem:[#allocation16 + $0xd0] sm:$0xff] }
 0x2f6   :  { %988 = vmatprep.subr.bf16.mxu1 %v4281_v43  ;;  %v1387_v43 = vunpack.c.l.s8.bf16 %v1235_v41 }
 0x2f8   :  { %1612 = vmatpush1.bf16.msra.mxu0 %v1387_v43  ;;  %v1459_v43 = vunpack.c.h.s8.bf16 %v1267_v30 }
 0x2f9   :  { %989 = vmatpush1.bf16.msra.mxu1 %v4279_v44  ;;  %v1389_v44 = vunpack.c.l.s8.bf16 %v1237_v42 }
 0x2fa   :  { %990 = vmatprep.subr.bf16.mxu1 %v4284_v45  ;;  %v1396_v45 = vunpack.c.h.s8.bf16 %v1236_v37 }
 0x2fc   :  { %1613 = vmatprep.subr.bf16.mxu0 %v1396_v45 }
 0x2fd   :  { %991 = vmatpush1.bf16.msra.mxu1 %v4282_v46  ;;  %v1398_v46 = vunpack.c.h.s8.bf16 %v1238_v38 }
 0x2fe   :  { %992 = vmatprep.subr.bf16.mxu1 %v4287_v47  ;;  %v1395_v47 = vunpack.c.h.s8.bf16 %v1235_v41  ;;  %v1462_v41 = vunpack.c.h.s8.bf16 %v1270_v27 }
 0x300   :  { %1614 = vmatpush1.bf16.msra.mxu0 %v1395_v47  ;;  %v4883_v47 = vld [vmem:[#allocation16 + $0x208] sm:$0xff] }
 0x301   :  { %993 = vmatpush1.bf16.msra.mxu1 %v4285_v48  ;;  %v1397_v48 = vunpack.c.h.s8.bf16 %v1237_v42 }
 0x302   :  { %994 = vmatprep.subr.bf16.mxu1 %v4290_v49  ;;  %v1244_v49 = vld [vmem:[#allocation16 + $0x108] sm:$0xff] }
 0x305   :  { %995 = vmatpush1.bf16.msra.mxu1 %v4288_v50  ;;  %v1246_v50 = vld [vmem:[#allocation16 + $0x118] sm:$0xff] }
 0x306   :  { %996 = vmatprep.subr.bf16.mxu1 %v4293_v51  ;;  %v1404_v51 = vunpack.c.l.s8.bf16 %v1244_v49 }
 0x308   :  { %1615 = vmatprep.subr.bf16.mxu0 %v1404_v51 }
 0x309   :  { %997 = vmatpush1.bf16.msra.mxu1 %v4291_v52  ;;  %v1406_v52 = vunpack.c.l.s8.bf16 %v1246_v50 }
 0x30a   :  { %998 = vmatprep.subr.bf16.mxu1 %v4296_v53  ;;  %v1243_v53 = vld [vmem:[#allocation16 + $0x100] sm:$0xff] }
 0x30d   :  { %999 = vmatpush1.bf16.msra.mxu1 %v4294_v54  ;;  %v1403_v54 = vunpack.c.l.s8.bf16 %v1243_v53 }
 0x30e   :  { %1000 = vmatprep.subr.bf16.mxu1 %v4299_v55  ;;  %v1245_v55 = vld [vmem:[#allocation16 + $0x110] sm:$0xff] }
 0x30f   :  { %1616 = vmatpush1.bf16.msra.mxu0 %v1403_v54 }
 0x311   :  { %1001 = vmatpush1.bf16.msra.mxu1 %v4297_v56  ;;  %v1405_v56 = vunpack.c.l.s8.bf16 %v1245_v55 }
 0x312   :  { %1002 = vmatprep.subr.bf16.mxu1 %v4302_v57  ;;  %v1412_v57 = vunpack.c.h.s8.bf16 %v1244_v49 }
 0x314   :  { %1617 = vmatprep.subr.bf16.mxu0 %v1412_v57 }
 0x315   :  { %1003 = vmatpush1.bf16.msra.mxu1 %v4300_v58  ;;  %v1414_v58 = vunpack.c.h.s8.bf16 %v1246_v50  ;;  %v1468_v50 = vunpack.c.l.s8.bf16 %v4883_v47 }
 0x316   :  { %1004 = vmatprep.subr.bf16.mxu1 %v4305_v59  ;;  %v1411_v59 = vunpack.c.h.s8.bf16 %v1243_v53 }
 0x318   :  { %1618 = vmatpush1.bf16.msra.mxu0 %v1411_v59 }
 0x319   :  { %1005 = vmatpush1.bf16.msra.mxu1 %v4303_v61  ;;  %v1413_v61 = vunpack.c.h.s8.bf16 %v1245_v55  ;;  %1619 = vmatprep.subr.bf16.mxu0 %v1420_v1 }
 0x31a   :  { %1685 = vmatprep.subr.bf16.mxu1 %v1342_v2  ;;  %v1422_v2 = vunpack.c.l.s8.bf16 %v1254_v0 }
 0x31c   :  { %1007 = vmatmul.mubr.bf16.vlgmr.msra.gmra.mrb[8].mxu1 %v4879_v34  ;;  %v1229_v34 = vld [vmem:[#allocation16 + $0x90] sm:$0xff]  ;;  %1620 = vmatpush1.bf16.msra.mxu0 %v1419_v7 }
 0x31d   :  { %1686 = vmatpush1.bf16.msra.mxu1 %v1341_v8  ;;  %v1373_v31 = vunpack.c.l.s8.bf16 %v1229_v34  ;;  %v1381_v36 = vunpack.c.h.s8.bf16 %v1229_v34  ;;  %v1421_v8 = vunpack.c.l.s8.bf16 %v1253_v6  ;;  %1621 = vmatprep.subr.bf16.mxu0 %v1428_v9  ;;  %v1454_v34 = vunpack.c.l.s8.bf16 %v1270_v27 }
 0x31e   :  { %1687 = vmatprep.subr.bf16.mxu1 %v1350_v10  ;;  %v1430_v10 = vunpack.c.h.s8.bf16 %v1254_v0 }
 0x320   :  { %1622 = vmatpush1.bf16.msra.mxu0 %v1427_v11 }
 0x321   :  { %1688 = vmatpush1.bf16.msra.mxu1 %v1349_v12  ;;  %v1429_v12 = vunpack.c.h.s8.bf16 %v1253_v6  ;;  %1623 = vmatprep.subr.bf16.mxu0 %v1436_v15 }
 0x322   :  { %1689 = vmatprep.subr.bf16.mxu1 %v1358_v16  ;;  %v1438_v16 = vunpack.c.l.s8.bf16 %v1262_v14 }
 0x324   :  { %1624 = vmatpush1.bf16.msra.mxu0 %v1435_v19 }
 0x325   :  { %1690 = vmatpush1.bf16.msra.mxu1 %v1357_v20  ;;  %v1437_v20 = vunpack.c.l.s8.bf16 %v1261_v18  ;;  %1625 = vmatprep.subr.bf16.mxu0 %v1444_v21 }
 0x326   :  { %1691 = vmatprep.subr.bf16.mxu1 %v1366_v22  ;;  %v1446_v22 = vunpack.c.h.s8.bf16 %v1262_v14 }
 0x328   :  { %1626 = vmatpush1.bf16.msra.mxu0 %v1443_v23 }
 0x329   :  { %1692 = vmatpush1.bf16.msra.mxu1 %v1365_v24  ;;  %v1445_v24 = vunpack.c.h.s8.bf16 %v1261_v18  ;;  %1627 = vmatprep.subr.bf16.mxu0 %v1452_v29 }
 0x32a   :  { %1693 = vmatprep.subr.bf16.mxu1 %v1374_v28 }
 0x32d   :  { %1694 = vmatpush1.bf16.msra.mxu1 %v1373_v31  ;;  %v1269_v31 = vld [vmem:[#allocation16 + $0x1d0] sm:$0xff] }
 0x32e   :  { %1695 = vmatprep.subr.bf16.mxu1 %v1382_v33  ;;  %v1451_v33 = vunpack.c.l.s8.bf16 %v1267_v30  ;;  %v1453_v35 = vunpack.c.l.s8.bf16 %v1269_v31 }
 0x330   :  { %1628 = vmatpush1.bf16.msra.mxu0 %v1451_v33 }
 0x331   :  { %1696 = vmatpush1.bf16.msra.mxu1 %v1381_v36 }
 0x332   :  { %1697 = vmatprep.subr.bf16.mxu1 %v1390_v40  ;;  %v1460_v40 = vunpack.c.h.s8.bf16 %v1268_v26 }
 0x334   :  { %1629 = vmatprep.subr.bf16.mxu0 %v1460_v40 }
 0x335   :  { %1698 = vmatpush1.bf16.msra.mxu1 %v1389_v44  ;;  %v1461_v44 = vunpack.c.h.s8.bf16 %v1269_v31  ;;  %1630 = vmatpush1.bf16.msra.mxu0 %v1459_v43 }
 0x336   :  { %1699 = vmatprep.subr.bf16.mxu1 %v1398_v46  ;;  %1642 = vmatprep.subr.bf16.mxu0 %v1468_v50 }
 0x339   :  { %1700 = vmatpush1.bf16.msra.mxu1 %v1397_v48  ;;  %v4885_v48 = vld [vmem:[#allocation16 + $0x218] sm:$0xff] }
 0x33a   :  { %1701 = vmatprep.subr.bf16.mxu1 %v1406_v52  ;;  %v1470_v51 = vunpack.c.l.s8.bf16 %v4885_v48 }
 0x33d   :  { %1702 = vmatpush1.bf16.msra.mxu1 %v1405_v56 }
 0x33e   :  { %1703 = vmatprep.subr.bf16.mxu1 %v1414_v58 }
 0x341   :  { %1704 = vmatpush1.bf16.msra.mxu1 %v1413_v61 }
 0x342   :  { %1705 = vmatprep.subr.bf16.mxu1 %v1422_v2 }
 0x345   :  { %1706 = vmatpush1.bf16.msra.mxu1 %v1421_v8 }
 0x346   :  { %1707 = vmatprep.subr.bf16.mxu1 %v1430_v10 }
 0x349   :  { %1708 = vmatpush1.bf16.msra.mxu1 %v1429_v12 }
 0x34a   :  { %1709 = vmatprep.subr.bf16.mxu1 %v1438_v16 }
 0x34d   :  { %1710 = vmatpush1.bf16.msra.mxu1 %v1437_v20 }
 0x34e   :  { %1711 = vmatprep.subr.bf16.mxu1 %v1446_v22 }
 0x351   :  { %1712 = vmatpush1.bf16.msra.mxu1 %v1445_v24 }
 0x352   :  { %1713 = vmatprep.subr.bf16.mxu1 %v1454_v34 }
 0x355   :  { %1714 = vmatpush1.bf16.msra.mxu1 %v1453_v35 }
 0x356   :  { %1715 = vmatprep.subr.bf16.mxu1 %v1462_v41 }
 0x359   :  { %1716 = vmatpush1.bf16.msra.mxu1 %v1461_v44 }
 0x35a   :  { %1728 = vmatprep.subr.bf16.mxu1 %v1470_v51 }
 0x3af   :  { %v965_v25 = vpop.f32.mrb[4].mxu1 }
 0x3b0   :  { %v967_v28 = vpop.f32.mrb[5].mxu1 }
 0x3b1   :  { %v969_v32 = vpop.f32.mrb[6].mxu1 }
 0x3b2   :  { %v1019_v36 = vadd.f32 %v969_v32, %v965_v25  ;;  %v971_v37 = vpop.f32.mrb[7].mxu1 }
 0x3b3   :  { %v1026_v38 = vadd.f32 %v971_v37, %v967_v28 }
 0x3b4   :  { %v1020_v39 = vrot.slane %v1019_v36, 4 }
 0x3b5   :  { %v1027_v42 = vrot.slane %v1026_v38, 4 }
 0x3b6   :  { %v1021_v45 = vadd.f32 %v1020_v39, %v1019_v36 }
 0x3b7   :  { %v1028_v46 = vadd.f32 %v1027_v42, %v1026_v38 }
 0x3b8   :  { %v1022_v49 = vrot.slane %v1021_v45, 2 }
 0x3b9   :  { %v1029_v52 = vrot.slane %v1028_v46, 2 }
 0x3ba   :  { %v1023_v53 = vadd.f32 %v1022_v49, %v1021_v45 }
 0x3bb   :  { %v1030_v54 = vadd.f32 %v1029_v52, %v1028_v46 }
 0x3bc   :  { %v1024_v55 = vrot.slane %v1023_v53, 1 }
 0x3bd   :  { %v1031_v56 = vrot.slane %v1030_v54, 1 }
 0x3be   :  { %v1025_v57 = vadd.f32 %v1024_v55, %v1023_v53 }
 0x3bf   :  { %v1032_v58 = vadd.f32 %v1031_v56, %v1030_v54 }
 0x3c0   :  { %v1047_v59 = vmul.f32 0.0625, %v1025_v57 }
 0x3c1   :  { %v1048_v61 = vmul.f32 0.0625, %v1032_v58 }
 0x3c2   :  { %v4889_v63 = vsub.f32 %v965_v25, %v1047_v59  ;;  %v4891_v0 = vsub.f32 %v969_v32, %v1047_v59 }
 0x3c3   :  { %v4893_v1 = vsub.f32 %v967_v28, %v1048_v61  ;;  %v4895_v2 = vsub.f32 %v971_v37, %v1048_v61 }
 0x3c4   :  { %v1059_v3 = vmul.f32 %v4889_v63, %v4889_v63  ;;  %v1063_v6 = vmul.f32 %v4891_v0, %v4891_v0 }
 0x3c5   :  { %v1060_v7 = vmul.f32 %v4893_v1, %v4893_v1  ;;  %v1064_v8 = vmul.f32 %v4895_v2, %v4895_v2 }
 0x3c6   :  { %v1067_v9 = vadd.f32 %v1063_v6, %v1059_v3 }
 0x3c7   :  { %v1074_v10 = vadd.f32 %v1064_v8, %v1060_v7 }
 0x3c8   :  { %v1068_v11 = vrot.slane %v1067_v9, 4 }
 0x3c9   :  { %v1075_v12 = vrot.slane %v1074_v10, 4 }
 0x3ca   :  { %v1069_v13 = vadd.f32 %v1068_v11, %v1067_v9 }
 0x3cb   :  { %v1076_v14 = vadd.f32 %v1075_v12, %v1074_v10 }
 0x3cc   :  { %v1070_v15 = vrot.slane %v1069_v13, 2 }
 0x3cd   :  { %v1077_v16 = vrot.slane %v1076_v14, 2 }
 0x3ce   :  { %v1071_v17 = vadd.f32 %v1070_v15, %v1069_v13 }
 0x3cf   :  { %v1078_v18 = vadd.f32 %v1077_v16, %v1076_v14 }
 0x3d0   :  { %v1072_v19 = vrot.slane %v1071_v17, 1 }
 0x3d1   :  { %v1079_v20 = vrot.slane %v1078_v18, 1 }
 0x3d2   :  { %v1073_v21 = vadd.f32 %v1072_v19, %v1071_v17 }
 0x3d3   :  { %v1080_v22 = vadd.f32 %v1079_v20, %v1078_v18 }
 0x3d4   :  { %v1095_v23 = vmul.f32 0.0625, %v1073_v21 }
 0x3d5   :  { %v1096_v24 = vmul.f32 0.0625, %v1080_v22 }
 0x3d6   :  { %v1099_v25 = vadd.f32 0.8, %v1095_v23 }
 0x3d7   :  { %v1100_v26 = vadd.f32 0.8, %v1096_v24 }
 0x3d8   :  { %4310 = vrsqrt.f32 %v1099_v25 }
 0x3d9   :  { %4312 = vrsqrt.f32 %v1100_v26 }
 0x3e2   :  { %v4311_v27 = vpop.eup %4310 }
 0x3e3   :  { %v4313_v28 = vpop.eup %4312 }
 0x3e4   :  { %v1111_v29 = vcombine.low %v4311_v27, %v4313_v28  ;;  %v1017_v28 = vld [vmem:[#allocation13] sm:$0xf] }
 0x3e6   :  { %v1119_v25 = vrot.slane %v1111_v29, %v4862_v62 }
 0x3ef   :  { %v1008_v34 = vpop.f32.mrb[8].mxu1 }
 0x3f0   :  { %v1010_v30 = vpop.f32.mrb[9].mxu1 }
 0x3f1   :  { %v1012_v31 = vpop.f32.mrb[10].mxu1 }
 0x3f2   :  { %v1033_v32 = vadd.f32 %v1012_v31, %v1008_v34  ;;  %v1014_v33 = vpop.f32.mrb[11].mxu1 }
 0x3f3   :  { %v1040_v35 = vadd.f32 %v1014_v33, %v1010_v30 }
 0x3f4   :  { %v1034_v36 = vrot.slane %v1033_v32, 4 }
 0x3f5   :  { %v1041_v37 = vrot.slane %v1040_v35, 4 }
 0x3f6   :  { %v1035_v38 = vadd.f32 %v1034_v36, %v1033_v32  ;;  %v4912_v32 = vsub.s32 2, %v4859_v60 }
 0x3f7   :  { %v1042_v39 = vadd.f32 %v1041_v37, %v1040_v35 }
 0x3f8   :  { %v1036_v40 = vrot.slane %v1035_v38, 2 }
 0x3f9   :  { %v1043_v41 = vrot.slane %v1042_v39, 2 }
 0x3fa   :  { %v1037_v42 = vadd.f32 %v1036_v40, %v1035_v38 }
 0x3fb   :  { %v1044_v43 = vadd.f32 %v1043_v41, %v1042_v39 }
 0x3fc   :  { %v1038_v44 = vrot.slane %v1037_v42, 1 }
 0x3fd   :  { %v1045_v45 = vrot.slane %v1044_v43, 1 }
 0x3fe   :  { %v1039_v46 = vadd.f32 %v1038_v44, %v1037_v42 }
 0x3ff   :  { %v1046_v49 = vadd.f32 %v1045_v45, %v1044_v43 }
 0x400   :  { %v1049_v50 = vmul.f32 0.0625, %v1039_v46 }
 0x401   :  { %v1050_v51 = vmul.f32 0.0625, %v1046_v49 }
 0x402   :  { %v1053_v52 = vsub.f32 %v1008_v34, %v1049_v50  ;;  %v1057_v53 = vsub.f32 %v1012_v31, %v1049_v50  ;;  %v1018_v34 = vld [vmem:[#allocation14] sm:$0xf]  ;;  %v4909_v31 = vsub.s32 3, %v4859_v60 }
 0x403   :  { %v1054_v54 = vsub.f32 %v1010_v30, %v1050_v51  ;;  %v1058_v55 = vsub.f32 %v1014_v33, %v1050_v51  ;;  %v1174_v36 = vrot.slane %v1018_v34, %v4873_v5  ;;  %v1170_v40 = vrot.slane %v1018_v34, %v4870_v4 }
 0x404   :  { %v1061_v56 = vmul.f32 %v1053_v52, %v1053_v52  ;;  %v1065_v57 = vmul.f32 %v1057_v53, %v1057_v53  ;;  %v1182_v35 = vrot.slane %v1018_v34, %v4909_v31  ;;  %v1178_v41 = vrot.slane %v1018_v34, %v4912_v32 }
 0x405   :  { %v1062_v58 = vmul.f32 %v1054_v54, %v1054_v54  ;;  %v1066_v59 = vmul.f32 %v1058_v55, %v1058_v55 }
 0x406   :  { %v1081_v61 = vadd.f32 %v1065_v57, %v1061_v56 }
 0x407   :  { %v1088_v3 = vadd.f32 %v1066_v59, %v1062_v58 }
 0x408   :  { %v1082_v6 = vrot.slane %v1081_v61, 4 }
 0x409   :  { %v1089_v7 = vrot.slane %v1088_v3, 4 }
 0x40a   :  { %v1083_v8 = vadd.f32 %v1082_v6, %v1081_v61  ;;  %v1275_v6 = vld [vmem:[#allocation16 + $0x200] sm:$0xff] }
 0x40b   :  { %v1090_v9 = vadd.f32 %v1089_v7, %v1088_v3  ;;  %v1277_v7 = vld [vmem:[#allocation16 + $0x210] sm:$0xff] }
 0x40c   :  { %v1084_v10 = vrot.slane %v1083_v8, 2  ;;  %v1477_v34 = vunpack.c.h.s8.bf16 %v1277_v7 }
 0x40d   :  { %v1091_v11 = vrot.slane %v1090_v9, 2 }
 0x40e   :  { %v1085_v12 = vadd.f32 %v1084_v10, %v1083_v8 }
 0x40f   :  { %v1092_v13 = vadd.f32 %v1091_v11, %v1090_v9 }
 0x410   :  { %v1086_v14 = vrot.slane %v1085_v12, 1 }
 0x411   :  { %v1093_v15 = vrot.slane %v1092_v13, 1 }
 0x412   :  { %v1087_v16 = vadd.f32 %v1086_v14, %v1085_v12 }
 0x413   :  { %v1094_v17 = vadd.f32 %v1093_v15, %v1092_v13 }
 0x414   :  { %v1097_v18 = vmul.f32 0.0625, %v1087_v16 }
 0x415   :  { %v1098_v19 = vmul.f32 0.0625, %v1094_v17  ;;  %v1467_v17 = vunpack.c.l.s8.bf16 %v1275_v6 }
 0x416   :  { %v1101_v20 = vadd.f32 0.8, %v1097_v18  ;;  %v1469_v18 = vunpack.c.l.s8.bf16 %v1277_v7  ;;  %v1301_v7 = vld [vmem:[#allocation16 + $0x2d0] sm:$0xff] }
 0x417   :  { %v1102_v21 = vadd.f32 0.8, %v1098_v19 }
 0x418   :  { %4314 = vrsqrt.f32 %v1101_v20 }
 0x419   :  { %4316 = vrsqrt.f32 %v1102_v21 }
 0x422   :  { %v4315_v22 = vpop.eup %4314 }
 0x423   :  { %v4317_v23 = vpop.eup %4316 }
 0x424   :  { %v1112_v24 = vcombine.low %v4315_v22, %v4317_v23  ;;  %v1476_v23 = vunpack.c.h.s8.bf16 %v4883_v47 }
 0x426   :  { %v1126_v26 = vrot.slane %v1112_v24, %v4862_v62  ;;  %v1478_v24 = vunpack.c.h.s8.bf16 %v4885_v48  ;;  %v1285_v48 = vld [vmem:[#allocation16 + $0x250] sm:$0xff] }
 0x428   :  { %v1127_v27 = vcombine.low %v1119_v25, %v1126_v26  ;;  %v1284_v25 = vld [vmem:[#allocation16 + $0x248] sm:$0xff]  ;;  %v1286_v26 = vld [vmem:[#allocation16 + $0x258] sm:$0xff] }
 0x429   :  { %v1486_v47 = vunpack.c.l.s8.bf16 %v1286_v26 }
 0x42a   :  { %v1134_v30 = vrot.slane %v1127_v27, %v4862_v62 }
 0x42c   :  { %v1136_v33 = vmul.f32 %v1134_v30, %v1017_v28  ;;  %v1475_v28 = vunpack.c.h.s8.bf16 %v1275_v6  ;;  %v1484_v30 = vunpack.c.l.s8.bf16 %v1284_v25  ;;  %v1299_v6 = vld [vmem:[#allocation16 + $0x2c0] sm:$0xff] }
 0x42e   :  { %v1153_v29 = vrot.slane %v1136_v33, %v4909_v31  ;;  %v1145_v37 = vrot.slane %v1136_v33, %v4873_v5  ;;  %v1141_v38 = vrot.slane %v1136_v33, %v4870_v4  ;;  %v1149_v39 = vrot.slane %v1136_v33, %v4912_v32  ;;  %v1283_v33 = vld [vmem:[#allocation16 + $0x240] sm:$0xff] }
 0x430   :  { %v1161_v42 = vmul.f32 %v1153_v29, %v1054_v54  ;;  %v1165_v43 = vmul.f32 %v1153_v29, %v1058_v55  ;;  %v1159_v44 = vmul.f32 %v1145_v37, %v4893_v1  ;;  %v1163_v45 = vmul.f32 %v1145_v37, %v4895_v2 }
 0x431   :  { %v1158_v46 = vmul.f32 %v1141_v38, %v4889_v63  ;;  %v1162_v49 = vmul.f32 %v1141_v38, %v4891_v0  ;;  %v1160_v50 = vmul.f32 %v1149_v39, %v1053_v52  ;;  %v1164_v51 = vmul.f32 %v1149_v39, %v1057_v53  ;;  %v1292_v38 = vld [vmem:[#allocation16 + $0x288] sm:$0xff]  ;;  %v1294_v39 = vld [vmem:[#allocation16 + $0x298] sm:$0xff] }
 0x432   :  { %v1190_v56 = vadd.f32 %v1182_v35, %v1161_v42  ;;  %v1194_v57 = vadd.f32 %v1182_v35, %v1165_v43  ;;  %v1188_v58 = vadd.f32 %v1174_v36, %v1159_v44  ;;  %v1192_v59 = vadd.f32 %v1174_v36, %v1163_v45  ;;  %v1291_v44 = vld [vmem:[#allocation16 + $0x280] sm:$0xff]  ;;  %v1293_v45 = vld [vmem:[#allocation16 + $0x290] sm:$0xff] }
 0x433   :  { %v1187_v61 = vadd.f32 %v1170_v40, %v1158_v46  ;;  %v1191_v3 = vadd.f32 %v1170_v40, %v1162_v49  ;;  %v1189_v54 = vadd.f32 %v1178_v41, %v1160_v50  ;;  %v1193_v55 = vadd.f32 %v1178_v41, %v1164_v51 }
 0x434   :  { %v1202_v8 = vmul.f32 0.2, %v1194_v57  ;;  %v1196_v1 = vmul.f32 0.2, %v1188_v58  ;;  %v1200_v9 = vmul.f32 0.2, %v1192_v59  ;;  %v1483_v35 = vunpack.c.l.s8.bf16 %v1283_v33 }
 0x435   :  { %v1195_v2 = vmul.f32 0.2, %v1187_v61  ;;  %v1199_v10 = vmul.f32 0.2, %v1191_v3  ;;  %v1198_v63 = vmul.f32 0.2, %v1190_v56  ;;  %v1485_v36 = vunpack.c.l.s8.bf16 %v1285_v48 }
 0x436   :  { %v1210_v11 = vmax.f32 %v1194_v57, %v1202_v8  ;;  %v1204_v0 = vmax.f32 %v1188_v58, %v1196_v1  ;;  %v1208_v52 = vmax.f32 %v1192_v59, %v1200_v9  ;;  %v1197_v53 = vmul.f32 0.2, %v1189_v54  ;;  %v1302_v57 = vld [vmem:[#allocation16 + $0x2d8] sm:$0xff]  ;;  %v1308_v9 = vld [vmem:[#allocation16 + $0x308] sm:$0xff] }
 0x437   :  { %v1203_v12 = vmax.f32 %v1187_v61, %v1195_v2  ;;  %v1207_v13 = vmax.f32 %v1191_v3, %v1199_v10  ;;  %v1206_v14 = vmax.f32 %v1190_v56, %v1198_v63  ;;  %v1201_v15 = vmul.f32 0.2, %v1193_v55  ;;  %v1300_v56 = vld [vmem:[#allocation16 + $0x2c8] sm:$0xff]  ;;  %v1310_v2 = vld [vmem:[#allocation16 + $0x318] sm:$0xff] }
 0x438   :  { %v4926_v16 = vpack.c.bf16 %v1208_v52, %v1204_v0  ;;  %v1205_v19 = vmax.f32 %v1189_v54, %v1197_v53  ;;  %v1492_v29 = vunpack.c.h.s8.bf16 %v1284_v25  ;;  %v1494_v37 = vunpack.c.h.s8.bf16 %v1286_v26  ;;  %v1307_v52 = vld [vmem:[#allocation16 + $0x300] sm:$0xff]  ;;  %v1309_v53 = vld [vmem:[#allocation16 + $0x310] sm:$0xff] }
 0x439   :  { %v4928_v20 = vpack.c.bf16 %v1207_v13, %v1203_v12  ;;  %v4930_v21 = vpack.c.bf16 %v1210_v11, %v1206_v14  ;;  %v1209_v22 = vmax.f32 %v1193_v55, %v1201_v15  ;;  %v1491_v40 = vunpack.c.h.s8.bf16 %v1283_v33  ;;  %v1315_v25 = vld [vmem:[#allocation16 + $0x340] sm:$0xff]  ;;  %v1317_v26 = vld [vmem:[#allocation16 + $0x350] sm:$0xff]  ;;  %v1324_v33 = vld [vmem:[#allocation16 + $0x388] sm:$0xff] }
 0x43a   :  { %1631 = vmatprep.mubr.bf16.mxu0 %v4926_v16  ;;  %1717 = vmatprep.mubr.bf16.mxu1 %v4926_v16  ;;  %v1493_v41 = vunpack.c.h.s8.bf16 %v1285_v48  ;;  %v1500_v42 = vunpack.c.l.s8.bf16 %v1292_v38  ;;  %v1502_v43 = vunpack.c.l.s8.bf16 %v1294_v39  ;;  %v1499_v46 = vunpack.c.l.s8.bf16 %v1291_v44  ;;  %v1326_v48 = vld [vmem:[#allocation16 + $0x398] sm:$0xff] }
 0x43b   :  { %1632 = vmatmul.mubr.bf16.vlgmr.msra.gmra.mrb[4].mxu0 %v4928_v20  ;;  %1718 = vmatmul.mubr.bf16.vlgmr.msra.gmra.mrb[12].mxu1 %v4928_v20  ;;  %v4938_v27 = vpack.c.bf16 %v1209_v22, %v1205_v19  ;;  %v1501_v49 = vunpack.c.l.s8.bf16 %v1293_v45  ;;  %v1508_v50 = vunpack.c.h.s8.bf16 %v1292_v38  ;;  %v1510_v51 = vunpack.c.h.s8.bf16 %v1294_v39  ;;  %v1323_v38 = vld [vmem:[#allocation16 + $0x380] sm:$0xff]  ;;  %v1325_v39 = vld [vmem:[#allocation16 + $0x390] sm:$0xff] }
 0x43c   :  { %1643 = vmatpush1.bf16.msra.mxu0 %v1467_v17  ;;  %1729 = vmatpush1.bf16.msra.mxu1 %v1469_v18  ;;  %v1507_v58 = vunpack.c.h.s8.bf16 %v1291_v44  ;;  %v1509_v59 = vunpack.c.h.s8.bf16 %v1293_v45  ;;  %v1516_v61 = vunpack.c.l.s8.bf16 %v1300_v56  ;;  %v1518_v3 = vunpack.c.l.s8.bf16 %v1302_v57  ;;  %v1316_v17 = vld [vmem:[#allocation16 + $0x348] sm:$0xff]  ;;  %v1318_v18 = vld [vmem:[#allocation16 + $0x358] sm:$0xff] }
 0x43d   :  { %1674 = vmatprep.mubr.bf16.mxu0 %v4930_v21  ;;  %1760 = vmatprep.mubr.bf16.mxu1 %v4930_v21  ;;  %v1515_v54 = vunpack.c.l.s8.bf16 %v1299_v6  ;;  %v1517_v55 = vunpack.c.l.s8.bf16 %v1301_v7  ;;  %v1524_v8 = vunpack.c.h.s8.bf16 %v1300_v56  ;;  %v1526_v1 = vunpack.c.h.s8.bf16 %v1302_v57  ;;  %v1332_v44 = vld [vmem:[#allocation16 + $0x3c8] sm:$0xff]  ;;  %v1334_v45 = vld [vmem:[#allocation16 + $0x3d8] sm:$0xff]  ;;  %v1331_v56 = vld [vmem:[#allocation16 + $0x3c0] sm:$0xff] }
 0x43e   :  { %1644 = vmatprep.subr.bf16.mxu0 %v1476_v23  ;;  %1730 = vmatprep.subr.bf16.mxu1 %v1478_v24  ;;  %v1523_v10 = vunpack.c.h.s8.bf16 %v1299_v6  ;;  %v1525_v63 = vunpack.c.h.s8.bf16 %v1301_v7  ;;  %v1532_v11 = vunpack.c.l.s8.bf16 %v1308_v9  ;;  %v1534_v0 = vunpack.c.l.s8.bf16 %v1310_v2  ;;  %v1333_v57 = vld [vmem:[#allocation16 + $0x3d0] sm:$0xff]  ;;  %v1216_v6 = vld [vmem:[#allocation16 + $0x28] sm:$0xff]  ;;  %v1218_v7 = vld [vmem:[#allocation16 + $0x38] sm:$0xff] }
 0x43f   :  { %v1531_v12 = vunpack.c.l.s8.bf16 %v1307_v52  ;;  %v1533_v13 = vunpack.c.l.s8.bf16 %v1309_v53  ;;  %v1540_v14 = vunpack.c.h.s8.bf16 %v1308_v9  ;;  %v1542_v15 = vunpack.c.h.s8.bf16 %v1310_v2  ;;  %v1215_v9 = vld [vmem:[#allocation16 + $0x20] sm:$0xff]  ;;  %v1217_v2 = vld [vmem:[#allocation16 + $0x30] sm:$0xff] }
 0x440   :  { %1645 = vmatpush1.bf16.msra.mxu0 %v1475_v28  ;;  %1731 = vmatpush1.bf16.msra.mxu1 %v1477_v34  ;;  %v1539_v19 = vunpack.c.h.s8.bf16 %v1307_v52  ;;  %v1541_v22 = vunpack.c.h.s8.bf16 %v1309_v53  ;;  %v1548_v23 = vunpack.c.l.s8.bf16 %v1316_v17  ;;  %v1550_v24 = vunpack.c.l.s8.bf16 %v1318_v18  ;;  %v1224_v52 = vld [vmem:[#allocation16 + $0x68] sm:$0xff]  ;;  %v1226_v53 = vld [vmem:[#allocation16 + $0x78] sm:$0xff] }
 0x441   :  { %1646 = vmatprep.subr.bf16.mxu0 %v1484_v30  ;;  %1732 = vmatprep.subr.bf16.mxu1 %v1486_v47  ;;  %v1547_v28 = vunpack.c.l.s8.bf16 %v1315_v25  ;;  %v1549_v34 = vunpack.c.l.s8.bf16 %v1317_v26  ;;  %v1556_v30 = vunpack.c.h.s8.bf16 %v1316_v17  ;;  %v1558_v47 = vunpack.c.h.s8.bf16 %v1318_v18  ;;  %v1225_v18 = vld [vmem:[#allocation16 + $0x70] sm:$0xff] }
 0x442   :  { %v1362_v17 = vunpack.c.l.s8.bf16 %v1226_v53 }
 0x444   :  { %1647 = vmatpush1.bf16.msra.mxu0 %v1483_v35  ;;  %1733 = vmatpush1.bf16.msra.mxu1 %v1485_v36  ;;  %v1555_v35 = vunpack.c.h.s8.bf16 %v1315_v25  ;;  %v1557_v36 = vunpack.c.h.s8.bf16 %v1317_v26  ;;  %v1232_v25 = vld [vmem:[#allocation16 + $0xa8] sm:$0xff]  ;;  %v1234_v26 = vld [vmem:[#allocation16 + $0xb8] sm:$0xff] }
 0x445   :  { %1648 = vmatprep.subr.bf16.mxu0 %v1492_v29  ;;  %1734 = vmatprep.subr.bf16.mxu1 %v1494_v37  ;;  %v1564_v29 = vunpack.c.l.s8.bf16 %v1324_v33  ;;  %v1566_v37 = vunpack.c.l.s8.bf16 %v1326_v48 }
 0x448   :  { %1649 = vmatpush1.bf16.msra.mxu0 %v1491_v40  ;;  %1735 = vmatpush1.bf16.msra.mxu1 %v1493_v41  ;;  %v1563_v40 = vunpack.c.l.s8.bf16 %v1323_v38  ;;  %v1565_v41 = vunpack.c.l.s8.bf16 %v1325_v39 }
 0x449   :  { %1650 = vmatprep.subr.bf16.mxu0 %v1500_v42  ;;  %1736 = vmatprep.subr.bf16.mxu1 %v1502_v43  ;;  %v1572_v42 = vunpack.c.h.s8.bf16 %v1324_v33  ;;  %v1574_v43 = vunpack.c.h.s8.bf16 %v1326_v48  ;;  %v1233_v33 = vld [vmem:[#allocation16 + $0xb0] sm:$0xff] }
 0x44c   :  { %1651 = vmatpush1.bf16.msra.mxu0 %v1499_v46  ;;  %1737 = vmatpush1.bf16.msra.mxu1 %v1501_v49  ;;  %v1571_v46 = vunpack.c.h.s8.bf16 %v1323_v38  ;;  %v1573_v49 = vunpack.c.h.s8.bf16 %v1325_v39  ;;  %v1242_v38 = vld [vmem:[#allocation16 + $0xf8] sm:$0xff] }
 0x44d   :  { %1652 = vmatprep.subr.bf16.mxu0 %v1508_v50  ;;  %1738 = vmatprep.subr.bf16.mxu1 %v1510_v51  ;;  %v1580_v50 = vunpack.c.l.s8.bf16 %v1332_v44  ;;  %v1582_v51 = vunpack.c.l.s8.bf16 %v1334_v45 }
 0x450   :  { %1653 = vmatpush1.bf16.msra.mxu0 %v1507_v58  ;;  %1739 = vmatpush1.bf16.msra.mxu1 %v1509_v59  ;;  %v1579_v58 = vunpack.c.l.s8.bf16 %v1331_v56  ;;  %v1581_v59 = vunpack.c.l.s8.bf16 %v1333_v57 }
 0x451   :  { %1654 = vmatprep.subr.bf16.mxu0 %v1516_v61  ;;  %1740 = vmatprep.subr.bf16.mxu1 %v1518_v3  ;;  %v1588_v61 = vunpack.c.h.s8.bf16 %v1332_v44  ;;  %v1590_v3 = vunpack.c.h.s8.bf16 %v1334_v45  ;;  %v1241_v44 = vld [vmem:[#allocation16 + $0xf0] sm:$0xff] }
 0x454   :  { %1655 = vmatpush1.bf16.msra.mxu0 %v1515_v54  ;;  %1741 = vmatpush1.bf16.msra.mxu1 %v1517_v55  ;;  %v1587_v54 = vunpack.c.h.s8.bf16 %v1331_v56  ;;  %v1589_v55 = vunpack.c.h.s8.bf16 %v1333_v57  ;;  %v1250_v56 = vld [vmem:[#allocation16 + $0x138] sm:$0xff] }
 0x455   :  { %1656 = vmatprep.subr.bf16.mxu0 %v1524_v8  ;;  %1742 = vmatprep.subr.bf16.mxu1 %v1526_v1  ;;  %v1344_v8 = vunpack.c.l.s8.bf16 %v1216_v6  ;;  %v1346_v1 = vunpack.c.l.s8.bf16 %v1218_v7 }
 0x458   :  { %1657 = vmatpush1.bf16.msra.mxu0 %v1523_v10  ;;  %1743 = vmatpush1.bf16.msra.mxu1 %v1525_v63  ;;  %v1343_v10 = vunpack.c.l.s8.bf16 %v1215_v9  ;;  %v1345_v63 = vunpack.c.l.s8.bf16 %v1217_v2 }
 0x459   :  { %1658 = vmatprep.subr.bf16.mxu0 %v1532_v11  ;;  %1744 = vmatprep.subr.bf16.mxu1 %v1534_v0  ;;  %v1352_v11 = vunpack.c.h.s8.bf16 %v1216_v6  ;;  %v1354_v0 = vunpack.c.h.s8.bf16 %v1218_v7  ;;  %v1249_v6 = vld [vmem:[#allocation16 + $0x130] sm:$0xff] }
 0x45c   :  { %1659 = vmatpush1.bf16.msra.mxu0 %v1531_v12  ;;  %1745 = vmatpush1.bf16.msra.mxu1 %v1533_v13  ;;  %v1351_v12 = vunpack.c.h.s8.bf16 %v1215_v9  ;;  %v1353_v13 = vunpack.c.h.s8.bf16 %v1217_v2  ;;  %v1258_v9 = vld [vmem:[#allocation16 + $0x178] sm:$0xff] }
 0x45d   :  { %1660 = vmatprep.subr.bf16.mxu0 %v1540_v14  ;;  %1746 = vmatprep.subr.bf16.mxu1 %v1542_v15  ;;  %v1360_v14 = vunpack.c.l.s8.bf16 %v1224_v52  ;;  %v1223_v15 = vld [vmem:[#allocation16 + $0x60] sm:$0xff] }
 0x460   :  { %1661 = vmatpush1.bf16.msra.mxu0 %v1539_v19  ;;  %1747 = vmatpush1.bf16.msra.mxu1 %v1541_v22  ;;  %v1359_v19 = vunpack.c.l.s8.bf16 %v1223_v15  ;;  %v1361_v22 = vunpack.c.l.s8.bf16 %v1225_v18 }
 0x461   :  { %1662 = vmatprep.subr.bf16.mxu0 %v1548_v23  ;;  %1748 = vmatprep.subr.bf16.mxu1 %v1550_v24  ;;  %v1368_v23 = vunpack.c.h.s8.bf16 %v1224_v52  ;;  %v1370_v24 = vunpack.c.h.s8.bf16 %v1226_v53  ;;  %v1257_v52 = vld [vmem:[#allocation16 + $0x170] sm:$0xff] }
 0x464   :  { %1663 = vmatpush1.bf16.msra.mxu0 %v1547_v28  ;;  %1749 = vmatpush1.bf16.msra.mxu1 %v1549_v34  ;;  %v1367_v28 = vunpack.c.h.s8.bf16 %v1223_v15  ;;  %v1376_v34 = vunpack.c.l.s8.bf16 %v1232_v25  ;;  %v1264_v15 = vld [vmem:[#allocation16 + $0x1a8] sm:$0xff] }
 0x465   :  { %1664 = vmatprep.subr.bf16.mxu0 %v1556_v30  ;;  %1750 = vmatprep.subr.bf16.mxu1 %v1558_v47  ;;  %v1231_v30 = vld [vmem:[#allocation16 + $0xa0] sm:$0xff]  ;;  %v1378_v47 = vunpack.c.l.s8.bf16 %v1234_v26 }
 0x466   :  { %v1375_v48 = vunpack.c.l.s8.bf16 %v1231_v30  ;;  %v1383_v39 = vunpack.c.h.s8.bf16 %v1231_v30  ;;  %v1272_v30 = vld [vmem:[#allocation16 + $0x1e8] sm:$0xff] }
 0x468   :  { %1665 = vmatpush1.bf16.msra.mxu0 %v1555_v35  ;;  %1751 = vmatpush1.bf16.msra.mxu1 %v1557_v36  ;;  %v1377_v35 = vunpack.c.l.s8.bf16 %v1233_v33  ;;  %v1384_v36 = vunpack.c.h.s8.bf16 %v1232_v25  ;;  %v1265_v25 = vld [vmem:[#allocation16 + $0x1b0] sm:$0xff] }
 0x469   :  { %1666 = vmatprep.subr.bf16.mxu0 %v1564_v29  ;;  %1752 = vmatprep.subr.bf16.mxu1 %v1566_v37  ;;  %v1386_v29 = vunpack.c.h.s8.bf16 %v1234_v26  ;;  %v1240_v37 = vld [vmem:[#allocation16 + $0xe8] sm:$0xff] }
 0x46c   :  { %1667 = vmatpush1.bf16.msra.mxu0 %v1563_v40  ;;  %1753 = vmatpush1.bf16.msra.mxu1 %v1565_v41  ;;  %v1385_v40 = vunpack.c.h.s8.bf16 %v1233_v33  ;;  %v1392_v41 = vunpack.c.l.s8.bf16 %v1240_v37 }
 0x46d   :  { %1668 = vmatprep.subr.bf16.mxu0 %v1572_v42  ;;  %1754 = vmatprep.subr.bf16.mxu1 %v1574_v43  ;;  %v1239_v42 = vld [vmem:[#allocation16 + $0xe0] sm:$0xff]  ;;  %v1394_v43 = vunpack.c.l.s8.bf16 %v1242_v38 }
 0x46e   :  { %v1391_v45 = vunpack.c.l.s8.bf16 %v1239_v42  ;;  %v1399_v57 = vunpack.c.h.s8.bf16 %v1239_v42  ;;  %v1280_v42 = vld [vmem:[#allocation16 + $0x228] sm:$0xff] }
 0x470   :  { %1669 = vmatpush1.bf16.msra.mxu0 %v1571_v46  ;;  %1755 = vmatpush1.bf16.msra.mxu1 %v1573_v49  ;;  %v1393_v46 = vunpack.c.l.s8.bf16 %v1241_v44  ;;  %v1400_v49 = vunpack.c.h.s8.bf16 %v1240_v37  ;;  %v1273_v37 = vld [vmem:[#allocation16 + $0x1f0] sm:$0xff] }
 0x471   :  { %1670 = vmatprep.subr.bf16.mxu0 %v1580_v50  ;;  %1756 = vmatprep.subr.bf16.mxu1 %v1582_v51  ;;  %v1402_v50 = vunpack.c.h.s8.bf16 %v1242_v38  ;;  %v1248_v51 = vld [vmem:[#allocation16 + $0x128] sm:$0xff] }
 0x474   :  { %1671 = vmatpush1.bf16.msra.mxu0 %v1579_v58  ;;  %1757 = vmatpush1.bf16.msra.mxu1 %v1581_v59  ;;  %v1401_v58 = vunpack.c.h.s8.bf16 %v1241_v44  ;;  %v1408_v59 = vunpack.c.l.s8.bf16 %v1248_v51 }
 0x475   :  { %1672 = vmatprep.subr.bf16.mxu0 %v1588_v61  ;;  %1758 = vmatprep.subr.bf16.mxu1 %v1590_v3  ;;  %v1247_v61 = vld [vmem:[#allocation16 + $0x120] sm:$0xff]  ;;  %v1410_v3 = vunpack.c.l.s8.bf16 %v1250_v56 }
 0x476   :  { %v1407_v7 = vunpack.c.l.s8.bf16 %v1247_v61  ;;  %v1415_v2 = vunpack.c.h.s8.bf16 %v1247_v61 }
 0x478   :  { %1673 = vmatpush1.bf16.msra.mxu0 %v1587_v54  ;;  %1759 = vmatpush1.bf16.msra.mxu1 %v1589_v55  ;;  %v1409_v54 = vunpack.c.l.s8.bf16 %v1249_v6  ;;  %v1416_v55 = vunpack.c.h.s8.bf16 %v1248_v51  ;;  %v1281_v51 = vld [vmem:[#allocation16 + $0x230] sm:$0xff] }
 0x479   :  { %1771 = vmatprep.subr.bf16.mxu0 %v1344_v8  ;;  %1857 = vmatprep.subr.bf16.mxu1 %v1346_v1  ;;  %v1418_v8 = vunpack.c.h.s8.bf16 %v1250_v56  ;;  %v1256_v1 = vld [vmem:[#allocation16 + $0x168] sm:$0xff] }
 0x47b   :  { %1675 = vmatmul.mubr.bf16.vlgmr.msra.gmra.mrb[4].mxu0 %v4938_v27  ;;  %1761 = vmatmul.mubr.bf16.vlgmr.msra.gmra.mrb[12].mxu1 %v4938_v27 }
 0x47c   :  { %1772 = vmatpush1.bf16.msra.mxu0 %v1343_v10  ;;  %1803 = vmatprep.mubr.bf16.mxu0 %v4926_v16  ;;  %v1417_v10 = vunpack.c.h.s8.bf16 %v1249_v6 }
 0x47d   :  { %1858 = vmatpush1.bf16.msra.mxu1 %v1345_v63  ;;  %1889 = vmatprep.mubr.bf16.mxu1 %v4926_v16  ;;  %v1369_v16 = vunpack.c.h.s8.bf16 %v1225_v18  ;;  %v1424_v63 = vunpack.c.l.s8.bf16 %v1256_v1 }
 0x47e   :  { %1773 = vmatprep.subr.bf16.mxu0 %v1352_v11  ;;  %1859 = vmatprep.subr.bf16.mxu1 %v1354_v0  ;;  %v1255_v11 = vld [vmem:[#allocation16 + $0x160] sm:$0xff]  ;;  %v1426_v0 = vunpack.c.l.s8.bf16 %v1258_v9 }
 0x47f   :  { %v1423_v53 = vunpack.c.l.s8.bf16 %v1255_v11  ;;  %v1431_v18 = vunpack.c.h.s8.bf16 %v1255_v11  ;;  %v1298_v11 = vld [vmem:[#allocation16 + $0x2b8] sm:$0xff] }
 0x480   :  { %1774 = vmatpush1.bf16.msra.mxu0 %v1351_v12  ;;  %v1425_v12 = vunpack.c.l.s8.bf16 %v1257_v52 }
 0x481   :  { %1860 = vmatpush1.bf16.msra.mxu1 %v1353_v13  ;;  %1775 = vmatprep.subr.bf16.mxu0 %v1360_v14  ;;  %v1432_v13 = vunpack.c.h.s8.bf16 %v1256_v1  ;;  %v1434_v14 = vunpack.c.h.s8.bf16 %v1258_v9  ;;  %v1289_v1 = vld [vmem:[#allocation16 + $0x270] sm:$0xff] }
 0x482   :  { %1861 = vmatprep.subr.bf16.mxu1 %v1362_v17  ;;  %v1266_v17 = vld [vmem:[#allocation16 + $0x1b8] sm:$0xff] }
 0x484   :  { %1776 = vmatpush1.bf16.msra.mxu0 %v1359_v19  ;;  %v1433_v19 = vunpack.c.h.s8.bf16 %v1257_v52  ;;  %v1497_v52 = vunpack.c.h.s8.bf16 %v1289_v1 }
 0x485   :  { %1862 = vmatpush1.bf16.msra.mxu1 %v1361_v22  ;;  %1777 = vmatprep.subr.bf16.mxu0 %v1368_v23  ;;  %v1440_v22 = vunpack.c.l.s8.bf16 %v1264_v15  ;;  %v1263_v23 = vld [vmem:[#allocation16 + $0x1a0] sm:$0xff] }
 0x486   :  { %1863 = vmatprep.subr.bf16.mxu1 %v1370_v24  ;;  %v1442_v24 = vunpack.c.l.s8.bf16 %v1266_v17  ;;  %v1439_v26 = vunpack.c.l.s8.bf16 %v1263_v23  ;;  %v1447_v33 = vunpack.c.h.s8.bf16 %v1263_v23 }
 0x488   :  { %1778 = vmatpush1.bf16.msra.mxu0 %v1367_v28  ;;  %v1441_v28 = vunpack.c.l.s8.bf16 %v1265_v25 }
 0x489   :  { %1864 = vmatpush1.bf16.msra.mxu1 %v1369_v16  ;;  %1779 = vmatprep.subr.bf16.mxu0 %v1376_v34  ;;  %v1448_v16 = vunpack.c.h.s8.bf16 %v1264_v15  ;;  %v1450_v34 = vunpack.c.h.s8.bf16 %v1266_v17 }
 0x48a   :  { %1865 = vmatprep.subr.bf16.mxu1 %v1378_v47  ;;  %v1274_v47 = vld [vmem:[#allocation16 + $0x1f8] sm:$0xff] }
 0x48c   :  { %1780 = vmatpush1.bf16.msra.mxu0 %v1375_v48  ;;  %v1449_v48 = vunpack.c.h.s8.bf16 %v1265_v25 }
 0x48d   :  { %1866 = vmatpush1.bf16.msra.mxu1 %v1377_v35  ;;  %1781 = vmatprep.subr.bf16.mxu0 %v1384_v36  ;;  %v1456_v35 = vunpack.c.l.s8.bf16 %v1272_v30  ;;  %v1271_v36 = vld [vmem:[#allocation16 + $0x1e0] sm:$0xff] }
 0x48e   :  { %1867 = vmatprep.subr.bf16.mxu1 %v1386_v29  ;;  %v1458_v29 = vunpack.c.l.s8.bf16 %v1274_v47  ;;  %v1455_v38 = vunpack.c.l.s8.bf16 %v1271_v36  ;;  %v1463_v44 = vunpack.c.h.s8.bf16 %v1271_v36 }
 0x490   :  { %1782 = vmatpush1.bf16.msra.mxu0 %v1383_v39  ;;  %v1457_v39 = vunpack.c.l.s8.bf16 %v1273_v37 }
 0x491   :  { %1868 = vmatpush1.bf16.msra.mxu1 %v1385_v40  ;;  %1783 = vmatprep.subr.bf16.mxu0 %v1392_v41  ;;  %v1464_v40 = vunpack.c.h.s8.bf16 %v1272_v30  ;;  %v1466_v41 = vunpack.c.h.s8.bf16 %v1274_v47 }
 0x492   :  { %1869 = vmatprep.subr.bf16.mxu1 %v1394_v43  ;;  %v1282_v43 = vld [vmem:[#allocation16 + $0x238] sm:$0xff] }
 0x493   :  { %v1482_v61 = vunpack.c.h.s8.bf16 %v1282_v43 }
 0x494   :  { %1784 = vmatpush1.bf16.msra.mxu0 %v1391_v45  ;;  %v1465_v45 = vunpack.c.h.s8.bf16 %v1273_v37 }
 0x495   :  { %1870 = vmatpush1.bf16.msra.mxu1 %v1393_v46  ;;  %1785 = vmatprep.subr.bf16.mxu0 %v1400_v49  ;;  %v1472_v46 = vunpack.c.l.s8.bf16 %v1280_v42  ;;  %v1279_v49 = vld [vmem:[#allocation16 + $0x220] sm:$0xff] }
 0x496   :  { %1871 = vmatprep.subr.bf16.mxu1 %v1402_v50  ;;  %v1474_v50 = vunpack.c.l.s8.bf16 %v1282_v43  ;;  %v1471_v56 = vunpack.c.l.s8.bf16 %v1279_v49  ;;  %v1479_v6 = vunpack.c.h.s8.bf16 %v1279_v49 }
 0x498   :  { %1786 = vmatpush1.bf16.msra.mxu0 %v1399_v57  ;;  %v1473_v57 = vunpack.c.l.s8.bf16 %v1281_v51 }
 0x499   :  { %1872 = vmatpush1.bf16.msra.mxu1 %v1401_v58  ;;  %1787 = vmatprep.subr.bf16.mxu0 %v1408_v59  ;;  %v1480_v58 = vunpack.c.h.s8.bf16 %v1280_v42  ;;  %v1288_v59 = vld [vmem:[#allocation16 + $0x268] sm:$0xff] }
 0x49a   :  { %1873 = vmatprep.subr.bf16.mxu1 %v1410_v3  ;;  %v1290_v3 = vld [vmem:[#allocation16 + $0x278] sm:$0xff] }
 0x49c   :  { %1788 = vmatpush1.bf16.msra.mxu0 %v1407_v7  ;;  %v1481_v7 = vunpack.c.h.s8.bf16 %v1281_v51 }
 0x49d   :  { %1874 = vmatpush1.bf16.msra.mxu1 %v1409_v54  ;;  %1789 = vmatprep.subr.bf16.mxu0 %v1416_v55  ;;  %v1488_v54 = vunpack.c.l.s8.bf16 %v1288_v59  ;;  %v1287_v55 = vld [vmem:[#allocation16 + $0x260] sm:$0xff] }
 0x49e   :  { %1875 = vmatprep.subr.bf16.mxu1 %v1418_v8  ;;  %v1490_v8 = vunpack.c.l.s8.bf16 %v1290_v3  ;;  %v1487_v9 = vunpack.c.l.s8.bf16 %v1287_v55 }
 0x4a0   :  { %1790 = vmatpush1.bf16.msra.mxu0 %v1415_v2  ;;  %v1489_v2 = vunpack.c.l.s8.bf16 %v1289_v1 }
 0x4a1   :  { %1876 = vmatpush1.bf16.msra.mxu1 %v1417_v10  ;;  %1791 = vmatprep.subr.bf16.mxu0 %v1424_v63  ;;  %v1498_v10 = vunpack.c.h.s8.bf16 %v1290_v3  ;;  %v1296_v63 = vld [vmem:[#allocation16 + $0x2a8] sm:$0xff] }
 0x4a2   :  { %1877 = vmatprep.subr.bf16.mxu1 %v1426_v0  ;;  %v1495_v0 = vunpack.c.h.s8.bf16 %v1287_v55  ;;  %v1512_v17 = vunpack.c.h.s8.bf16 %v1296_v63 }
 0x4a4   :  { %1792 = vmatpush1.bf16.msra.mxu0 %v1423_v53  ;;  %v1295_v53 = vld [vmem:[#allocation16 + $0x2a0] sm:$0xff] }
 0x4a5   :  { %1878 = vmatpush1.bf16.msra.mxu1 %v1425_v12  ;;  %1793 = vmatprep.subr.bf16.mxu0 %v1432_v13  ;;  %v1506_v12 = vunpack.c.l.s8.bf16 %v1298_v11  ;;  %v1297_v13 = vld [vmem:[#allocation16 + $0x2b0] sm:$0xff]  ;;  %v1511_v23 = vunpack.c.h.s8.bf16 %v1295_v53 }
 0x4a6   :  { %1879 = vmatprep.subr.bf16.mxu1 %v1434_v14  ;;  %v1503_v14 = vunpack.c.l.s8.bf16 %v1295_v53  ;;  %v1505_v15 = vunpack.c.l.s8.bf16 %v1297_v13 }
 0x4a8   :  { %1794 = vmatpush1.bf16.msra.mxu0 %v1431_v18  ;;  %v1514_v18 = vunpack.c.h.s8.bf16 %v1298_v11 }
 0x4a9   :  { %1880 = vmatpush1.bf16.msra.mxu1 %v1433_v19  ;;  %1795 = vmatprep.subr.bf16.mxu0 %v1440_v22  ;;  %v1304_v19 = vld [vmem:[#allocation16 + $0x2e8] sm:$0xff]  ;;  %v1306_v22 = vld [vmem:[#allocation16 + $0x2f8] sm:$0xff] }
 0x4aa   :  { %1881 = vmatprep.subr.bf16.mxu1 %v1442_v24  ;;  %v1513_v24 = vunpack.c.h.s8.bf16 %v1297_v13  ;;  %v1520_v25 = vunpack.c.l.s8.bf16 %v1304_v19  ;;  %v1528_v47 = vunpack.c.h.s8.bf16 %v1304_v19 }
 0x4ac   :  { %1796 = vmatpush1.bf16.msra.mxu0 %v1439_v26  ;;  %v1303_v26 = vld [vmem:[#allocation16 + $0x2e0] sm:$0xff] }
 0x4ad   :  { %1882 = vmatpush1.bf16.msra.mxu1 %v1441_v28  ;;  %1797 = vmatprep.subr.bf16.mxu0 %v1448_v16  ;;  %v1522_v28 = vunpack.c.l.s8.bf16 %v1306_v22  ;;  %v1305_v16 = vld [vmem:[#allocation16 + $0x2f0] sm:$0xff]  ;;  %v1527_v36 = vunpack.c.h.s8.bf16 %v1303_v26 }
 0x4ae   :  { %1883 = vmatprep.subr.bf16.mxu1 %v1450_v34  ;;  %v1519_v34 = vunpack.c.l.s8.bf16 %v1303_v26  ;;  %v1521_v30 = vunpack.c.l.s8.bf16 %v1305_v16  ;;  %v4955_v26 = vld [vmem:[%s5257_s10] sm:$0xff] }
 0x4b0   :  { %1798 = vmatpush1.bf16.msra.mxu0 %v1447_v33  ;;  %v1530_v33 = vunpack.c.h.s8.bf16 %v1306_v22 }
 0x4b1   :  { %1884 = vmatpush1.bf16.msra.mxu1 %v1449_v48  ;;  %1799 = vmatprep.subr.bf16.mxu0 %v1456_v35  ;;  %v1312_v48 = vld [vmem:[#allocation16 + $0x328] sm:$0xff]  ;;  %v1314_v35 = vld [vmem:[#allocation16 + $0x338] sm:$0xff] }
 0x4b2   :  { %1885 = vmatprep.subr.bf16.mxu1 %v1458_v29  ;;  %v1529_v29 = vunpack.c.h.s8.bf16 %v1305_v16  ;;  %v1536_v37 = vunpack.c.l.s8.bf16 %v1312_v48  ;;  %v1544_v43 = vunpack.c.h.s8.bf16 %v1312_v48  ;;  %v1956_v16 = vrot.slane %v4955_v26, %v4912_v32 }
 0x4b4   :  { %1800 = vmatpush1.bf16.msra.mxu0 %v1455_v38  ;;  %v1311_v38 = vld [vmem:[#allocation16 + $0x320] sm:$0xff] }
 0x4b5   :  { %1886 = vmatpush1.bf16.msra.mxu1 %v1457_v39  ;;  %1801 = vmatprep.subr.bf16.mxu0 %v1464_v40  ;;  %v1538_v39 = vunpack.c.l.s8.bf16 %v1314_v35  ;;  %v1313_v40 = vld [vmem:[#allocation16 + $0x330] sm:$0xff]  ;;  %v1543_v49 = vunpack.c.h.s8.bf16 %v1311_v38 }
 0x4b6   :  { %1887 = vmatprep.subr.bf16.mxu1 %v1466_v41  ;;  %v1535_v41 = vunpack.c.l.s8.bf16 %v1311_v38  ;;  %v1537_v42 = vunpack.c.l.s8.bf16 %v1313_v40 }
 0x4b8   :  { %1802 = vmatpush1.bf16.msra.mxu0 %v1463_v44  ;;  %v1546_v44 = vunpack.c.h.s8.bf16 %v1314_v35 }
 0x4b9   :  { %1888 = vmatpush1.bf16.msra.mxu1 %v1465_v45  ;;  %1814 = vmatprep.subr.bf16.mxu0 %v1472_v46  ;;  %v1320_v45 = vld [vmem:[#allocation16 + $0x368] sm:$0xff]  ;;  %v1322_v46 = vld [vmem:[#allocation16 + $0x378] sm:$0xff] }
 0x4ba   :  { %1900 = vmatprep.subr.bf16.mxu1 %v1474_v50  ;;  %v1545_v50 = vunpack.c.h.s8.bf16 %v1313_v40  ;;  %v1552_v51 = vunpack.c.l.s8.bf16 %v1320_v45  ;;  %v1560_v3 = vunpack.c.h.s8.bf16 %v1320_v45 }
 0x4bb   :  { %1804 = vmatmul.mubr.bf16.vlgmr.msra.gmra.mrb[8].mxu0 %v4928_v20 }
 0x4bc   :  { %1890 = vmatmul.mubr.bf16.vlgmr.msra.gmra.mrb[16].mxu1 %v4928_v20  ;;  %1815 = vmatpush1.bf16.msra.mxu0 %v1471_v56  ;;  %v1496_v20 = vunpack.c.h.s8.bf16 %v1288_v59  ;;  %v1319_v56 = vld [vmem:[#allocation16 + $0x360] sm:$0xff] }
 0x4bd   :  { %1846 = vmatprep.mubr.bf16.mxu0 %v4930_v21  ;;  %1901 = vmatpush1.bf16.msra.mxu1 %v1473_v57  ;;  %v1554_v57 = vunpack.c.l.s8.bf16 %v1322_v46  ;;  %v1551_v59 = vunpack.c.l.s8.bf16 %v1319_v56  ;;  %v1559_v55 = vunpack.c.h.s8.bf16 %v1319_v56 }
 0x4be   :  { %1932 = vmatprep.mubr.bf16.mxu1 %v4930_v21  ;;  %1816 = vmatprep.subr.bf16.mxu0 %v1480_v58  ;;  %v1504_v21 = vunpack.c.l.s8.bf16 %v1296_v63  ;;  %v1321_v58 = vld [vmem:[#allocation16 + $0x370] sm:$0xff] }
 0x4bf   :  { %1902 = vmatprep.subr.bf16.mxu1 %v1482_v61  ;;  %v1553_v61 = vunpack.c.l.s8.bf16 %v1321_v58 }
 0x4c0   :  { %1817 = vmatpush1.bf16.msra.mxu0 %v1479_v6  ;;  %v1562_v6 = vunpack.c.h.s8.bf16 %v1322_v46 }
 0x4c1   :  { %1903 = vmatpush1.bf16.msra.mxu1 %v1481_v7  ;;  %1818 = vmatprep.subr.bf16.mxu0 %v1488_v54  ;;  %v1328_v7 = vld [vmem:[#allocation16 + $0x3a8] sm:$0xff]  ;;  %v1330_v54 = vld [vmem:[#allocation16 + $0x3b8] sm:$0xff] }
 0x4c2   :  { %1904 = vmatprep.subr.bf16.mxu1 %v1490_v8  ;;  %v1561_v8 = vunpack.c.h.s8.bf16 %v1321_v58  ;;  %v1568_v1 = vunpack.c.l.s8.bf16 %v1328_v7  ;;  %v1576_v11 = vunpack.c.h.s8.bf16 %v1328_v7 }
 0x4c4   :  { %1819 = vmatpush1.bf16.msra.mxu0 %v1487_v9  ;;  %v1327_v9 = vld [vmem:[#allocation16 + $0x3a0] sm:$0xff] }
 0x4c5   :  { %1905 = vmatpush1.bf16.msra.mxu1 %v1489_v2  ;;  %1820 = vmatprep.subr.bf16.mxu0 %v1496_v20  ;;  %v1570_v2 = vunpack.c.l.s8.bf16 %v1330_v54  ;;  %v1329_v20 = vld [vmem:[#allocation16 + $0x3b0] sm:$0xff]  ;;  %v1575_v53 = vunpack.c.h.s8.bf16 %v1327_v9 }
 0x4c6   :  { %1906 = vmatprep.subr.bf16.mxu1 %v1498_v10  ;;  %v1567_v10 = vunpack.c.l.s8.bf16 %v1327_v9  ;;  %v1569_v63 = vunpack.c.l.s8.bf16 %v1329_v20 }
 0x4c8   :  { %1821 = vmatpush1.bf16.msra.mxu0 %v1495_v0  ;;  %v1578_v0 = vunpack.c.h.s8.bf16 %v1330_v54 }
 0x4c9   :  { %1907 = vmatpush1.bf16.msra.mxu1 %v1497_v52  ;;  %1822 = vmatprep.subr.bf16.mxu0 %v1504_v21  ;;  %v1336_v52 = vld [vmem:[#allocation16 + $0x3e8] sm:$0xff]  ;;  %v1338_v21 = vld [vmem:[#allocation16 + $0x3f8] sm:$0xff] }
 0x4ca   :  { %1908 = vmatprep.subr.bf16.mxu1 %v1506_v12  ;;  %v1577_v12 = vunpack.c.h.s8.bf16 %v1329_v20  ;;  %v1584_v13 = vunpack.c.l.s8.bf16 %v1336_v52  ;;  %v1592_v22 = vunpack.c.h.s8.bf16 %v1336_v52 }
 0x4cc   :  { %1823 = vmatpush1.bf16.msra.mxu0 %v1503_v14  ;;  %v1335_v14 = vld [vmem:[#allocation16 + $0x3e0] sm:$0xff] }
 0x4cd   :  { %1909 = vmatpush1.bf16.msra.mxu1 %v1505_v15  ;;  %1824 = vmatprep.subr.bf16.mxu0 %v1512_v17  ;;  %v1586_v15 = vunpack.c.l.s8.bf16 %v1338_v21  ;;  %v1337_v17 = vld [vmem:[#allocation16 + $0x3f0] sm:$0xff] }
 0x4ce   :  { %1910 = vmatprep.subr.bf16.mxu1 %v1514_v18  ;;  %v1583_v18 = vunpack.c.l.s8.bf16 %v1335_v14  ;;  %v1585_v19 = vunpack.c.l.s8.bf16 %v1337_v17 }
 0x4d0   :  { %1825 = vmatpush1.bf16.msra.mxu0 %v1511_v23  ;;  %v1594_v23 = vunpack.c.h.s8.bf16 %v1338_v21 }
 0x4d1   :  { %1911 = vmatpush1.bf16.msra.mxu1 %v1513_v24  ;;  %1826 = vmatprep.subr.bf16.mxu0 %v1520_v25  ;;  %v1591_v24 = vunpack.c.h.s8.bf16 %v1335_v14  ;;  %v1593_v25 = vunpack.c.h.s8.bf16 %v1337_v17 }
 0x4d2   :  { %1912 = vmatprep.subr.bf16.mxu1 %v1522_v28  ;;  %v1948_v28 = vrot.slane %v4955_v26, %v4870_v4 }
 0x4d4   :  { %1827 = vmatpush1.bf16.msra.mxu0 %v1519_v34 }
 0x4d5   :  { %1913 = vmatpush1.bf16.msra.mxu1 %v1521_v30  ;;  %1828 = vmatprep.subr.bf16.mxu0 %v1528_v47  ;;  %v1952_v47 = vrot.slane %v4955_v26, %v4873_v5 }
 0x4d6   :  { %1914 = vmatprep.subr.bf16.mxu1 %v1530_v33  ;;  %v1960_v33 = vrot.slane %v4955_v26, %v4909_v31 }
 0x4d8   :  { %1829 = vmatpush1.bf16.msra.mxu0 %v1527_v36 }
 0x4d9   :  { %1915 = vmatpush1.bf16.msra.mxu1 %v1529_v29  ;;  %1830 = vmatprep.subr.bf16.mxu0 %v1536_v37 }
 0x4da   :  { %1916 = vmatprep.subr.bf16.mxu1 %v1538_v39 }
 0x4dc   :  { %1831 = vmatpush1.bf16.msra.mxu0 %v1535_v41 }
 0x4dd   :  { %1917 = vmatpush1.bf16.msra.mxu1 %v1537_v42  ;;  %1832 = vmatprep.subr.bf16.mxu0 %v1544_v43 }
 0x4de   :  { %1918 = vmatprep.subr.bf16.mxu1 %v1546_v44 }
 0x4e0   :  { %1833 = vmatpush1.bf16.msra.mxu0 %v1543_v49 }
 0x4e1   :  { %1919 = vmatpush1.bf16.msra.mxu1 %v1545_v50  ;;  %1834 = vmatprep.subr.bf16.mxu0 %v1552_v51 }
 0x4e2   :  { %1920 = vmatprep.subr.bf16.mxu1 %v1554_v57 }
 0x4e4   :  { %1835 = vmatpush1.bf16.msra.mxu0 %v1551_v59 }
 0x4e5   :  { %1921 = vmatpush1.bf16.msra.mxu1 %v1553_v61  ;;  %1836 = vmatprep.subr.bf16.mxu0 %v1560_v3 }
 0x4e6   :  { %1922 = vmatprep.subr.bf16.mxu1 %v1562_v6 }
 0x4e8   :  { %1837 = vmatpush1.bf16.msra.mxu0 %v1559_v55 }
 0x4e9   :  { %1923 = vmatpush1.bf16.msra.mxu1 %v1561_v8  ;;  %1838 = vmatprep.subr.bf16.mxu0 %v1568_v1 }
 0x4ea   :  { %1924 = vmatprep.subr.bf16.mxu1 %v1570_v2 }
 0x4ec   :  { %1839 = vmatpush1.bf16.msra.mxu0 %v1567_v10 }
 0x4ed   :  { %1925 = vmatpush1.bf16.msra.mxu1 %v1569_v63  ;;  %1840 = vmatprep.subr.bf16.mxu0 %v1576_v11  ;;  %v2385_v63 = vld [vmem:[#allocation17 + $0x8] sm:$0xff]  ;;  %v2387_v11 = vld [vmem:[#allocation17 + $0x18] sm:$0xff] }
 0x4ee   :  { %1926 = vmatprep.subr.bf16.mxu1 %v1578_v0  ;;  %v2609_v21 = vunpack.c.l.s8.bf16 %v2385_v63 }
 0x4f0   :  { %1841 = vmatpush1.bf16.msra.mxu0 %v1575_v53  ;;  %v2611_v53 = vunpack.c.l.s8.bf16 %v2387_v11 }
 0x4f1   :  { %1927 = vmatpush1.bf16.msra.mxu1 %v1577_v12  ;;  %1842 = vmatprep.subr.bf16.mxu0 %v1584_v13  ;;  %v2384_v12 = vld [vmem:[#allocation17] sm:$0xff]  ;;  %v2386_v13 = vld [vmem:[#allocation17 + $0x10] sm:$0xff] }
 0x4f2   :  { %1928 = vmatprep.subr.bf16.mxu1 %v1586_v15  ;;  %v2608_v17 = vunpack.c.l.s8.bf16 %v2384_v12 }
 0x4f4   :  { %1843 = vmatpush1.bf16.msra.mxu0 %v1583_v18  ;;  %v2610_v18 = vunpack.c.l.s8.bf16 %v2386_v13 }
 0x4f5   :  { %1929 = vmatpush1.bf16.msra.mxu1 %v1585_v19  ;;  %1844 = vmatprep.subr.bf16.mxu0 %v1592_v22 }
 0x4f6   :  { %1930 = vmatprep.subr.bf16.mxu1 %v1594_v23 }
 0x4f8   :  { %1845 = vmatpush1.bf16.msra.mxu0 %v1591_v24 }
 0x4f9   :  { %1931 = vmatpush1.bf16.msra.mxu1 %v1593_v25  ;;  %3064 = vmatprep.subr.bf16.mxu0 %v2609_v21 }
 0x4fa   :  { %3236 = vmatprep.subr.bf16.mxu1 %v2611_v53 }
 0x4fb   :  { %1847 = vmatmul.mubr.bf16.vlgmr.msra.gmra.mrb[8].mxu0 %v4938_v27 }
 0x4fc   :  { %1933 = vmatmul.mubr.bf16.vlgmr.msra.gmra.mrb[16].mxu1 %v4938_v27  ;;  %3065 = vmatpush1.bf16.msra.mxu0 %v2608_v17 }
 0x4fd   :  { %3237 = vmatpush1.bf16.msra.mxu1 %v2610_v18 }
 0x54e   :  { %v1676_v34 = vpop.f32.mrb[4].mxu0  ;;  %v1762_v30 = vpop.f32.mrb[12].mxu1 }
 0x54f   :  { %v1678_v27 = vpop.f32.mrb[5].mxu0  ;;  %v1764_v48 = vpop.f32.mrb[13].mxu1  ;;  %v1985_v29 = vmul.f32 %v1948_v28, %v1676_v34  ;;  %v1987_v37 = vmul.f32 %v1956_v16, %v1762_v30  ;;  %v2618_v34 = vunpack.c.h.s8.bf16 %v2387_v11 }
 0x550   :  { %v1680_v35 = vpop.f32.mrb[6].mxu0  ;;  %v1766_v36 = vpop.f32.mrb[14].mxu1  ;;  %v1986_v42 = vmul.f32 %v1952_v47, %v1678_v27  ;;  %v1988_v43 = vmul.f32 %v1960_v33, %v1764_v48  ;;  %v2617_v27 = vunpack.c.h.s8.bf16 %v2386_v13  ;;  %v2399_v13 = vld [vmem:[#allocation17 + $0x78] sm:$0xff] }
 0x551   :  { %v1993_v38 = vmul.f32 %v1948_v28, %v1680_v35  ;;  %v1995_v39 = vmul.f32 %v1956_v16, %v1766_v36  ;;  %v1682_v40 = vpop.f32.mrb[7].mxu0  ;;  %v1768_v41 = vpop.f32.mrb[15].mxu1  ;;  %v2616_v16 = vunpack.c.h.s8.bf16 %v2385_v63  ;;  %3238 = vmatprep.subr.bf16.mxu1 %v2618_v34  ;;  %v2637_v18 = vunpack.c.l.s8.bf16 %v2399_v13 }
 0x552   :  { %v1994_v44 = vmul.f32 %v1952_v47, %v1682_v40  ;;  %v1996_v45 = vmul.f32 %v1960_v33, %v1768_v41  ;;  %v2615_v33 = vunpack.c.h.s8.bf16 %v2384_v12  ;;  %3239 = vmatpush1.bf16.msra.mxu1 %v2617_v27 }
 0x553   :  { %v2003_v46 = vadd.f32 %v1993_v38, %v1985_v29  ;;  %v2017_v49 = vadd.f32 %v1995_v39, %v1987_v37  ;;  %3066 = vmatprep.subr.bf16.mxu0 %v2616_v16 }
 0x554   :  { %v2010_v50 = vadd.f32 %v1994_v44, %v1986_v42  ;;  %v2024_v51 = vadd.f32 %v1996_v45, %v1988_v43  ;;  %3067 = vmatpush1.bf16.msra.mxu0 %v2615_v33 }
 0x555   :  { %v2004_v56 = vrot.slane %v2003_v46, 4  ;;  %v2018_v57 = vrot.slane %v2017_v49, 4 }
 0x556   :  { %v2011_v58 = vrot.slane %v2010_v50, 4  ;;  %v2025_v59 = vrot.slane %v2024_v51, 4 }
 0x557   :  { %v2005_v61 = vadd.f32 %v2004_v56, %v2003_v46  ;;  %v2019_v3 = vadd.f32 %v2018_v57, %v2017_v49  ;;  %v2394_v56 = vld [vmem:[#allocation17 + $0x50] sm:$0xff] }
 0x558   :  { %v2012_v6 = vadd.f32 %v2011_v58, %v2010_v50  ;;  %v2026_v7 = vadd.f32 %v2025_v59, %v2024_v51  ;;  %v2392_v51 = vld [vmem:[#allocation17 + $0x40] sm:$0xff] }
 0x559   :  { %v2006_v54 = vrot.slane %v2005_v61, 2  ;;  %v2020_v55 = vrot.slane %v2019_v3, 2 }
 0x55a   :  { %v2013_v8 = vrot.slane %v2012_v6, 2  ;;  %v2027_v1 = vrot.slane %v2026_v7, 2 }
 0x55b   :  { %v2007_v9 = vadd.f32 %v2006_v54, %v2005_v61  ;;  %v2021_v2 = vadd.f32 %v2020_v55, %v2019_v3  ;;  %v2623_v3 = vunpack.c.l.s8.bf16 %v2392_v51 }
 0x55c   :  { %v2014_v20 = vadd.f32 %v2013_v8, %v2012_v6  ;;  %v2028_v10 = vadd.f32 %v2027_v1, %v2026_v7  ;;  %v2625_v6 = vunpack.c.l.s8.bf16 %v2394_v56 }
 0x55d   :  { %v2008_v0 = vrot.slane %v2007_v9, 1  ;;  %v2022_v52 = vrot.slane %v2021_v2, 1  ;;  %3068 = vmatprep.subr.bf16.mxu0 %v2623_v3 }
 0x55e   :  { %v2015_v14 = vrot.slane %v2014_v20, 1  ;;  %v2029_v15 = vrot.slane %v2028_v10, 1  ;;  %3240 = vmatprep.subr.bf16.mxu1 %v2625_v6 }
 0x55f   :  { %v2009_v19 = vadd.f32 %v2008_v0, %v2007_v9  ;;  %v2023_v22 = vadd.f32 %v2022_v52, %v2021_v2  ;;  %v2630_v2 = vunpack.c.h.s8.bf16 %v2392_v51 }
 0x560   :  { %v2016_v23 = vadd.f32 %v2015_v14, %v2014_v20  ;;  %v2030_v24 = vadd.f32 %v2029_v15, %v2028_v10  ;;  %v2632_v20 = vunpack.c.h.s8.bf16 %v2394_v56  ;;  %v2401_v14 = vld [vmem:[#allocation17 + $0x88] sm:$0xff]  ;;  %v2644_v56 = vunpack.c.h.s8.bf16 %v2399_v13  ;;  %v2415_v13 = vld [vmem:[#allocation17 + $0xf8] sm:$0xff] }
 0x561   :  { %v2059_v25 = vmul.f32 0.0625, %v2009_v19  ;;  %v2061_v28 = vmul.f32 0.0625, %v2023_v22  ;;  %v2639_v19 = vunpack.c.l.s8.bf16 %v2401_v14  ;;  %v2398_v22 = vld [vmem:[#allocation17 + $0x70] sm:$0xff] }
 0x562   :  { %v2060_v30 = vmul.f32 0.0625, %v2016_v23  ;;  %v2062_v47 = vmul.f32 0.0625, %v2030_v24  ;;  %v2400_v23 = vld [vmem:[#allocation17 + $0x80] sm:$0xff] }
 0x563   :  { %v4965_v48 = vsub.f32 %v1985_v29, %v2059_v25  ;;  %v4967_v35 = vsub.f32 %v1993_v38, %v2059_v25  ;;  %v4969_v36 = vsub.f32 %v1987_v37, %v2061_v28  ;;  %v4971_v40 = vsub.f32 %v1995_v39, %v2061_v28 }
 0x564   :  { %v4973_v41 = vsub.f32 %v1986_v42, %v2060_v30  ;;  %v4975_v46 = vsub.f32 %v1994_v44, %v2060_v30  ;;  %v4977_v49 = vsub.f32 %v1988_v43, %v2062_v47  ;;  %v4979_v50 = vsub.f32 %v1996_v45, %v2062_v47  ;;  %v2391_v42 = vld [vmem:[#allocation17 + $0x38] sm:$0xff]  ;;  %v2393_v43 = vld [vmem:[#allocation17 + $0x48] sm:$0xff] }
 0x565   :  { %v2083_v29 = vmul.f32 %v4965_v48, %v4965_v48  ;;  %v2091_v37 = vmul.f32 %v4967_v35, %v4967_v35  ;;  %v2085_v38 = vmul.f32 %v4969_v36, %v4969_v36  ;;  %v2093_v39 = vmul.f32 %v4971_v40, %v4971_v40 }
 0x566   :  { %v2084_v44 = vmul.f32 %v4973_v41, %v4973_v41  ;;  %v2092_v45 = vmul.f32 %v4975_v46, %v4975_v46  ;;  %v2086_v57 = vmul.f32 %v4977_v49, %v4977_v49  ;;  %v2094_v58 = vmul.f32 %v4979_v50, %v4979_v50 }
 0x567   :  { %v2099_v59 = vadd.f32 %v2091_v37, %v2083_v29  ;;  %v2113_v61 = vadd.f32 %v2093_v39, %v2085_v38  ;;  %v2622_v55 = vunpack.c.l.s8.bf16 %v2391_v42  ;;  %v2624_v8 = vunpack.c.l.s8.bf16 %v2393_v43 }
 0x568   :  { %v2106_v7 = vadd.f32 %v2092_v45, %v2084_v44  ;;  %v2120_v54 = vadd.f32 %v2094_v58, %v2086_v57  ;;  %v2629_v11 = vunpack.c.h.s8.bf16 %v2391_v42  ;;  %v2631_v0 = vunpack.c.h.s8.bf16 %v2393_v43  ;;  %v2406_v58 = vld [vmem:[#allocation17 + $0xb0] sm:$0xff] }
 0x569   :  { %v2100_v1 = vrot.slane %v2099_v59, 4  ;;  %v2114_v9 = vrot.slane %v2113_v61, 4  ;;  %3069 = vmatpush1.bf16.msra.mxu0 %v2622_v55  ;;  %3241 = vmatpush1.bf16.msra.mxu1 %v2624_v8  ;;  %v2636_v28 = vunpack.c.l.s8.bf16 %v2398_v22  ;;  %v2638_v16 = vunpack.c.l.s8.bf16 %v2400_v23  ;;  %v2407_v55 = vld [vmem:[#allocation17 + $0xb8] sm:$0xff] }
 0x56a   :  { %v2107_v10 = vrot.slane %v2106_v7, 4  ;;  %v2121_v63 = vrot.slane %v2120_v54, 4  ;;  %3070 = vmatprep.subr.bf16.mxu0 %v2630_v2  ;;  %3242 = vmatprep.subr.bf16.mxu1 %v2632_v20  ;;  %v2646_v29 = vunpack.c.h.s8.bf16 %v2401_v14  ;;  %v2643_v39 = vunpack.c.h.s8.bf16 %v2398_v22 }
 0x56b   :  { %v2101_v52 = vadd.f32 %v2100_v1, %v2099_v59  ;;  %v2115_v21 = vadd.f32 %v2114_v9, %v2113_v61  ;;  %v2645_v42 = vunpack.c.h.s8.bf16 %v2400_v23  ;;  %v2408_v59 = vld [vmem:[#allocation17 + $0xc0] sm:$0xff]  ;;  %v2651_v6 = vunpack.c.l.s8.bf16 %v2406_v58 }
 0x56c   :  { %v2108_v53 = vadd.f32 %v2107_v10, %v2106_v7  ;;  %v2122_v12 = vadd.f32 %v2121_v63, %v2120_v54  ;;  %v2653_v7 = vunpack.c.l.s8.bf16 %v2408_v59  ;;  %v2405_v54 = vld [vmem:[#allocation17 + $0xa8] sm:$0xff]  ;;  %v2652_v2 = vunpack.c.l.s8.bf16 %v2407_v55 }
 0x56d   :  { %v2102_v15 = vrot.slane %v2101_v52, 2  ;;  %v2116_v17 = vrot.slane %v2115_v21, 2  ;;  %3071 = vmatpush1.bf16.msra.mxu0 %v2629_v11  ;;  %3243 = vmatpush1.bf16.msra.mxu1 %v2631_v0  ;;  %v2650_v9 = vunpack.c.l.s8.bf16 %v2405_v54  ;;  %v2658_v0 = vunpack.c.h.s8.bf16 %v2406_v58 }
 0x56e   :  { %v2109_v24 = vrot.slane %v2108_v53, 2  ;;  %v2123_v25 = vrot.slane %v2122_v12, 2  ;;  %3072 = vmatprep.subr.bf16.mxu0 %v2637_v18  ;;  %3244 = vmatprep.subr.bf16.mxu1 %v2639_v19  ;;  %v2414_v18 = vld [vmem:[#allocation17 + $0xf0] sm:$0xff] }
 0x56f   :  { %v2103_v34 = vadd.f32 %v2102_v15, %v2101_v52  ;;  %v2117_v30 = vadd.f32 %v2116_v17, %v2115_v21  ;;  %v2660_v52 = vunpack.c.h.s8.bf16 %v2408_v59  ;;  %v2657_v21 = vunpack.c.h.s8.bf16 %v2405_v54  ;;  %v2412_v17 = vld [vmem:[#allocation17 + $0xe0] sm:$0xff] }
 0x570   :  { %v2110_v47 = vadd.f32 %v2109_v24, %v2108_v53  ;;  %v2124_v33 = vadd.f32 %v2123_v25, %v2122_v12  ;;  %v2659_v53 = vunpack.c.h.s8.bf16 %v2407_v55  ;;  %v2413_v12 = vld [vmem:[#allocation17 + $0xe8] sm:$0xff]  ;;  %v2667_v15 = vunpack.c.l.s8.bf16 %v2415_v13 }
 0x571   :  { %v2104_v27 = vrot.slane %v2103_v34, 1  ;;  %v2118_v51 = vrot.slane %v2117_v30, 1  ;;  %3073 = vmatpush1.bf16.msra.mxu0 %v2636_v28  ;;  %3245 = vmatpush1.bf16.msra.mxu1 %v2638_v16  ;;  %v2665_v14 = vunpack.c.l.s8.bf16 %v2413_v12  ;;  %v2664_v19 = vunpack.c.l.s8.bf16 %v2412_v17 }
 0x572   :  { %v2111_v37 = vrot.slane %v2110_v47, 1  ;;  %v2125_v38 = vrot.slane %v2124_v33, 1  ;;  %3074 = vmatprep.subr.bf16.mxu0 %v2644_v56  ;;  %3246 = vmatprep.subr.bf16.mxu1 %v2646_v29  ;;  %v2666_v22 = vunpack.c.l.s8.bf16 %v2414_v18  ;;  %v2672_v23 = vunpack.c.h.s8.bf16 %v2413_v12  ;;  %v2419_v56 = vld [vmem:[#allocation17 + $0x118] sm:$0xff]  ;;  %v2421_v29 = vld [vmem:[#allocation17 + $0x128] sm:$0xff] }
 0x573   :  { %v2105_v43 = vadd.f32 %v2104_v27, %v2103_v34  ;;  %v2119_v44 = vadd.f32 %v2118_v51, %v2117_v30  ;;  %v2674_v24 = vunpack.c.h.s8.bf16 %v2415_v13  ;;  %v2671_v25 = vunpack.c.h.s8.bf16 %v2412_v17  ;;  %v2420_v30 = vld [vmem:[#allocation17 + $0x120] sm:$0xff]  ;;  %v2433_v12 = vld [vmem:[#allocation17 + $0x188] sm:$0xff]  ;;  %v2435_v13 = vld [vmem:[#allocation17 + $0x198] sm:$0xff] }
 0x574   :  { %v2112_v45 = vadd.f32 %v2111_v37, %v2110_v47  ;;  %v2126_v57 = vadd.f32 %v2125_v38, %v2124_v33  ;;  %v2673_v28 = vunpack.c.h.s8.bf16 %v2414_v18  ;;  %v2422_v47 = vld [vmem:[#allocation17 + $0x130] sm:$0xff]  ;;  %v2679_v27 = vunpack.c.l.s8.bf16 %v2420_v30 }
 0x575   :  { %v2155_v61 = vmul.f32 0.0625, %v2105_v43  ;;  %v2157_v3 = vmul.f32 0.0625, %v2119_v44  ;;  %3075 = vmatpush1.bf16.msra.mxu0 %v2643_v39  ;;  %3247 = vmatpush1.bf16.msra.mxu1 %v2645_v42  ;;  %v2681_v51 = vunpack.c.l.s8.bf16 %v2422_v47  ;;  %v2678_v39 = vunpack.c.l.s8.bf16 %v2419_v56 }
 0x576   :  { %v2156_v8 = vmul.f32 0.0625, %v2112_v45  ;;  %v2158_v1 = vmul.f32 0.0625, %v2126_v57  ;;  %3076 = vmatprep.subr.bf16.mxu0 %v2651_v6  ;;  %3248 = vmatprep.subr.bf16.mxu1 %v2653_v7  ;;  %v2680_v42 = vunpack.c.l.s8.bf16 %v2421_v29  ;;  %v2686_v57 = vunpack.c.h.s8.bf16 %v2420_v30  ;;  %v2427_v6 = vld [vmem:[#allocation17 + $0x158] sm:$0xff]  ;;  %v2429_v7 = vld [vmem:[#allocation17 + $0x168] sm:$0xff] }
 0x577   :  { %v2163_v20 = vadd.f32 0.8, %v2155_v61  ;;  %v2165_v10 = vadd.f32 0.8, %v2157_v3  ;;  %v2688_v58 = vunpack.c.h.s8.bf16 %v2422_v47  ;;  %v2685_v59 = vunpack.c.h.s8.bf16 %v2419_v56 }
 0x578   :  { %v2164_v63 = vadd.f32 0.8, %v2156_v8  ;;  %v2166_v11 = vadd.f32 0.8, %v2158_v1  ;;  %v2687_v61 = vunpack.c.h.s8.bf16 %v2421_v29  ;;  %v2693_v54 = vunpack.c.l.s8.bf16 %v2427_v6  ;;  %v2426_v8 = vld [vmem:[#allocation17 + $0x150] sm:$0xff]  ;;  %v2428_v1 = vld [vmem:[#allocation17 + $0x160] sm:$0xff] }
 0x579   :  { %4318 = vrsqrt.f32 %v2163_v20  ;;  %3077 = vmatpush1.bf16.msra.mxu0 %v2650_v9  ;;  %3249 = vmatpush1.bf16.msra.mxu1 %v2652_v2  ;;  %v2695_v55 = vunpack.c.l.s8.bf16 %v2429_v7  ;;  %v2692_v9 = vunpack.c.l.s8.bf16 %v2426_v8  ;;  %v2694_v2 = vunpack.c.l.s8.bf16 %v2428_v1 }
 0x57a   :  { %4320 = vrsqrt.f32 %v2165_v10  ;;  %3078 = vmatprep.subr.bf16.mxu0 %v2658_v0  ;;  %3250 = vmatprep.subr.bf16.mxu1 %v2660_v52  ;;  %v2700_v20 = vunpack.c.h.s8.bf16 %v2427_v6  ;;  %v2702_v10 = vunpack.c.h.s8.bf16 %v2429_v7  ;;  %v2434_v0 = vld [vmem:[#allocation17 + $0x190] sm:$0xff]  ;;  %v2436_v52 = vld [vmem:[#allocation17 + $0x1a0] sm:$0xff]  ;;  %v5018_v30 = vsub.s32 5, %v4859_v60 }
 0x57b   :  { %4322 = vrsqrt.f32 %v2164_v63  ;;  %v2699_v63 = vunpack.c.h.s8.bf16 %v2426_v8  ;;  %v2714_v17 = vunpack.c.h.s8.bf16 %v2434_v0  ;;  %v2716_v18 = vunpack.c.h.s8.bf16 %v2436_v52 }
 0x57c   :  { %4324 = vrsqrt.f32 %v2166_v11  ;;  %v2701_v11 = vunpack.c.h.s8.bf16 %v2428_v1  ;;  %v5021_v47 = vsub.s32 7, %v4859_v60  ;;  %v1968_v56 = vrot.slane %v4955_v26, %v5018_v30 }
 0x57d   :  { %3079 = vmatpush1.bf16.msra.mxu0 %v2657_v21  ;;  %3251 = vmatpush1.bf16.msra.mxu1 %v2659_v53  ;;  %v2707_v21 = vunpack.c.l.s8.bf16 %v2434_v0  ;;  %v2709_v53 = vunpack.c.l.s8.bf16 %v2436_v52 }
 0x57e   :  { %3080 = vmatprep.subr.bf16.mxu0 %v2665_v14  ;;  %3252 = vmatprep.subr.bf16.mxu1 %v2667_v15  ;;  %v2706_v14 = vunpack.c.l.s8.bf16 %v2433_v12  ;;  %v2708_v15 = vunpack.c.l.s8.bf16 %v2435_v13 }
 0x581   :  { %3081 = vmatpush1.bf16.msra.mxu0 %v2664_v19  ;;  %3253 = vmatpush1.bf16.msra.mxu1 %v2666_v22  ;;  %v2713_v19 = vunpack.c.h.s8.bf16 %v2433_v12  ;;  %v2715_v22 = vunpack.c.h.s8.bf16 %v2435_v13 }
 0x582   :  { %3082 = vmatprep.subr.bf16.mxu0 %v2672_v23  ;;  %3254 = vmatprep.subr.bf16.mxu1 %v2674_v24  ;;  %v5005_v23 = vld [vmem:[#allocation17 + $0x1c8] sm:$0xff]  ;;  %v5007_v24 = vld [vmem:[#allocation17 + $0x1d8] sm:$0xff] }
 0x583   :  { %v4319_v16 = vpop.eup %4318 }
 0x584   :  { %v4321_v34 = vpop.eup %4320 }
 0x585   :  { %v4323_v33 = vpop.eup %4322  ;;  %3083 = vmatpush1.bf16.msra.mxu0 %v2671_v25  ;;  %3255 = vmatpush1.bf16.msra.mxu1 %v2673_v28  ;;  %v2721_v25 = vunpack.c.l.s8.bf16 %v5005_v23  ;;  %v2723_v28 = vunpack.c.l.s8.bf16 %v5007_v24 }
 0x586   :  { %v4325_v37 = vpop.eup %4324  ;;  %v2187_v38 = vcombine.low %v4319_v16, %v4323_v33  ;;  %3084 = vmatprep.subr.bf16.mxu0 %v2679_v27  ;;  %3256 = vmatprep.subr.bf16.mxu1 %v2681_v51  ;;  %v5012_v16 = vsub.s32 4, %v4859_v60 }
 0x587   :  { %v2188_v43 = vcombine.low %v4321_v34, %v4325_v37  ;;  %v5015_v34 = vsub.s32 6, %v4859_v60 }
 0x588   :  { %v4998_v44 = vrot.slane %v2187_v38, %v4862_v62  ;;  %v1964_v33 = vrot.slane %v4955_v26, %v5012_v16  ;;  %v1976_v38 = vrot.slane %v4955_v26, %v5021_v47 }
 0x589   :  { %v5001_v45 = vrot.slane %v2188_v43, %v4862_v62  ;;  %3085 = vmatpush1.bf16.msra.mxu0 %v2678_v39  ;;  %3257 = vmatpush1.bf16.msra.mxu1 %v2680_v42  ;;  %v1972_v51 = vrot.slane %v4955_v26, %v5015_v34 }
 0x58a   :  { %3086 = vmatprep.subr.bf16.mxu0 %v2686_v57  ;;  %3258 = vmatprep.subr.bf16.mxu1 %v2688_v58 }
 0x58b   :  { %v2219_v3 = vcombine.low %v4998_v44, %v5001_v45  ;;  %v5084_v44 = vld [vmem:[#allocation17 + $0x1d0] sm:$0xff] }
 0x58d   :  { %3087 = vmatpush1.bf16.msra.mxu0 %v2685_v59  ;;  %3259 = vmatpush1.bf16.msra.mxu1 %v2687_v61 }
 0x58e   :  { %3088 = vmatprep.subr.bf16.mxu0 %v2693_v54  ;;  %3260 = vmatprep.subr.bf16.mxu1 %v2695_v55 }
 0x591   :  { %3089 = vmatpush1.bf16.msra.mxu0 %v2692_v9  ;;  %3261 = vmatpush1.bf16.msra.mxu1 %v2694_v2 }
 0x592   :  { %3090 = vmatprep.subr.bf16.mxu0 %v2700_v20  ;;  %3262 = vmatprep.subr.bf16.mxu1 %v2702_v10 }
 0x595   :  { %3091 = vmatpush1.bf16.msra.mxu0 %v2699_v63  ;;  %3263 = vmatpush1.bf16.msra.mxu1 %v2701_v11 }
 0x596   :  { %3092 = vmatprep.subr.bf16.mxu0 %v2707_v21  ;;  %3264 = vmatprep.subr.bf16.mxu1 %v2709_v53 }
 0x599   :  { %3093 = vmatpush1.bf16.msra.mxu0 %v2706_v14  ;;  %3265 = vmatpush1.bf16.msra.mxu1 %v2708_v15 }
 0x59a   :  { %3094 = vmatprep.subr.bf16.mxu0 %v2714_v17  ;;  %3266 = vmatprep.subr.bf16.mxu1 %v2716_v18 }
 0x59d   :  { %3095 = vmatpush1.bf16.msra.mxu0 %v2713_v19  ;;  %3267 = vmatpush1.bf16.msra.mxu1 %v2715_v22 }
 0x59e   :  { %3107 = vmatprep.subr.bf16.mxu0 %v2721_v25  ;;  %3279 = vmatprep.subr.bf16.mxu1 %v2723_v28 }
 0x5ce   :  { %v1848_v27 = vpop.f32.mrb[8].mxu0 }
 0x5cf   :  { %v1934_v29 = vpop.f32.mrb[16].mxu1  ;;  %v1850_v37 = vpop.f32.mrb[9].mxu0  ;;  %v1989_v43 = vmul.f32 %v1964_v33, %v1848_v27 }
 0x5d0   :  { %v1936_v39 = vpop.f32.mrb[17].mxu1  ;;  %v1852_v42 = vpop.f32.mrb[10].mxu0  ;;  %v1991_v59 = vmul.f32 %v1972_v51, %v1934_v29  ;;  %v1990_v61 = vmul.f32 %v1968_v56, %v1850_v37 }
 0x5d1   :  { %v1997_v60 = vmul.f32 %v1964_v33, %v1852_v42  ;;  %v1938_v57 = vpop.f32.mrb[18].mxu1  ;;  %v1854_v58 = vpop.f32.mrb[11].mxu0  ;;  %v1992_v55 = vmul.f32 %v1976_v38, %v1936_v39 }
 0x5d2   :  { %v1999_v6 = vmul.f32 %v1972_v51, %v1938_v57  ;;  %v1998_v7 = vmul.f32 %v1968_v56, %v1854_v58  ;;  %v1940_v54 = vpop.f32.mrb[19].mxu1 }
 0x5d3   :  { %v2031_v8 = vadd.f32 %v1997_v60, %v1989_v43  ;;  %v2000_v1 = vmul.f32 %v1976_v38, %v1940_v54 }
 0x5d4   :  { %v2045_v9 = vadd.f32 %v1999_v6, %v1991_v59  ;;  %v2038_v2 = vadd.f32 %v1998_v7, %v1990_v61 }
 0x5d5   :  { %v2032_v20 = vrot.slane %v2031_v8, 4  ;;  %v2052_v10 = vadd.f32 %v2000_v1, %v1992_v55 }
 0x5d6   :  { %v2046_v63 = vrot.slane %v2045_v9, 4  ;;  %v2039_v26 = vrot.slane %v2038_v2, 4 }
 0x5d7   :  { %v2033_v11 = vadd.f32 %v2032_v20, %v2031_v8  ;;  %v2053_v0 = vrot.slane %v2052_v10, 4 }
 0x5d8   :  { %v2047_v52 = vadd.f32 %v2046_v63, %v2045_v9  ;;  %v2040_v21 = vadd.f32 %v2039_v26, %v2038_v2 }
 0x5d9   :  { %v2034_v53 = vrot.slane %v2033_v11, 2  ;;  %v2054_v12 = vadd.f32 %v2053_v0, %v2052_v10 }
 0x5da   :  { %v2048_v13 = vrot.slane %v2047_v52, 2  ;;  %v2041_v14 = vrot.slane %v2040_v21, 2 }
 0x5db   :  { %v2035_v15 = vadd.f32 %v2034_v53, %v2033_v11  ;;  %v2055_v17 = vrot.slane %v2054_v12, 2 }
 0x5dc   :  { %v2049_v18 = vadd.f32 %v2048_v13, %v2047_v52  ;;  %v2042_v19 = vadd.f32 %v2041_v14, %v2040_v21 }
 0x5dd   :  { %v2036_v22 = vrot.slane %v2035_v15, 1  ;;  %v2056_v25 = vadd.f32 %v2055_v17, %v2054_v12 }
 0x5de   :  { %v2050_v28 = vrot.slane %v2049_v18, 1  ;;  %v2043_v33 = vrot.slane %v2042_v19, 1 }
 0x5df   :  { %v2037_v27 = vadd.f32 %v2036_v22, %v2035_v15  ;;  %v2057_v51 = vrot.slane %v2056_v25, 1 }
 0x5e0   :  { %v2051_v56 = vadd.f32 %v2050_v28, %v2049_v18  ;;  %v2044_v29 = vadd.f32 %v2043_v33, %v2042_v19 }
 0x5e1   :  { %v2063_v37 = vmul.f32 0.0625, %v2037_v27  ;;  %v2058_v38 = vadd.f32 %v2057_v51, %v2056_v25 }
 0x5e2   :  { %v2065_v39 = vmul.f32 0.0625, %v2051_v56  ;;  %v2064_v42 = vmul.f32 0.0625, %v2044_v29 }
 0x5e3   :  { %v5031_v57 = vsub.f32 %v1989_v43, %v2063_v37  ;;  %v5033_v58 = vsub.f32 %v1997_v60, %v2063_v37  ;;  %v2066_v54 = vmul.f32 0.0625, %v2058_v38 }
 0x5e4   :  { %v5035_v8 = vsub.f32 %v1991_v59, %v2065_v39  ;;  %v5037_v9 = vsub.f32 %v1999_v6, %v2065_v39  ;;  %v5039_v2 = vsub.f32 %v1990_v61, %v2064_v42  ;;  %v5041_v20 = vsub.f32 %v1998_v7, %v2064_v42 }
 0x5e5   :  { %v2087_v10 = vmul.f32 %v5031_v57, %v5031_v57  ;;  %v2095_v63 = vmul.f32 %v5033_v58, %v5033_v58  ;;  %v5047_v26 = vsub.f32 %v1992_v55, %v2066_v54  ;;  %v5049_v43 = vsub.f32 %v2000_v1, %v2066_v54 }
 0x5e6   :  { %v2089_v60 = vmul.f32 %v5035_v8, %v5035_v8  ;;  %v2097_v59 = vmul.f32 %v5037_v9, %v5037_v9  ;;  %v2088_v61 = vmul.f32 %v5039_v2, %v5039_v2  ;;  %v2096_v6 = vmul.f32 %v5041_v20, %v5041_v20 }
 0x5e7   :  { %v2127_v7 = vadd.f32 %v2095_v63, %v2087_v10  ;;  %v2090_v11 = vmul.f32 %v5047_v26, %v5047_v26  ;;  %v2098_v55 = vmul.f32 %v5049_v43, %v5049_v43 }
 0x5e8   :  { %v2141_v1 = vadd.f32 %v2097_v59, %v2089_v60  ;;  %v2134_v0 = vadd.f32 %v2096_v6, %v2088_v61 }
 0x5e9   :  { %v2128_v52 = vrot.slane %v2127_v7, 4  ;;  %v2148_v21 = vadd.f32 %v2098_v55, %v2090_v11 }
 0x5ea   :  { %v2142_v53 = vrot.slane %v2141_v1, 4  ;;  %v2135_v12 = vrot.slane %v2134_v0, 4 }
 0x5eb   :  { %v2129_v13 = vadd.f32 %v2128_v52, %v2127_v7  ;;  %v2149_v14 = vrot.slane %v2148_v21, 4 }
 0x5ec   :  { %v2143_v15 = vadd.f32 %v2142_v53, %v2141_v1  ;;  %v2136_v17 = vadd.f32 %v2135_v12, %v2134_v0 }
 0x5ed   :  { %v2130_v18 = vrot.slane %v2129_v13, 2  ;;  %v2150_v19 = vadd.f32 %v2149_v14, %v2148_v21 }
 0x5ee   :  { %v2144_v22 = vrot.slane %v2143_v15, 2  ;;  %v2137_v25 = vrot.slane %v2136_v17, 2 }
 0x5ef   :  { %v2131_v28 = vadd.f32 %v2130_v18, %v2129_v13  ;;  %v2151_v33 = vrot.slane %v2150_v19, 2  ;;  %v2227_v18 = vrot.slane %v2219_v3, %v4862_v62 }
 0x5f0   :  { %v2145_v27 = vadd.f32 %v2144_v22, %v2143_v15  ;;  %v2138_v51 = vadd.f32 %v2137_v25, %v2136_v17  ;;  %v2001_v22 = vld [vmem:[%s5258_s11] sm:$0xff] }
 0x5f1   :  { %v2132_v56 = vrot.slane %v2131_v28, 1  ;;  %v2152_v29 = vadd.f32 %v2151_v33, %v2150_v19  ;;  %v5076_v25 = vld [vmem:[%s5259_s12] sm:$0xff] }
 0x5f2   :  { %v2146_v37 = vrot.slane %v2145_v27, 1  ;;  %v2139_v38 = vrot.slane %v2138_v51, 1  ;;  %v2299_v45 = vrot.slane %v5076_v25, %v4870_v4  ;;  %v2311_v3 = vrot.slane %v5076_v25, %v4909_v31 }
 0x5f3   :  { %v2133_v39 = vadd.f32 %v2132_v56, %v2131_v28  ;;  %v2153_v42 = vrot.slane %v2152_v29, 1  ;;  %v2307_v56 = vrot.slane %v5076_v25, %v4912_v32 }
 0x5f4   :  { %v2147_v54 = vadd.f32 %v2146_v37, %v2145_v27  ;;  %v2140_v10 = vadd.f32 %v2139_v38, %v2138_v51  ;;  %v2327_v27 = vrot.slane %v5076_v25, %v5021_v47  ;;  %v5082_v51 = vld [vmem:[#allocation17 + $0x1c0] sm:$0xff] }
 0x5f5   :  { %v2159_v63 = vmul.f32 0.0625, %v2133_v39  ;;  %v2154_v60 = vadd.f32 %v2153_v42, %v2152_v29  ;;  %v2720_v42 = vunpack.c.l.s8.bf16 %v5082_v51 }
 0x5f6   :  { %v2161_v59 = vmul.f32 0.0625, %v2147_v54  ;;  %v2160_v61 = vmul.f32 0.0625, %v2140_v10  ;;  %v2722_v54 = vunpack.c.l.s8.bf16 %v5084_v44 }
 0x5f7   :  { %v2167_v6 = vadd.f32 0.8, %v2159_v63  ;;  %v2162_v7 = vmul.f32 0.0625, %v2154_v60  ;;  %v2319_v63 = vrot.slane %v5076_v25, %v5018_v30 }
 0x5f8   :  { %v2169_v11 = vadd.f32 0.8, %v2161_v59  ;;  %v2168_v55 = vadd.f32 0.8, %v2160_v61 }
 0x5f9   :  { %4326 = vrsqrt.f32 %v2167_v6  ;;  %v2170_v1 = vadd.f32 0.8, %v2162_v7 }
 0x5fa   :  { %4328 = vrsqrt.f32 %v2169_v11 }
 0x5fb   :  { %4330 = vrsqrt.f32 %v2168_v55 }
 0x5fc   :  { %4332 = vrsqrt.f32 %v2170_v1 }
 0x603   :  { %v4327_v0 = vpop.eup %4326 }
 0x604   :  { %v4329_v52 = vpop.eup %4328 }
 0x605   :  { %v4331_v21 = vpop.eup %4330 }
 0x606   :  { %v4333_v53 = vpop.eup %4332  ;;  %v2189_v12 = vcombine.low %v4327_v0, %v4331_v21 }
 0x607   :  { %v2190_v13 = vcombine.low %v4329_v52, %v4333_v53 }
 0x608   :  { %v2211_v14 = vrot.slane %v2189_v12, %v4862_v62 }
 0x609   :  { %v2218_v15 = vrot.slane %v2190_v13, %v4862_v62 }
 0x60b   :  { %v2220_v17 = vcombine.low %v2211_v14, %v2218_v15 }
 0x60d   :  { %v2234_v19 = vrot.slane %v2220_v17, %v4862_v62  ;;  %v2303_v62 = vrot.slane %v5076_v25, %v4873_v5 }
 0x60f   :  { %v2235_v28 = vcombine.low %v2227_v18, %v2234_v19  ;;  %v2728_v19 = vunpack.c.h.s8.bf16 %v5005_v23 }
 0x611   :  { %v5078_v33 = vmul.f32 %v2235_v28, %v2001_v22 }
 0x613   :  { %v2270_v29 = vrot.slane %v5078_v33, %v5021_v47  ;;  %v2246_v37 = vrot.slane %v5078_v33, %v4873_v5  ;;  %v2242_v38 = vrot.slane %v5078_v33, %v4870_v4  ;;  %v2254_v39 = vrot.slane %v5078_v33, %v4909_v31 }
 0x614   :  { %v2250_v10 = vrot.slane %v5078_v33, %v4912_v32 }
 0x615   :  { %v2286_v47 = vmul.f32 %v2270_v29, %v5047_v26  ;;  %v2294_v60 = vmul.f32 %v2270_v29, %v5049_v43  ;;  %v2280_v59 = vmul.f32 %v2246_v37, %v4973_v41  ;;  %v2288_v61 = vmul.f32 %v2246_v37, %v4975_v46 }
 0x616   :  { %v2279_v6 = vmul.f32 %v2242_v38, %v4965_v48  ;;  %v2287_v7 = vmul.f32 %v2242_v38, %v4967_v35  ;;  %v2282_v11 = vmul.f32 %v2254_v39, %v4977_v49  ;;  %v2290_v55 = vmul.f32 %v2254_v39, %v4979_v50 }
 0x617   :  { %v5116_v1 = vadd.f32 %v2327_v27, %v2286_v47  ;;  %v5118_v0 = vadd.f32 %v2327_v27, %v2294_v60  ;;  %v2337_v52 = vadd.f32 %v2303_v62, %v2280_v59  ;;  %v2345_v26 = vadd.f32 %v2303_v62, %v2288_v61  ;;  %v2450_v47 = vld [vmem:[#allocation17 + $0x210] sm:$0xff] }
 0x618   :  { %v2336_v21 = vadd.f32 %v2299_v45, %v2279_v6  ;;  %v2344_v43 = vadd.f32 %v2299_v45, %v2287_v7  ;;  %v2339_v53 = vadd.f32 %v2311_v3, %v2282_v11  ;;  %v2347_v41 = vadd.f32 %v2311_v3, %v2290_v55  ;;  %v2447_v7 = vld [vmem:[#allocation17 + $0x1f8] sm:$0xff] }
 0x619   :  { %v2353_v12 = vmul.f32 0.2, %v2337_v52  ;;  %v2361_v46 = vmul.f32 0.2, %v2345_v26  ;;  %v2281_v48 = vmul.f32 %v2250_v10, %v4969_v36  ;;  %v2262_v35 = vrot.slane %v5078_v33, %v5018_v30 }
 0x61a   :  { %v2352_v49 = vmul.f32 0.2, %v2336_v21  ;;  %v2360_v13 = vmul.f32 0.2, %v2344_v43  ;;  %v2355_v50 = vmul.f32 0.2, %v2339_v53  ;;  %v2289_v14 = vmul.f32 %v2250_v10, %v4971_v40 }
 0x61b   :  { %v2369_v15 = vmax.f32 %v2337_v52, %v2353_v12  ;;  %v2377_v17 = vmax.f32 %v2345_v26, %v2361_v46  ;;  %v2363_v18 = vmul.f32 0.2, %v2347_v41  ;;  %v2338_v62 = vadd.f32 %v2307_v56, %v2281_v48  ;;  %v2448_v10 = vld [vmem:[#allocation17 + $0x200] sm:$0xff] }
 0x61c   :  { %v2368_v22 = vmax.f32 %v2336_v21, %v2352_v49  ;;  %v2376_v28 = vmax.f32 %v2344_v43, %v2360_v13  ;;  %v2371_v27 = vmax.f32 %v2339_v53, %v2355_v50  ;;  %v2346_v3 = vadd.f32 %v2307_v56, %v2289_v14  ;;  %v2449_v21 = vld [vmem:[#allocation17 + $0x208] sm:$0xff] }
 0x61d   :  { %v5125_v45 = vpack.c.bf16 %v2377_v17, %v2369_v15  ;;  %v2379_v36 = vmax.f32 %v2347_v41, %v2363_v18  ;;  %v2284_v29 = vmul.f32 %v2262_v35, %v5039_v2  ;;  %v2730_v38 = vunpack.c.h.s8.bf16 %v5007_v24  ;;  %v2457_v15 = vld [vmem:[#allocation17 + $0x248] sm:$0xff] }
 0x61e   :  { %v5128_v37 = vpack.c.bf16 %v2376_v28, %v2368_v22  ;;  %v2354_v40 = vmul.f32 0.2, %v2338_v62  ;;  %v2292_v39 = vmul.f32 %v2262_v35, %v5041_v20  ;;  %v2362_v60 = vmul.f32 0.2, %v2346_v3 }
 0x61f   :  { %3096 = vmatprep.mubr.bf16.mxu0 %v5125_v45  ;;  %3268 = vmatprep.mubr.bf16.mxu1 %v5125_v45  ;;  %v5134_v23 = vpack.c.bf16 %v2379_v36, %v2371_v27  ;;  %v2341_v59 = vadd.f32 %v2319_v63, %v2284_v29  ;;  %v2258_v2 = vrot.slane %v5078_v33, %v5012_v16  ;;  %v2727_v24 = vunpack.c.h.s8.bf16 %v5082_v51  ;;  %v2454_v29 = vld [vmem:[#allocation17 + $0x230] sm:$0xff] }
 0x620   :  { %3097 = vmatmul.mubr.bf16.vlgmr.msra.gmra.mrb[12].mxu0 %v5128_v37  ;;  %3269 = vmatmul.mubr.bf16.vlgmr.msra.gmra.mrb[20].mxu1 %v5128_v37  ;;  %v2729_v20 = vunpack.c.h.s8.bf16 %v5084_v44  ;;  %v2370_v56 = vmax.f32 %v2338_v62, %v2354_v40  ;;  %v2349_v61 = vadd.f32 %v2319_v63, %v2292_v39  ;;  %v2367_v6 = vmul.f32 0.2, %v5118_v0 }
 0x621   :  { %3108 = vmatpush1.bf16.msra.mxu0 %v2720_v42  ;;  %3280 = vmatpush1.bf16.msra.mxu1 %v2722_v54  ;;  %v2378_v11 = vmax.f32 %v2346_v3, %v2362_v60  ;;  %v2357_v55 = vmul.f32 0.2, %v2341_v59  ;;  %v2315_v52 = vrot.slane %v5076_v25, %v5012_v16  ;;  %v2735_v26 = vunpack.c.l.s8.bf16 %v2448_v10 }
 0x622   :  { %3139 = vmatprep.mubr.bf16.mxu0 %v5134_v23  ;;  %3311 = vmatprep.mubr.bf16.mxu1 %v5134_v23  ;;  %v2737_v51 = vunpack.c.l.s8.bf16 %v2450_v47  ;;  %v2365_v44 = vmul.f32 0.2, %v2349_v61  ;;  %v2283_v54 = vmul.f32 %v2258_v2, %v5031_v57  ;;  %v2734_v43 = vunpack.c.l.s8.bf16 %v2447_v7  ;;  %v2455_v57 = vld [vmem:[#allocation17 + $0x238] sm:$0xff] }
 0x623   :  { %3109 = vmatprep.subr.bf16.mxu0 %v2728_v19  ;;  %3281 = vmatprep.subr.bf16.mxu1 %v2730_v38  ;;  %v5147_v63 = vpack.c.bf16 %v2378_v11, %v2370_v56  ;;  %v2373_v42 = vmax.f32 %v2341_v59, %v2357_v55  ;;  %v2291_v41 = vmul.f32 %v2258_v2, %v5033_v58  ;;  %v2736_v46 = vunpack.c.l.s8.bf16 %v2449_v21 }
 0x624   :  { %v2381_v53 = vmax.f32 %v2349_v61, %v2365_v44  ;;  %v2383_v12 = vmax.f32 %v5118_v0, %v2367_v6  ;;  %v2340_v48 = vadd.f32 %v2315_v52, %v2283_v54  ;;  %v2359_v35 = vmul.f32 0.2, %v5116_v1 }
 0x625   :  { %3110 = vmatpush1.bf16.msra.mxu0 %v2727_v24  ;;  %3282 = vmatpush1.bf16.msra.mxu1 %v2729_v20  ;;  %v2742_v49 = vunpack.c.h.s8.bf16 %v2448_v10  ;;  %v2744_v13 = vunpack.c.h.s8.bf16 %v2450_v47  ;;  %v2348_v14 = vadd.f32 %v2315_v52, %v2291_v41  ;;  %v2741_v18 = vunpack.c.h.s8.bf16 %v2447_v7  ;;  %v2462_v24 = vld [vmem:[#allocation17 + $0x270] sm:$0xff]  ;;  %v2464_v20 = vld [vmem:[#allocation17 + $0x280] sm:$0xff]  ;;  %v2461_v52 = vld [vmem:[#allocation17 + $0x268] sm:$0xff] }
 0x626   :  { %3111 = vmatprep.subr.bf16.mxu0 %v2735_v26  ;;  %3283 = vmatprep.subr.bf16.mxu1 %v2737_v51  ;;  %v5153_v50 = vpack.c.bf16 %v2381_v53, %v2373_v42  ;;  %v2356_v17 = vmul.f32 0.2, %v2340_v48  ;;  %v2375_v58 = vmax.f32 %v5116_v1, %v2359_v35  ;;  %v2266_v19 = vrot.slane %v5078_v33, %v5015_v34  ;;  %v2456_v1 = vld [vmem:[#allocation17 + $0x240] sm:$0xff]  ;;  %v2463_v26 = vld [vmem:[#allocation17 + $0x278] sm:$0xff] }
 0x627   :  { %v2364_v0 = vmul.f32 0.2, %v2348_v14  ;;  %v2743_v22 = vunpack.c.h.s8.bf16 %v2449_v21  ;;  %v2323_v62 = vrot.slane %v5076_v25, %v5015_v34  ;;  %v2749_v36 = vunpack.c.l.s8.bf16 %v2455_v57  ;;  %v2471_v53 = vld [vmem:[#allocation17 + $0x2b8] sm:$0xff]  ;;  %v2468_v35 = vld [vmem:[#allocation17 + $0x2a0] sm:$0xff] }
 0x628   :  { %v2372_v28 = vmax.f32 %v2340_v48, %v2356_v17  ;;  %v5158_v27 = vpack.c.bf16 %v2383_v12, %v2375_v58  ;;  %v2751_v3 = vunpack.c.l.s8.bf16 %v2457_v15  ;;  %v2285_v40 = vmul.f32 %v2266_v19, %v5035_v8  ;;  %v2476_v17 = vld [vmem:[#allocation17 + $0x2e0] sm:$0xff]  ;;  %v2478_v58 = vld [vmem:[#allocation17 + $0x2f0] sm:$0xff] }
 0x629   :  { %3112 = vmatpush1.bf16.msra.mxu0 %v2734_v43  ;;  %3284 = vmatpush1.bf16.msra.mxu1 %v2736_v46  ;;  %v2380_v38 = vmax.f32 %v2348_v14, %v2364_v0  ;;  %v2293_v33 = vmul.f32 %v2266_v19, %v5037_v9  ;;  %v2748_v10 = vunpack.c.l.s8.bf16 %v2454_v29  ;;  %v2750_v47 = vunpack.c.l.s8.bf16 %v2456_v1  ;;  %v2469_v43 = vld [vmem:[#allocation17 + $0x2a8] sm:$0xff] }
 0x62a   :  { %3113 = vmatprep.subr.bf16.mxu0 %v2742_v49  ;;  %3285 = vmatprep.subr.bf16.mxu1 %v2744_v13  ;;  %v2342_v60 = vadd.f32 %v2323_v62, %v2285_v40  ;;  %v2756_v25 = vunpack.c.h.s8.bf16 %v2455_v57  ;;  %v2758_v2 = vunpack.c.h.s8.bf16 %v2457_v15  ;;  %v2755_v8 = vunpack.c.h.s8.bf16 %v2454_v29  ;;  %v2470_v49 = vld [vmem:[#allocation17 + $0x2b0] sm:$0xff]  ;;  %v2485_v40 = vld [vmem:[#allocation17 + $0x328] sm:$0xff] }
 0x62b   :  { %v5164_v39 = vpack.c.bf16 %v2380_v38, %v2372_v28  ;;  %v2350_v59 = vadd.f32 %v2323_v62, %v2293_v33  ;;  %v2757_v9 = vunpack.c.h.s8.bf16 %v2456_v1  ;;  %v2763_v11 = vunpack.c.l.s8.bf16 %v2462_v24  ;;  %v2475_v28 = vld [vmem:[#allocation17 + $0x2d8] sm:$0xff]  ;;  %v2477_v62 = vld [vmem:[#allocation17 + $0x2e8] sm:$0xff] }
 0x62c   :  { %v2358_v56 = vmul.f32 0.2, %v2342_v60  ;;  %v2765_v55 = vunpack.c.l.s8.bf16 %v2464_v20  ;;  %v2762_v21 = vunpack.c.l.s8.bf16 %v2461_v52  ;;  %v2764_v44 = vunpack.c.l.s8.bf16 %v2463_v26  ;;  %v2483_v38 = vld [vmem:[#allocation17 + $0x318] sm:$0xff] }
 0x62d   :  { %3114 = vmatpush1.bf16.msra.mxu0 %v2741_v18  ;;  %3286 = vmatpush1.bf16.msra.mxu1 %v2743_v22  ;;  %v2366_v61 = vmul.f32 0.2, %v2350_v59  ;;  %v2770_v42 = vunpack.c.h.s8.bf16 %v2462_v24  ;;  %v2772_v54 = vunpack.c.h.s8.bf16 %v2464_v20  ;;  %v2769_v41 = vunpack.c.h.s8.bf16 %v2461_v52  ;;  %v2491_v52 = vld [vmem:[#allocation17 + $0x358] sm:$0xff] }
 0x62e   :  { %3115 = vmatprep.subr.bf16.mxu0 %v2749_v36  ;;  %3287 = vmatprep.subr.bf16.mxu1 %v2751_v3  ;;  %v2374_v6 = vmax.f32 %v2342_v60, %v2358_v56  ;;  %v2771_v12 = vunpack.c.h.s8.bf16 %v2463_v26  ;;  %v2777_v46 = vunpack.c.l.s8.bf16 %v2469_v43  ;;  %v2779_v48 = vunpack.c.l.s8.bf16 %v2471_v53 }
 0x62f   :  { %v2382_v7 = vmax.f32 %v2350_v59, %v2366_v61  ;;  %v2776_v13 = vunpack.c.l.s8.bf16 %v2468_v35  ;;  %v2778_v14 = vunpack.c.l.s8.bf16 %v2470_v49  ;;  %v2784_v57 = vunpack.c.h.s8.bf16 %v2469_v43  ;;  %v2482_v59 = vld [vmem:[#allocation17 + $0x310] sm:$0xff]  ;;  %v2499_v43 = vld [vmem:[#allocation17 + $0x398] sm:$0xff] }
 0x630   :  { %v2786_v15 = vunpack.c.h.s8.bf16 %v2471_v53  ;;  %v2783_v18 = vunpack.c.h.s8.bf16 %v2468_v35  ;;  %v2785_v0 = vunpack.c.h.s8.bf16 %v2470_v49  ;;  %v2791_v19 = vunpack.c.l.s8.bf16 %v2476_v17  ;;  %v2490_v61 = vld [vmem:[#allocation17 + $0x350] sm:$0xff] }
 0x631   :  { %3116 = vmatpush1.bf16.msra.mxu0 %v2748_v10  ;;  %3288 = vmatpush1.bf16.msra.mxu1 %v2750_v47  ;;  %v5166_v51 = vpack.c.bf16 %v2382_v7, %v2374_v6  ;;  %v2793_v22 = vunpack.c.l.s8.bf16 %v2478_v58  ;;  %v2790_v36 = vunpack.c.l.s8.bf16 %v2475_v28  ;;  %v2792_v3 = vunpack.c.l.s8.bf16 %v2477_v62  ;;  %v2498_v35 = vld [vmem:[#allocation17 + $0x390] sm:$0xff] }
 0x632   :  { %3117 = vmatprep.subr.bf16.mxu0 %v2756_v25  ;;  %3289 = vmatprep.subr.bf16.mxu1 %v2758_v2  ;;  %v2798_v29 = vunpack.c.h.s8.bf16 %v2476_v17  ;;  %v2800_v1 = vunpack.c.h.s8.bf16 %v2478_v58  ;;  %v2797_v33 = vunpack.c.h.s8.bf16 %v2475_v28  ;;  %v2799_v10 = vunpack.c.h.s8.bf16 %v2477_v62  ;;  %v2484_v25 = vld [vmem:[#allocation17 + $0x320] sm:$0xff]  ;;  %v2506_v17 = vld [vmem:[#allocation17 + $0x3d0] sm:$0xff]  ;;  %v2505_v28 = vld [vmem:[#allocation17 + $0x3c8] sm:$0xff] }
 0x633   :  { %v2805_v47 = vunpack.c.l.s8.bf16 %v2483_v38  ;;  %v2807_v60 = vunpack.c.l.s8.bf16 %v2485_v40  ;;  %v2804_v2 = vunpack.c.l.s8.bf16 %v2482_v59  ;;  %v2806_v24 = vunpack.c.l.s8.bf16 %v2484_v25 }
 0x634   :  { %v2812_v20 = vunpack.c.h.s8.bf16 %v2483_v38  ;;  %v2814_v56 = vunpack.c.h.s8.bf16 %v2485_v40  ;;  %v2813_v6 = vunpack.c.h.s8.bf16 %v2484_v25  ;;  %v2819_v7 = vunpack.c.l.s8.bf16 %v2490_v61  ;;  %v2513_v38 = vld [vmem:[#allocation17 + $0x408] sm:$0xff] }
 0x635   :  { %3118 = vmatpush1.bf16.msra.mxu0 %v2755_v8  ;;  %3290 = vmatpush1.bf16.msra.mxu1 %v2757_v9  ;;  %v2492_v8 = vld [vmem:[#allocation17 + $0x360] sm:$0xff]  ;;  %v2811_v9 = vunpack.c.h.s8.bf16 %v2482_v59 }
 0x636   :  { %3119 = vmatprep.subr.bf16.mxu0 %v2763_v11  ;;  %3291 = vmatprep.subr.bf16.mxu1 %v2765_v55  ;;  %v2821_v11 = vunpack.c.l.s8.bf16 %v2492_v8  ;;  %v2489_v55 = vld [vmem:[#allocation17 + $0x348] sm:$0xff]  ;;  %v2512_v59 = vld [vmem:[#allocation17 + $0x400] sm:$0xff] }
 0x637   :  { %v2818_v26 = vunpack.c.l.s8.bf16 %v2489_v55  ;;  %v2825_v53 = vunpack.c.h.s8.bf16 %v2489_v55  ;;  %v2519_v55 = vld [vmem:[#allocation17 + $0x438] sm:$0xff] }
 0x639   :  { %3120 = vmatpush1.bf16.msra.mxu0 %v2762_v21  ;;  %3292 = vmatpush1.bf16.msra.mxu1 %v2764_v44  ;;  %v2820_v21 = vunpack.c.l.s8.bf16 %v2491_v52  ;;  %v2826_v44 = vunpack.c.h.s8.bf16 %v2490_v61  ;;  %v2520_v61 = vld [vmem:[#allocation17 + $0x440] sm:$0xff] }
 0x63a   :  { %3121 = vmatprep.subr.bf16.mxu0 %v2770_v42  ;;  %3293 = vmatprep.subr.bf16.mxu1 %v2772_v54  ;;  %v2828_v42 = vunpack.c.h.s8.bf16 %v2492_v8  ;;  %v2497_v54 = vld [vmem:[#allocation17 + $0x388] sm:$0xff] }
 0x63d   :  { %3122 = vmatpush1.bf16.msra.mxu0 %v2769_v41  ;;  %3294 = vmatpush1.bf16.msra.mxu1 %v2771_v12  ;;  %v2827_v41 = vunpack.c.h.s8.bf16 %v2491_v52  ;;  %v2833_v12 = vunpack.c.l.s8.bf16 %v2497_v54 }
 0x63e   :  { %3123 = vmatprep.subr.bf16.mxu0 %v2777_v46  ;;  %3295 = vmatprep.subr.bf16.mxu1 %v2779_v48  ;;  %v2835_v46 = vunpack.c.l.s8.bf16 %v2499_v43  ;;  %v2496_v48 = vld [vmem:[#allocation17 + $0x380] sm:$0xff] }
 0x63f   :  { %v2832_v49 = vunpack.c.l.s8.bf16 %v2496_v48  ;;  %v2839_v58 = vunpack.c.h.s8.bf16 %v2496_v48  ;;  %v2526_v48 = vld [vmem:[#allocation17 + $0x470] sm:$0xff] }
 0x641   :  { %3124 = vmatpush1.bf16.msra.mxu0 %v2776_v13  ;;  %3296 = vmatpush1.bf16.msra.mxu1 %v2778_v14  ;;  %v2834_v13 = vunpack.c.l.s8.bf16 %v2498_v35  ;;  %v2840_v14 = vunpack.c.h.s8.bf16 %v2497_v54  ;;  %v2527_v54 = vld [vmem:[#allocation17 + $0x478] sm:$0xff] }
 0x642   :  { %3125 = vmatprep.subr.bf16.mxu0 %v2784_v57  ;;  %3297 = vmatprep.subr.bf16.mxu1 %v2786_v15  ;;  %v2842_v57 = vunpack.c.h.s8.bf16 %v2499_v43  ;;  %v2504_v15 = vld [vmem:[#allocation17 + $0x3c0] sm:$0xff] }
 0x645   :  { %3126 = vmatpush1.bf16.msra.mxu0 %v2783_v18  ;;  %3298 = vmatpush1.bf16.msra.mxu1 %v2785_v0  ;;  %v2841_v18 = vunpack.c.h.s8.bf16 %v2498_v35  ;;  %v2847_v0 = vunpack.c.l.s8.bf16 %v2504_v15 }
 0x646   :  { %3127 = vmatprep.subr.bf16.mxu0 %v2791_v19  ;;  %3299 = vmatprep.subr.bf16.mxu1 %v2793_v22  ;;  %v2503_v19 = vld [vmem:[#allocation17 + $0x3b8] sm:$0xff]  ;;  %v2849_v22 = vunpack.c.l.s8.bf16 %v2506_v17 }
 0x647   :  { %v2846_v62 = vunpack.c.l.s8.bf16 %v2503_v19  ;;  %v2853_v40 = vunpack.c.h.s8.bf16 %v2503_v19 }
 0x649   :  { %3128 = vmatpush1.bf16.msra.mxu0 %v2790_v36  ;;  %3300 = vmatpush1.bf16.msra.mxu1 %v2792_v3  ;;  %v2848_v36 = vunpack.c.l.s8.bf16 %v2505_v28  ;;  %v2854_v3 = vunpack.c.h.s8.bf16 %v2504_v15  ;;  %v2534_v15 = vld [vmem:[#allocation17 + $0x4b0] sm:$0xff] }
 0x64a   :  { %3129 = vmatprep.subr.bf16.mxu0 %v2798_v29  ;;  %3301 = vmatprep.subr.bf16.mxu1 %v2800_v1  ;;  %v2856_v29 = vunpack.c.h.s8.bf16 %v2506_v17  ;;  %v2511_v1 = vld [vmem:[#allocation17 + $0x3f8] sm:$0xff]  ;;  %v2905_v19 = vunpack.c.l.s8.bf16 %v2534_v15 }
 0x64d   :  { %3130 = vmatpush1.bf16.msra.mxu0 %v2797_v33  ;;  %3302 = vmatpush1.bf16.msra.mxu1 %v2799_v10  ;;  %v2855_v33 = vunpack.c.h.s8.bf16 %v2505_v28  ;;  %v2861_v10 = vunpack.c.l.s8.bf16 %v2511_v1 }
 0x64e   :  { %3131 = vmatprep.subr.bf16.mxu0 %v2805_v47  ;;  %3303 = vmatprep.subr.bf16.mxu1 %v2807_v60  ;;  %v2510_v47 = vld [vmem:[#allocation17 + $0x3f0] sm:$0xff]  ;;  %v2863_v60 = vunpack.c.l.s8.bf16 %v2513_v38 }
 0x64f   :  { %v2860_v25 = vunpack.c.l.s8.bf16 %v2510_v47  ;;  %v2867_v8 = vunpack.c.h.s8.bf16 %v2510_v47 }
 0x651   :  { %3132 = vmatpush1.bf16.msra.mxu0 %v2804_v2  ;;  %3304 = vmatpush1.bf16.msra.mxu1 %v2806_v24  ;;  %v2862_v2 = vunpack.c.l.s8.bf16 %v2512_v59  ;;  %v2868_v24 = vunpack.c.h.s8.bf16 %v2511_v1  ;;  %v2541_v1 = vld [vmem:[#allocation17 + $0x4e8] sm:$0xff] }
 0x652   :  { %3133 = vmatprep.subr.bf16.mxu0 %v2812_v20  ;;  %3305 = vmatprep.subr.bf16.mxu1 %v2814_v56  ;;  %v2870_v20 = vunpack.c.h.s8.bf16 %v2513_v38  ;;  %v2518_v56 = vld [vmem:[#allocation17 + $0x430] sm:$0xff]  ;;  %v2919_v47 = vunpack.c.l.s8.bf16 %v2541_v1 }
 0x655   :  { %3134 = vmatpush1.bf16.msra.mxu0 %v2811_v9  ;;  %3306 = vmatpush1.bf16.msra.mxu1 %v2813_v6  ;;  %v2869_v9 = vunpack.c.h.s8.bf16 %v2512_v59  ;;  %v2875_v6 = vunpack.c.l.s8.bf16 %v2518_v56 }
 0x656   :  { %3135 = vmatprep.subr.bf16.mxu0 %v2819_v7  ;;  %3307 = vmatprep.subr.bf16.mxu1 %v2821_v11  ;;  %v2517_v7 = vld [vmem:[#allocation17 + $0x428] sm:$0xff]  ;;  %v2877_v11 = vunpack.c.l.s8.bf16 %v2520_v61 }
 0x657   :  { %v2874_v52 = vunpack.c.l.s8.bf16 %v2517_v7  ;;  %v2881_v43 = vunpack.c.h.s8.bf16 %v2517_v7 }
 0x659   :  { %3136 = vmatpush1.bf16.msra.mxu0 %v2818_v26  ;;  %3308 = vmatpush1.bf16.msra.mxu1 %v2820_v21  ;;  %v2876_v26 = vunpack.c.l.s8.bf16 %v2519_v55  ;;  %v2882_v21 = vunpack.c.h.s8.bf16 %v2518_v56  ;;  %v2548_v56 = vld [vmem:[#allocation17 + $0x520] sm:$0xff] }
 0x65a   :  { %3137 = vmatprep.subr.bf16.mxu0 %v2826_v44  ;;  %3309 = vmatprep.subr.bf16.mxu1 %v2828_v42  ;;  %v2884_v44 = vunpack.c.h.s8.bf16 %v2520_v61  ;;  %v2525_v42 = vld [vmem:[#allocation17 + $0x468] sm:$0xff]  ;;  %v2933_v7 = vunpack.c.l.s8.bf16 %v2548_v56 }
 0x65d   :  { %3138 = vmatpush1.bf16.msra.mxu0 %v2825_v53  ;;  %3310 = vmatpush1.bf16.msra.mxu1 %v2827_v41  ;;  %v2883_v53 = vunpack.c.h.s8.bf16 %v2519_v55  ;;  %v2889_v41 = vunpack.c.l.s8.bf16 %v2525_v42 }
 0x65e   :  { %3150 = vmatprep.subr.bf16.mxu0 %v2833_v12  ;;  %3322 = vmatprep.subr.bf16.mxu1 %v2835_v46  ;;  %v2524_v12 = vld [vmem:[#allocation17 + $0x460] sm:$0xff]  ;;  %v2891_v46 = vunpack.c.l.s8.bf16 %v2527_v54 }
 0x65f   :  { %v2888_v35 = vunpack.c.l.s8.bf16 %v2524_v12  ;;  %v2895_v17 = vunpack.c.h.s8.bf16 %v2524_v12 }
 0x660   :  { %3140 = vmatmul.mubr.bf16.vlgmr.msra.gmra.mrb[12].mxu0 %v5147_v63  ;;  %3312 = vmatmul.mubr.bf16.vlgmr.msra.gmra.mrb[20].mxu1 %v5147_v63 }
 0x661   :  { %3151 = vmatpush1.bf16.msra.mxu0 %v2832_v49  ;;  %3182 = vmatprep.mubr.bf16.mxu0 %v5153_v50  ;;  %v2890_v49 = vunpack.c.l.s8.bf16 %v2526_v48 }
 0x662   :  { %3323 = vmatpush1.bf16.msra.mxu1 %v2834_v13  ;;  %3354 = vmatprep.mubr.bf16.mxu1 %v5153_v50  ;;  %v2896_v13 = vunpack.c.h.s8.bf16 %v2525_v42  ;;  %v2555_v42 = vld [vmem:[#allocation17 + $0x558] sm:$0xff] }
 0x663   :  { %3152 = vmatprep.subr.bf16.mxu0 %v2840_v14  ;;  %3324 = vmatprep.subr.bf16.mxu1 %v2842_v57  ;;  %v2898_v14 = vunpack.c.h.s8.bf16 %v2527_v54  ;;  %v2532_v57 = vld [vmem:[#allocation17 + $0x4a0] sm:$0xff]  ;;  %v2947_v12 = vunpack.c.l.s8.bf16 %v2555_v42 }
 0x665   :  { %3153 = vmatpush1.bf16.msra.mxu0 %v2839_v58  ;;  %v2897_v58 = vunpack.c.h.s8.bf16 %v2526_v48 }
 0x666   :  { %3325 = vmatpush1.bf16.msra.mxu1 %v2841_v18  ;;  %3154 = vmatprep.subr.bf16.mxu0 %v2847_v0  ;;  %v2903_v18 = vunpack.c.l.s8.bf16 %v2532_v57  ;;  %v2531_v0 = vld [vmem:[#allocation17 + $0x498] sm:$0xff] }
 0x667   :  { %3326 = vmatprep.subr.bf16.mxu1 %v2849_v22  ;;  %v2533_v22 = vld [vmem:[#allocation17 + $0x4a8] sm:$0xff]  ;;  %v2902_v28 = vunpack.c.l.s8.bf16 %v2531_v0  ;;  %v2909_v38 = vunpack.c.h.s8.bf16 %v2531_v0 }
 0x669   :  { %3155 = vmatpush1.bf16.msra.mxu0 %v2846_v62  ;;  %v2904_v62 = vunpack.c.l.s8.bf16 %v2533_v22 }
 0x66a   :  { %3327 = vmatpush1.bf16.msra.mxu1 %v2848_v36  ;;  %3156 = vmatprep.subr.bf16.mxu0 %v2854_v3  ;;  %v2910_v36 = vunpack.c.h.s8.bf16 %v2532_v57  ;;  %v2912_v3 = vunpack.c.h.s8.bf16 %v2534_v15  ;;  %v2562_v57 = vld [vmem:[#allocation17 + $0x590] sm:$0xff] }
 0x66b   :  { %3328 = vmatprep.subr.bf16.mxu1 %v2856_v29  ;;  %v2539_v29 = vld [vmem:[#allocation17 + $0x4d8] sm:$0xff]  ;;  %v2961_v0 = vunpack.c.l.s8.bf16 %v2562_v57 }
 0x66d   :  { %3157 = vmatpush1.bf16.msra.mxu0 %v2853_v40  ;;  %v2911_v40 = vunpack.c.h.s8.bf16 %v2533_v22 }
 0x66e   :  { %3329 = vmatpush1.bf16.msra.mxu1 %v2855_v33  ;;  %3158 = vmatprep.subr.bf16.mxu0 %v2861_v10  ;;  %v2917_v33 = vunpack.c.l.s8.bf16 %v2539_v29  ;;  %v2538_v10 = vld [vmem:[#allocation17 + $0x4d0] sm:$0xff] }
 0x66f   :  { %3330 = vmatprep.subr.bf16.mxu1 %v2863_v60  ;;  %v2540_v60 = vld [vmem:[#allocation17 + $0x4e0] sm:$0xff]  ;;  %v2916_v59 = vunpack.c.l.s8.bf16 %v2538_v10  ;;  %v2923_v61 = vunpack.c.h.s8.bf16 %v2538_v10 }
 0x671   :  { %3159 = vmatpush1.bf16.msra.mxu0 %v2860_v25  ;;  %v2918_v25 = vunpack.c.l.s8.bf16 %v2540_v60 }
 0x672   :  { %3331 = vmatpush1.bf16.msra.mxu1 %v2862_v2  ;;  %3160 = vmatprep.subr.bf16.mxu0 %v2868_v24  ;;  %v2924_v2 = vunpack.c.h.s8.bf16 %v2539_v29  ;;  %v2926_v24 = vunpack.c.h.s8.bf16 %v2541_v1  ;;  %v2569_v29 = vld [vmem:[#allocation17 + $0x5c8] sm:$0xff] }
 0x673   :  { %3332 = vmatprep.subr.bf16.mxu1 %v2870_v20  ;;  %v2546_v20 = vld [vmem:[#allocation17 + $0x510] sm:$0xff]  ;;  %v2975_v10 = vunpack.c.l.s8.bf16 %v2569_v29 }
 0x675   :  { %3161 = vmatpush1.bf16.msra.mxu0 %v2867_v8  ;;  %v2925_v8 = vunpack.c.h.s8.bf16 %v2540_v60 }
 0x676   :  { %3333 = vmatpush1.bf16.msra.mxu1 %v2869_v9  ;;  %3162 = vmatprep.subr.bf16.mxu0 %v2875_v6  ;;  %v2931_v9 = vunpack.c.l.s8.bf16 %v2546_v20  ;;  %v2545_v6 = vld [vmem:[#allocation17 + $0x508] sm:$0xff] }
 0x677   :  { %3334 = vmatprep.subr.bf16.mxu1 %v2877_v11  ;;  %v2547_v11 = vld [vmem:[#allocation17 + $0x518] sm:$0xff]  ;;  %v2930_v55 = vunpack.c.l.s8.bf16 %v2545_v6  ;;  %v2937_v54 = vunpack.c.h.s8.bf16 %v2545_v6 }
 0x679   :  { %3163 = vmatpush1.bf16.msra.mxu0 %v2874_v52  ;;  %v2932_v52 = vunpack.c.l.s8.bf16 %v2547_v11 }
 0x67a   :  { %3335 = vmatpush1.bf16.msra.mxu1 %v2876_v26  ;;  %3164 = vmatprep.subr.bf16.mxu0 %v2882_v21  ;;  %v2938_v26 = vunpack.c.h.s8.bf16 %v2546_v20  ;;  %v2940_v21 = vunpack.c.h.s8.bf16 %v2548_v56  ;;  %v2576_v20 = vld [vmem:[#allocation17 + $0x600] sm:$0xff] }
 0x67b   :  { %3336 = vmatprep.subr.bf16.mxu1 %v2884_v44  ;;  %v2553_v44 = vld [vmem:[#allocation17 + $0x548] sm:$0xff]  ;;  %v2989_v6 = vunpack.c.l.s8.bf16 %v2576_v20 }
 0x67d   :  { %3165 = vmatpush1.bf16.msra.mxu0 %v2881_v43  ;;  %v2939_v43 = vunpack.c.h.s8.bf16 %v2547_v11 }
 0x67e   :  { %3337 = vmatpush1.bf16.msra.mxu1 %v2883_v53  ;;  %3166 = vmatprep.subr.bf16.mxu0 %v2889_v41  ;;  %v2945_v53 = vunpack.c.l.s8.bf16 %v2553_v44  ;;  %v2552_v41 = vld [vmem:[#allocation17 + $0x540] sm:$0xff] }
 0x67f   :  { %3338 = vmatprep.subr.bf16.mxu1 %v2891_v46  ;;  %v2554_v46 = vld [vmem:[#allocation17 + $0x550] sm:$0xff]  ;;  %v2944_v48 = vunpack.c.l.s8.bf16 %v2552_v41  ;;  %v2951_v15 = vunpack.c.h.s8.bf16 %v2552_v41 }
 0x681   :  { %3167 = vmatpush1.bf16.msra.mxu0 %v2888_v35  ;;  %v2946_v35 = vunpack.c.l.s8.bf16 %v2554_v46 }
 0x682   :  { %3339 = vmatpush1.bf16.msra.mxu1 %v2890_v49  ;;  %3168 = vmatprep.subr.bf16.mxu0 %v2896_v13  ;;  %v2952_v49 = vunpack.c.h.s8.bf16 %v2553_v44  ;;  %v2560_v13 = vld [vmem:[#allocation17 + $0x580] sm:$0xff]  ;;  %v2583_v44 = vld [vmem:[#allocation17 + $0x638] sm:$0xff] }
 0x683   :  { %3340 = vmatprep.subr.bf16.mxu1 %v2898_v14  ;;  %v2954_v14 = vunpack.c.h.s8.bf16 %v2555_v42  ;;  %v3003_v41 = vunpack.c.l.s8.bf16 %v2583_v44 }
 0x685   :  { %3169 = vmatpush1.bf16.msra.mxu0 %v2895_v17  ;;  %v2953_v17 = vunpack.c.h.s8.bf16 %v2554_v46 }
 0x686   :  { %3341 = vmatpush1.bf16.msra.mxu1 %v2897_v58  ;;  %3170 = vmatprep.subr.bf16.mxu0 %v2903_v18  ;;  %v2959_v58 = vunpack.c.l.s8.bf16 %v2560_v13  ;;  %v2559_v18 = vld [vmem:[#allocation17 + $0x578] sm:$0xff] }
 0x687   :  { %3342 = vmatprep.subr.bf16.mxu1 %v2905_v19  ;;  %v2561_v19 = vld [vmem:[#allocation17 + $0x588] sm:$0xff]  ;;  %v2958_v22 = vunpack.c.l.s8.bf16 %v2559_v18  ;;  %v2965_v1 = vunpack.c.h.s8.bf16 %v2559_v18 }
 0x689   :  { %3171 = vmatpush1.bf16.msra.mxu0 %v2902_v28  ;;  %v2960_v28 = vunpack.c.l.s8.bf16 %v2561_v19 }
 0x68a   :  { %3343 = vmatpush1.bf16.msra.mxu1 %v2904_v62  ;;  %3172 = vmatprep.subr.bf16.mxu0 %v2910_v36  ;;  %v2966_v62 = vunpack.c.h.s8.bf16 %v2560_v13  ;;  %v2968_v36 = vunpack.c.h.s8.bf16 %v2562_v57  ;;  %v2588_v13 = vld [vmem:[#allocation17 + $0x660] sm:$0xff] }
 0x68b   :  { %3344 = vmatprep.subr.bf16.mxu1 %v2912_v3  ;;  %v2567_v3 = vld [vmem:[#allocation17 + $0x5b8] sm:$0xff] }
 0x68d   :  { %3173 = vmatpush1.bf16.msra.mxu0 %v2909_v38  ;;  %v2967_v38 = vunpack.c.h.s8.bf16 %v2561_v19 }
 0x68e   :  { %3345 = vmatpush1.bf16.msra.mxu1 %v2911_v40  ;;  %3174 = vmatprep.subr.bf16.mxu0 %v2917_v33  ;;  %v2973_v40 = vunpack.c.l.s8.bf16 %v2567_v3  ;;  %v2566_v33 = vld [vmem:[#allocation17 + $0x5b0] sm:$0xff] }
 0x68f   :  { %3346 = vmatprep.subr.bf16.mxu1 %v2919_v47  ;;  %v2568_v47 = vld [vmem:[#allocation17 + $0x5c0] sm:$0xff]  ;;  %v2972_v60 = vunpack.c.l.s8.bf16 %v2566_v33  ;;  %v2979_v56 = vunpack.c.h.s8.bf16 %v2566_v33 }
 0x691   :  { %3175 = vmatpush1.bf16.msra.mxu0 %v2916_v59  ;;  %v2974_v59 = vunpack.c.l.s8.bf16 %v2568_v47 }
 0x692   :  { %3347 = vmatpush1.bf16.msra.mxu1 %v2918_v25  ;;  %3176 = vmatprep.subr.bf16.mxu0 %v2924_v2  ;;  %v2980_v25 = vunpack.c.h.s8.bf16 %v2567_v3  ;;  %v2982_v2 = vunpack.c.h.s8.bf16 %v2569_v29  ;;  %v2597_v3 = vld [vmem:[#allocation17 + $0x6a8] sm:$0xff] }
 0x693   :  { %3348 = vmatprep.subr.bf16.mxu1 %v2926_v24  ;;  %v2574_v24 = vld [vmem:[#allocation17 + $0x5f0] sm:$0xff]  ;;  %v3031_v33 = vunpack.c.l.s8.bf16 %v2597_v3 }
 0x695   :  { %3177 = vmatpush1.bf16.msra.mxu0 %v2923_v61  ;;  %v2981_v61 = vunpack.c.h.s8.bf16 %v2568_v47 }
 0x696   :  { %3349 = vmatpush1.bf16.msra.mxu1 %v2925_v8  ;;  %3178 = vmatprep.subr.bf16.mxu0 %v2931_v9  ;;  %v2987_v8 = vunpack.c.l.s8.bf16 %v2574_v24  ;;  %v2573_v9 = vld [vmem:[#allocation17 + $0x5e8] sm:$0xff] }
 0x697   :  { %3350 = vmatprep.subr.bf16.mxu1 %v2933_v7  ;;  %v2575_v7 = vld [vmem:[#allocation17 + $0x5f8] sm:$0xff]  ;;  %v2986_v11 = vunpack.c.l.s8.bf16 %v2573_v9  ;;  %v2993_v42 = vunpack.c.h.s8.bf16 %v2573_v9 }
 0x699   :  { %3179 = vmatpush1.bf16.msra.mxu0 %v2930_v55  ;;  %v2988_v55 = vunpack.c.l.s8.bf16 %v2575_v7 }
 0x69a   :  { %3351 = vmatpush1.bf16.msra.mxu1 %v2932_v52  ;;  %3180 = vmatprep.subr.bf16.mxu0 %v2938_v26  ;;  %v2994_v52 = vunpack.c.h.s8.bf16 %v2574_v24  ;;  %v2996_v26 = vunpack.c.h.s8.bf16 %v2576_v20  ;;  %v2604_v24 = vld [vmem:[#allocation17 + $0x6e0] sm:$0xff] }
 0x69b   :  { %3352 = vmatprep.subr.bf16.mxu1 %v2940_v21  ;;  %v2581_v21 = vld [vmem:[#allocation17 + $0x628] sm:$0xff]  ;;  %v3045_v9 = vunpack.c.l.s8.bf16 %v2604_v24 }
 0x69d   :  { %3181 = vmatpush1.bf16.msra.mxu0 %v2937_v54  ;;  %v2995_v54 = vunpack.c.h.s8.bf16 %v2575_v7 }
 0x69e   :  { %3353 = vmatpush1.bf16.msra.mxu1 %v2939_v43  ;;  %3193 = vmatprep.subr.bf16.mxu0 %v2945_v53  ;;  %v3001_v43 = vunpack.c.l.s8.bf16 %v2581_v21  ;;  %v2580_v53 = vld [vmem:[#allocation17 + $0x620] sm:$0xff] }
 0x69f   :  { %3365 = vmatprep.subr.bf16.mxu1 %v2947_v12  ;;  %v2582_v12 = vld [vmem:[#allocation17 + $0x630] sm:$0xff]  ;;  %v3000_v46 = vunpack.c.l.s8.bf16 %v2580_v53  ;;  %v3007_v57 = vunpack.c.h.s8.bf16 %v2580_v53 }
 0x6a0   :  { %3183 = vmatmul.mubr.bf16.vlgmr.msra.gmra.mrb[12].mxu0 %v5164_v39 }
 0x6a1   :  { %3355 = vmatmul.mubr.bf16.vlgmr.msra.gmra.mrb[20].mxu1 %v5164_v39  ;;  %3194 = vmatpush1.bf16.msra.mxu0 %v2944_v48  ;;  %v3002_v48 = vunpack.c.l.s8.bf16 %v2582_v12 }
 0x6a2   :  { %3225 = vmatprep.mubr.bf16.mxu0 %v5158_v27  ;;  %3366 = vmatpush1.bf16.msra.mxu1 %v2946_v35  ;;  %v3008_v35 = vunpack.c.h.s8.bf16 %v2581_v21  ;;  %v2418_v21 = vld [vmem:[#allocation17 + $0x110] sm:$0xff] }
 0x6a3   :  { %3397 = vmatprep.mubr.bf16.mxu1 %v5158_v27  ;;  %3195 = vmatprep.subr.bf16.mxu0 %v2952_v49  ;;  %v3010_v49 = vunpack.c.h.s8.bf16 %v2583_v44  ;;  %v2670_v53 = vunpack.c.l.s8.bf16 %v2418_v21 }
 0x6a4   :  { %3367 = vmatprep.subr.bf16.mxu1 %v2954_v14  ;;  %v2590_v14 = vld [vmem:[#allocation17 + $0x670] sm:$0xff] }
 0x6a5   :  { %3196 = vmatpush1.bf16.msra.mxu0 %v2951_v15  ;;  %v3009_v15 = vunpack.c.h.s8.bf16 %v2582_v12  ;;  %v3017_v18 = vunpack.c.l.s8.bf16 %v2590_v14 }
 0x6a6   :  { %3368 = vmatpush1.bf16.msra.mxu1 %v2953_v17  ;;  %3197 = vmatprep.subr.bf16.mxu0 %v2959_v58  ;;  %v3015_v17 = vunpack.c.l.s8.bf16 %v2588_v13  ;;  %v2587_v58 = vld [vmem:[#allocation17 + $0x658] sm:$0xff] }
 0x6a7   :  { %3369 = vmatprep.subr.bf16.mxu1 %v2961_v0  ;;  %v2589_v0 = vld [vmem:[#allocation17 + $0x668] sm:$0xff]  ;;  %v3014_v19 = vunpack.c.l.s8.bf16 %v2587_v58  ;;  %v3021_v29 = vunpack.c.h.s8.bf16 %v2587_v58 }
 0x6a9   :  { %3198 = vmatpush1.bf16.msra.mxu0 %v2958_v22  ;;  %v3016_v22 = vunpack.c.l.s8.bf16 %v2589_v0 }
 0x6aa   :  { %3370 = vmatpush1.bf16.msra.mxu1 %v2960_v28  ;;  %3199 = vmatprep.subr.bf16.mxu0 %v2966_v62  ;;  %v3022_v28 = vunpack.c.h.s8.bf16 %v2588_v13  ;;  %v3024_v62 = vunpack.c.h.s8.bf16 %v2590_v14  ;;  %v2425_v13 = vld [vmem:[#allocation17 + $0x148] sm:$0xff] }
 0x6ab   :  { %3371 = vmatprep.subr.bf16.mxu1 %v2968_v36  ;;  %v2595_v36 = vld [vmem:[#allocation17 + $0x698] sm:$0xff]  ;;  %v2684_v58 = vunpack.c.l.s8.bf16 %v2425_v13 }
 0x6ad   :  { %3200 = vmatpush1.bf16.msra.mxu0 %v2965_v1  ;;  %v3023_v1 = vunpack.c.h.s8.bf16 %v2589_v0 }
 0x6ae   :  { %3372 = vmatpush1.bf16.msra.mxu1 %v2967_v38  ;;  %3201 = vmatprep.subr.bf16.mxu0 %v2973_v40  ;;  %v3029_v38 = vunpack.c.l.s8.bf16 %v2595_v36  ;;  %v2594_v40 = vld [vmem:[#allocation17 + $0x690] sm:$0xff] }
 0x6af   :  { %3373 = vmatprep.subr.bf16.mxu1 %v2975_v10  ;;  %v2596_v10 = vld [vmem:[#allocation17 + $0x6a0] sm:$0xff]  ;;  %v3028_v47 = vunpack.c.l.s8.bf16 %v2594_v40  ;;  %v3035_v20 = vunpack.c.h.s8.bf16 %v2594_v40 }
 0x6b0   :  { %v2404_v40 = vld [vmem:[#allocation17 + $0xa0] sm:$0xff] }
 0x6b1   :  { %3202 = vmatpush1.bf16.msra.mxu0 %v2972_v60  ;;  %v3030_v60 = vunpack.c.l.s8.bf16 %v2596_v10 }
 0x6b2   :  { %3374 = vmatpush1.bf16.msra.mxu1 %v2974_v59  ;;  %3203 = vmatprep.subr.bf16.mxu0 %v2980_v25  ;;  %v3036_v59 = vunpack.c.h.s8.bf16 %v2595_v36  ;;  %v3038_v25 = vunpack.c.h.s8.bf16 %v2597_v3  ;;  %v2432_v36 = vld [vmem:[#allocation17 + $0x180] sm:$0xff] }
 0x6b3   :  { %3375 = vmatprep.subr.bf16.mxu1 %v2982_v2  ;;  %v2602_v2 = vld [vmem:[#allocation17 + $0x6d0] sm:$0xff] }
 0x6b5   :  { %3204 = vmatpush1.bf16.msra.mxu0 %v2979_v56  ;;  %v3037_v56 = vunpack.c.h.s8.bf16 %v2596_v10  ;;  %v2642_v10 = vunpack.c.l.s8.bf16 %v2404_v40 }
 0x6b6   :  { %3376 = vmatpush1.bf16.msra.mxu1 %v2981_v61  ;;  %3205 = vmatprep.subr.bf16.mxu0 %v2987_v8  ;;  %v3043_v61 = vunpack.c.l.s8.bf16 %v2602_v2  ;;  %v2601_v8 = vld [vmem:[#allocation17 + $0x6c8] sm:$0xff] }
 0x6b7   :  { %3377 = vmatprep.subr.bf16.mxu1 %v2989_v6  ;;  %v2603_v6 = vld [vmem:[#allocation17 + $0x6d8] sm:$0xff]  ;;  %v3042_v7 = vunpack.c.l.s8.bf16 %v2601_v8  ;;  %v3049_v44 = vunpack.c.h.s8.bf16 %v2601_v8 }
 0x6b8   :  { %v2411_v8 = vld [vmem:[#allocation17 + $0xd8] sm:$0xff] }
 0x6b9   :  { %3206 = vmatpush1.bf16.msra.mxu0 %v2986_v11  ;;  %v3044_v11 = vunpack.c.l.s8.bf16 %v2603_v6 }
 0x6ba   :  { %3378 = vmatpush1.bf16.msra.mxu1 %v2988_v55  ;;  %3207 = vmatprep.subr.bf16.mxu0 %v2994_v52  ;;  %v3050_v55 = vunpack.c.h.s8.bf16 %v2602_v2  ;;  %v3052_v52 = vunpack.c.h.s8.bf16 %v2604_v24  ;;  %v2649_v24 = vunpack.c.h.s8.bf16 %v2404_v40 }
 0x6bb   :  { %3379 = vmatprep.subr.bf16.mxu1 %v2996_v26  ;;  %v2389_v26 = vld [vmem:[#allocation17 + $0x28] sm:$0xff] }
 0x6bd   :  { %3208 = vmatpush1.bf16.msra.mxu0 %v2993_v42  ;;  %v3051_v42 = vunpack.c.h.s8.bf16 %v2603_v6  ;;  %v2656_v6 = vunpack.c.l.s8.bf16 %v2411_v8 }
 0x6be   :  { %3380 = vmatpush1.bf16.msra.mxu1 %v2995_v54  ;;  %3209 = vmatprep.subr.bf16.mxu0 %v3001_v43  ;;  %v2613_v54 = vunpack.c.l.s8.bf16 %v2389_v26  ;;  %v2388_v43 = vld [vmem:[#allocation17 + $0x20] sm:$0xff] }
 0x6bf   :  { %3381 = vmatprep.subr.bf16.mxu1 %v3003_v41  ;;  %v2390_v41 = vld [vmem:[#allocation17 + $0x30] sm:$0xff]  ;;  %v2612_v12 = vunpack.c.l.s8.bf16 %v2388_v43  ;;  %v2619_v14 = vunpack.c.h.s8.bf16 %v2388_v43 }
 0x6c0   :  { %v2446_v43 = vld [vmem:[#allocation17 + $0x1f0] sm:$0xff] }
 0x6c1   :  { %3210 = vmatpush1.bf16.msra.mxu0 %v3000_v46  ;;  %v2614_v46 = vunpack.c.l.s8.bf16 %v2390_v41 }
 0x6c2   :  { %3382 = vmatpush1.bf16.msra.mxu1 %v3002_v48  ;;  %3211 = vmatprep.subr.bf16.mxu0 %v3008_v35  ;;  %v2620_v48 = vunpack.c.h.s8.bf16 %v2389_v26  ;;  %v2396_v35 = vld [vmem:[#allocation17 + $0x60] sm:$0xff] }
 0x6c3   :  { %3383 = vmatprep.subr.bf16.mxu1 %v3010_v49  ;;  %v2677_v49 = vunpack.c.h.s8.bf16 %v2418_v21  ;;  %v2663_v21 = vunpack.c.h.s8.bf16 %v2411_v8 }
 0x6c5   :  { %3212 = vmatpush1.bf16.msra.mxu0 %v3007_v57  ;;  %v2621_v57 = vunpack.c.h.s8.bf16 %v2390_v41  ;;  %v2726_v41 = vunpack.c.l.s8.bf16 %v2446_v43 }
 0x6c6   :  { %3384 = vmatpush1.bf16.msra.mxu1 %v3009_v15  ;;  %3213 = vmatprep.subr.bf16.mxu0 %v3015_v17  ;;  %v2627_v15 = vunpack.c.l.s8.bf16 %v2396_v35  ;;  %v2395_v17 = vld [vmem:[#allocation17 + $0x58] sm:$0xff] }
 0x6c7   :  { %3385 = vmatprep.subr.bf16.mxu1 %v3017_v18  ;;  %v2397_v18 = vld [vmem:[#allocation17 + $0x68] sm:$0xff]  ;;  %v2626_v0 = vunpack.c.l.s8.bf16 %v2395_v17  ;;  %v2633_v3 = vunpack.c.h.s8.bf16 %v2395_v17 }
 0x6c8   :  { %v2453_v17 = vld [vmem:[#allocation17 + $0x228] sm:$0xff] }
 0x6c9   :  { %3214 = vmatpush1.bf16.msra.mxu0 %v3014_v19  ;;  %v2628_v19 = vunpack.c.l.s8.bf16 %v2397_v18 }
 0x6ca   :  { %3386 = vmatpush1.bf16.msra.mxu1 %v3016_v22  ;;  %3215 = vmatprep.subr.bf16.mxu0 %v3022_v28  ;;  %v2634_v22 = vunpack.c.h.s8.bf16 %v2396_v35  ;;  %v2691_v28 = vunpack.c.h.s8.bf16 %v2425_v13  ;;  %v2481_v35 = vld [vmem:[#allocation17 + $0x308] sm:$0xff]  ;;  %v2733_v13 = vunpack.c.h.s8.bf16 %v2446_v43 }
 0x6cb   :  { %3387 = vmatprep.subr.bf16.mxu1 %v3024_v62  ;;  %v2403_v62 = vld [vmem:[#allocation17 + $0x98] sm:$0xff] }
 0x6cd   :  { %3216 = vmatpush1.bf16.msra.mxu0 %v3021_v29  ;;  %v2635_v29 = vunpack.c.h.s8.bf16 %v2397_v18  ;;  %v2740_v18 = vunpack.c.l.s8.bf16 %v2453_v17 }
 0x6ce   :  { %3388 = vmatpush1.bf16.msra.mxu1 %v3023_v1  ;;  %3217 = vmatprep.subr.bf16.mxu0 %v3029_v38  ;;  %v2402_v1 = vld [vmem:[#allocation17 + $0x90] sm:$0xff]  ;;  %v2698_v38 = vunpack.c.l.s8.bf16 %v2432_v36 }
 0x6cf   :  { %3389 = vmatprep.subr.bf16.mxu1 %v3031_v33  ;;  %v2640_v33 = vunpack.c.l.s8.bf16 %v2402_v1  ;;  %v2647_v2 = vunpack.c.h.s8.bf16 %v2402_v1  ;;  %v2460_v1 = vld [vmem:[#allocation17 + $0x260] sm:$0xff] }
 0x6d0   :  { %v2754_v40 = vunpack.c.l.s8.bf16 %v2460_v1 }
 0x6d1   :  { %3218 = vmatpush1.bf16.msra.mxu0 %v3028_v47  ;;  %v2648_v47 = vunpack.c.h.s8.bf16 %v2403_v62 }
 0x6d2   :  { %3390 = vmatpush1.bf16.msra.mxu1 %v3030_v60  ;;  %3219 = vmatprep.subr.bf16.mxu0 %v3036_v59  ;;  %v2705_v60 = vunpack.c.h.s8.bf16 %v2432_v36  ;;  %v2410_v59 = vld [vmem:[#allocation17 + $0xd0] sm:$0xff]  ;;  %v2747_v36 = vunpack.c.h.s8.bf16 %v2453_v17 }
 0x6d3   :  { %3391 = vmatprep.subr.bf16.mxu1 %v3038_v25  ;;  %v2439_v25 = vld [vmem:[#allocation17 + $0x1b8] sm:$0xff] }
 0x6d5   :  { %3220 = vmatpush1.bf16.msra.mxu0 %v3035_v20  ;;  %v2655_v20 = vunpack.c.l.s8.bf16 %v2410_v59 }
 0x6d6   :  { %3392 = vmatpush1.bf16.msra.mxu1 %v3037_v56  ;;  %3221 = vmatprep.subr.bf16.mxu0 %v3043_v61  ;;  %v2409_v56 = vld [vmem:[#allocation17 + $0xc8] sm:$0xff]  ;;  %v2712_v61 = vunpack.c.l.s8.bf16 %v2439_v25 }
 0x6d7   :  { %3393 = vmatprep.subr.bf16.mxu1 %v3045_v9  ;;  %v2654_v9 = vunpack.c.l.s8.bf16 %v2409_v56  ;;  %v2661_v26 = vunpack.c.h.s8.bf16 %v2409_v56  ;;  %v2467_v56 = vld [vmem:[#allocation17 + $0x298] sm:$0xff] }
 0x6d8   :  { %v2768_v8 = vunpack.c.l.s8.bf16 %v2467_v56 }
 0x6d9   :  { %3222 = vmatpush1.bf16.msra.mxu0 %v3042_v7  ;;  %v2662_v7 = vunpack.c.h.s8.bf16 %v2410_v59 }
 0x6da   :  { %3394 = vmatpush1.bf16.msra.mxu1 %v3044_v11  ;;  %3223 = vmatprep.subr.bf16.mxu0 %v3050_v55  ;;  %v2719_v11 = vunpack.c.h.s8.bf16 %v2439_v25  ;;  %v2417_v55 = vld [vmem:[#allocation17 + $0x108] sm:$0xff]  ;;  %v2761_v25 = vunpack.c.h.s8.bf16 %v2460_v1 }
 0x6db   :  { %3395 = vmatprep.subr.bf16.mxu1 %v3052_v52  ;;  %v2474_v52 = vld [vmem:[#allocation17 + $0x2d0] sm:$0xff] }
 0x6dd   :  { %3224 = vmatpush1.bf16.msra.mxu0 %v3049_v44  ;;  %v2669_v44 = vunpack.c.l.s8.bf16 %v2417_v55 }
 0x6de   :  { %3396 = vmatpush1.bf16.msra.mxu1 %v3051_v42  ;;  %3408 = vmatprep.subr.bf16.mxu0 %v2613_v54  ;;  %v2416_v42 = vld [vmem:[#allocation17 + $0x100] sm:$0xff]  ;;  %v2782_v54 = vunpack.c.l.s8.bf16 %v2474_v52 }
 0x6df   :  { %3994 = vmatprep.subr.bf16.mxu1 %v2670_v53  ;;  %v2668_v53 = vunpack.c.l.s8.bf16 %v2416_v42 }
 0x6e0   :  { %3226 = vmatmul.mubr.bf16.vlgmr.msra.gmra.mrb[12].mxu0 %v5166_v51 }
 0x6e1   :  { %3398 = vmatmul.mubr.bf16.vlgmr.msra.gmra.mrb[20].mxu1 %v5166_v51  ;;  %3409 = vmatpush1.bf16.msra.mxu0 %v2612_v12  ;;  %v2676_v12 = vunpack.c.h.s8.bf16 %v2417_v55 }
 0x6e2   :  { %3440 = vmatprep.mubr.bf16.mxu0 %v5125_v45  ;;  %3995 = vmatpush3.bf16.msra.mxu1 %v2614_v46  ;;  %v2789_v46 = vunpack.c.h.s8.bf16 %v2474_v52  ;;  %v2775_v52 = vunpack.c.h.s8.bf16 %v2467_v56 }
 0x6e3   :  { %3612 = vmatprep.mubr.bf16.mxu1 %v5125_v45  ;;  %3410 = vmatprep.subr.bf16.mxu0 %v2620_v48  ;;  %v2641_v45 = vunpack.c.l.s8.bf16 %v2403_v62  ;;  %v2424_v48 = vld [vmem:[#allocation17 + $0x140] sm:$0xff] }
 0x6e4   :  { %3996 = vmatprep.subr.bf16.mxu1 %v2677_v49  ;;  %v2675_v49 = vunpack.c.h.s8.bf16 %v2416_v42  ;;  %v2502_v42 = vld [vmem:[#allocation17 + $0x3b0] sm:$0xff] }
 0x6e5   :  { %3411 = vmatpush1.bf16.msra.mxu0 %v2619_v14  ;;  %v2683_v14 = vunpack.c.l.s8.bf16 %v2424_v48  ;;  %v2838_v43 = vunpack.c.l.s8.bf16 %v2502_v42 }
 0x6e6   :  { %3997 = vmatpush3.bf16.msra.mxu1 %v2621_v57  ;;  %3412 = vmatprep.subr.bf16.mxu0 %v2627_v15  ;;  %v2423_v57 = vld [vmem:[#allocation17 + $0x138] sm:$0xff]  ;;  %v2796_v15 = vunpack.c.l.s8.bf16 %v2481_v35 }
 0x6e7   :  { %3998 = vmatprep.subr.bf16.mxu1 %v2684_v58  ;;  %v2682_v58 = vunpack.c.l.s8.bf16 %v2423_v57  ;;  %v2689_v62 = vunpack.c.h.s8.bf16 %v2423_v57  ;;  %v2509_v57 = vld [vmem:[#allocation17 + $0x3e8] sm:$0xff] }
 0x6e9   :  { %3413 = vmatpush1.bf16.msra.mxu0 %v2626_v0  ;;  %v2690_v0 = vunpack.c.h.s8.bf16 %v2424_v48 }
 0x6ea   :  { %3999 = vmatpush3.bf16.msra.mxu1 %v2628_v19  ;;  %3414 = vmatprep.subr.bf16.mxu0 %v2634_v22  ;;  %v2803_v19 = vunpack.c.h.s8.bf16 %v2481_v35  ;;  %v2431_v22 = vld [vmem:[#allocation17 + $0x178] sm:$0xff]  ;;  %v2845_v35 = vunpack.c.h.s8.bf16 %v2502_v42 }
 0x6eb   :  { %4000 = vmatprep.subr.bf16.mxu1 %v2691_v28  ;;  %v2488_v28 = vld [vmem:[#allocation17 + $0x340] sm:$0xff] }
 0x6ed   :  { %3415 = vmatpush1.bf16.msra.mxu0 %v2633_v3  ;;  %v2697_v3 = vunpack.c.l.s8.bf16 %v2431_v22 }
 0x6ee   :  { %4001 = vmatpush3.bf16.msra.mxu1 %v2635_v29  ;;  %3416 = vmatprep.subr.bf16.mxu0 %v2641_v45  ;;  %v2430_v29 = vld [vmem:[#allocation17 + $0x170] sm:$0xff]  ;;  %v2810_v45 = vunpack.c.l.s8.bf16 %v2488_v28 }
 0x6ef   :  { %4002 = vmatprep.subr.bf16.mxu1 %v2698_v38  ;;  %v2696_v38 = vunpack.c.l.s8.bf16 %v2430_v29  ;;  %v2703_v59 = vunpack.c.h.s8.bf16 %v2430_v29 }
 0x6f1   :  { %3417 = vmatpush1.bf16.msra.mxu0 %v2640_v33  ;;  %v2704_v33 = vunpack.c.h.s8.bf16 %v2431_v22 }
 0x6f2   :  { %4003 = vmatpush3.bf16.msra.mxu1 %v2642_v10  ;;  %3418 = vmatprep.subr.bf16.mxu0 %v2648_v47  ;;  %v2817_v10 = vunpack.c.h.s8.bf16 %v2488_v28  ;;  %v2438_v47 = vld [vmem:[#allocation17 + $0x1b0] sm:$0xff] }
 0x6f3   :  { %4004 = vmatprep.subr.bf16.mxu1 %v2705_v60  ;;  %v2495_v60 = vld [vmem:[#allocation17 + $0x378] sm:$0xff]  ;;  %v2458_v28 = vld [vmem:[#allocation17 + $0x250] sm:$0xff] }
 0x6f5   :  { %3419 = vmatpush1.bf16.msra.mxu0 %v2647_v2  ;;  %v2711_v2 = vunpack.c.l.s8.bf16 %v2438_v47 }
 0x6f6   :  { %4005 = vmatpush3.bf16.msra.mxu1 %v2649_v24  ;;  %3420 = vmatprep.subr.bf16.mxu0 %v2655_v20  ;;  %v2437_v24 = vld [vmem:[#allocation17 + $0x1a8] sm:$0xff]  ;;  %v2824_v20 = vunpack.c.l.s8.bf16 %v2495_v60 }
 0x6f7   :  { %4006 = vmatprep.subr.bf16.mxu1 %v2712_v61  ;;  %v2710_v61 = vunpack.c.l.s8.bf16 %v2437_v24  ;;  %v2717_v55 = vunpack.c.h.s8.bf16 %v2437_v24 }
 0x6f9   :  { %3421 = vmatpush1.bf16.msra.mxu0 %v2654_v9  ;;  %v2718_v9 = vunpack.c.h.s8.bf16 %v2438_v47 }
 0x6fa   :  { %4007 = vmatpush3.bf16.msra.mxu1 %v2656_v6  ;;  %3422 = vmatprep.subr.bf16.mxu0 %v2662_v7  ;;  %v2831_v6 = vunpack.c.h.s8.bf16 %v2495_v60  ;;  %v2445_v7 = vld [vmem:[#allocation17 + $0x1e8] sm:$0xff] }
 0x6fb   :  { %4008 = vmatprep.subr.bf16.mxu1 %v2719_v11  ;;  %v2530_v11 = vld [vmem:[#allocation17 + $0x490] sm:$0xff]  ;;  %v2465_v60 = vld [vmem:[#allocation17 + $0x288] sm:$0xff] }
 0x6fd   :  { %3423 = vmatpush1.bf16.msra.mxu0 %v2661_v26  ;;  %v2725_v26 = vunpack.c.l.s8.bf16 %v2445_v7 }
 0x6fe   :  { %4009 = vmatpush3.bf16.msra.mxu1 %v2663_v21  ;;  %3424 = vmatprep.subr.bf16.mxu0 %v2669_v44  ;;  %v2444_v21 = vld [vmem:[#allocation17 + $0x1e0] sm:$0xff]  ;;  %v2894_v44 = vunpack.c.l.s8.bf16 %v2530_v11 }
 0x6ff   :  { %4016 = vmatprep.subr.bf16.mxu1 %v2782_v54  ;;  %v2724_v54 = vunpack.c.l.s8.bf16 %v2444_v21  ;;  %v2731_v48 = vunpack.c.h.s8.bf16 %v2444_v21 }
 0x701   :  { %3613 = vmatmul.mubr.bf16.vlgmr.msra.gmra.mrb[24].mxu1 %v5128_v37  ;;  %3425 = vmatpush1.bf16.msra.mxu0 %v2668_v53  ;;  %v2732_v53 = vunpack.c.h.s8.bf16 %v2445_v7 }
 0x702   :  { %4017 = vmatpush3.bf16.msra.mxu1 %v2726_v41  ;;  %3653 = vmatprep.mubr.bf16.mxu1 %v5134_v23  ;;  %v2452_v41 = vld [vmem:[#allocation17 + $0x220] sm:$0xff] }
 0x703   :  { %3426 = vmatprep.subr.bf16.mxu0 %v2676_v12  ;;  %4018 = vmatprep.subr.bf16.mxu1 %v2789_v46  ;;  %v2901_v12 = vunpack.c.h.s8.bf16 %v2530_v11  ;;  %v2537_v46 = vld [vmem:[#allocation17 + $0x4c8] sm:$0xff]  ;;  %v2746_v17 = vunpack.c.h.s8.bf16 %v2452_v41  ;;  %v2472_v11 = vld [vmem:[#allocation17 + $0x2c0] sm:$0xff] }
 0x705   :  { %3427 = vmatpush1.bf16.msra.mxu0 %v2675_v49  ;;  %v2739_v49 = vunpack.c.l.s8.bf16 %v2452_v41 }
 0x706   :  { %4019 = vmatpush3.bf16.msra.mxu1 %v2733_v13  ;;  %3428 = vmatprep.subr.bf16.mxu0 %v2683_v14  ;;  %v2451_v13 = vld [vmem:[#allocation17 + $0x218] sm:$0xff]  ;;  %v2908_v14 = vunpack.c.l.s8.bf16 %v2537_v46 }
 0x707   :  { %4020 = vmatprep.subr.bf16.mxu1 %v2796_v15  ;;  %v2852_v15 = vunpack.c.l.s8.bf16 %v2509_v57 }
 0x709   :  { %3429 = vmatpush1.bf16.msra.mxu0 %v2682_v58  ;;  %v2915_v58 = vunpack.c.h.s8.bf16 %v2537_v46  ;;  %v2479_v46 = vld [vmem:[#allocation17 + $0x2f8] sm:$0xff] }
 0x70a   :  { %4021 = vmatpush3.bf16.msra.mxu1 %v2740_v18  ;;  %3430 = vmatprep.subr.bf16.mxu0 %v2690_v0  ;;  %v2459_v18 = vld [vmem:[#allocation17 + $0x258] sm:$0xff]  ;;  %v2745_v0 = vunpack.c.h.s8.bf16 %v2451_v13 }
 0x70b   :  { %4022 = vmatprep.subr.bf16.mxu1 %v2803_v19  ;;  %v2859_v19 = vunpack.c.h.s8.bf16 %v2509_v57  ;;  %v2753_v22 = vunpack.c.l.s8.bf16 %v2459_v18 }
 0x70d   :  { %3431 = vmatpush1.bf16.msra.mxu0 %v2689_v62 }
 0x70e   :  { %4023 = vmatpush3.bf16.msra.mxu1 %v2747_v36  ;;  %3432 = vmatprep.subr.bf16.mxu0 %v2697_v3  ;;  %v2516_v36 = vld [vmem:[#allocation17 + $0x420] sm:$0xff]  ;;  %v2752_v3 = vunpack.c.l.s8.bf16 %v2458_v28 }
 0x70f   :  { %4024 = vmatprep.subr.bf16.mxu1 %v2810_v45  ;;  %v2866_v29 = vunpack.c.l.s8.bf16 %v2516_v36  ;;  %v2760_v45 = vunpack.c.h.s8.bf16 %v2459_v18 }
 0x711   :  { %3433 = vmatpush1.bf16.msra.mxu0 %v2696_v38  ;;  %v2466_v38 = vld [vmem:[#allocation17 + $0x290] sm:$0xff] }
 0x712   :  { %4025 = vmatpush3.bf16.msra.mxu1 %v2754_v40  ;;  %3434 = vmatprep.subr.bf16.mxu0 %v2704_v33  ;;  %v2551_v40 = vld [vmem:[#allocation17 + $0x538] sm:$0xff]  ;;  %v2759_v33 = vunpack.c.h.s8.bf16 %v2458_v28  ;;  %v2767_v47 = vunpack.c.l.s8.bf16 %v2466_v38 }
 0x713   :  { %4026 = vmatprep.subr.bf16.mxu1 %v2817_v10  ;;  %v2873_v10 = vunpack.c.h.s8.bf16 %v2516_v36  ;;  %v2943_v56 = vunpack.c.h.s8.bf16 %v2551_v40 }
 0x715   :  { %3435 = vmatpush1.bf16.msra.mxu0 %v2703_v59  ;;  %v2936_v59 = vunpack.c.l.s8.bf16 %v2551_v40  ;;  %v2493_v40 = vld [vmem:[#allocation17 + $0x368] sm:$0xff] }
 0x716   :  { %4027 = vmatpush3.bf16.msra.mxu1 %v2761_v25  ;;  %3436 = vmatprep.subr.bf16.mxu0 %v2711_v2  ;;  %v2523_v25 = vld [vmem:[#allocation17 + $0x458] sm:$0xff]  ;;  %v2766_v2 = vunpack.c.l.s8.bf16 %v2465_v60 }
 0x717   :  { %4028 = vmatprep.subr.bf16.mxu1 %v2824_v20  ;;  %v2880_v24 = vunpack.c.l.s8.bf16 %v2523_v25  ;;  %v2774_v20 = vunpack.c.h.s8.bf16 %v2466_v38 }
 0x719   :  { %3437 = vmatpush1.bf16.msra.mxu0 %v2710_v61  ;;  %v2473_v61 = vld [vmem:[#allocation17 + $0x2c8] sm:$0xff] }
 0x71a   :  { %4029 = vmatpush3.bf16.msra.mxu1 %v2768_v8  ;;  %3438 = vmatprep.subr.bf16.mxu0 %v2718_v9  ;;  %v2586_v8 = vld [vmem:[#allocation17 + $0x650] sm:$0xff]  ;;  %v2773_v9 = vunpack.c.h.s8.bf16 %v2465_v60  ;;  %v2781_v7 = vunpack.c.l.s8.bf16 %v2473_v61 }
 0x71b   :  { %4030 = vmatprep.subr.bf16.mxu1 %v2831_v6  ;;  %v2887_v6 = vunpack.c.h.s8.bf16 %v2523_v25  ;;  %v3013_v42 = vunpack.c.h.s8.bf16 %v2586_v8 }
 0x71d   :  { %3439 = vmatpush1.bf16.msra.mxu0 %v2717_v55  ;;  %v3006_v55 = vunpack.c.l.s8.bf16 %v2586_v8 }
 0x71e   :  { %4031 = vmatpush3.bf16.msra.mxu1 %v2775_v52  ;;  %3451 = vmatprep.subr.bf16.mxu0 %v2725_v26  ;;  %v2558_v52 = vld [vmem:[#allocation17 + $0x570] sm:$0xff]  ;;  %v2780_v26 = vunpack.c.l.s8.bf16 %v2472_v11 }
 0x71f   :  { %4038 = vmatprep.subr.bf16.mxu1 %v2894_v44  ;;  %v2950_v21 = vunpack.c.l.s8.bf16 %v2558_v52  ;;  %v2788_v44 = vunpack.c.h.s8.bf16 %v2473_v61  ;;  %v2957_v41 = vunpack.c.h.s8.bf16 %v2558_v52  ;;  %v2500_v61 = vld [vmem:[#allocation17 + $0x3a0] sm:$0xff] }
 0x720   :  { %3441 = vmatmul.mubr.bf16.vlgmr.msra.gmra.mrb[16].mxu0 %v5128_v37  ;;  %v2738_v37 = vunpack.c.l.s8.bf16 %v2451_v13  ;;  %v2836_v8 = vunpack.c.l.s8.bf16 %v2500_v61 }
 0x721   :  { %3654 = vmatmul.mubr.bf16.vlgmr.msra.gmra.mrb[28].mxu1 %v5147_v63  ;;  %3452 = vmatpush1.bf16.msra.mxu0 %v2724_v54  ;;  %v2480_v54 = vld [vmem:[#allocation17 + $0x300] sm:$0xff] }
 0x722   :  { %3483 = vmatprep.mubr.bf16.mxu0 %v5134_v23  ;;  %4039 = vmatpush3.bf16.msra.mxu1 %v2838_v43  ;;  %v2544_v23 = vld [vmem:[#allocation17 + $0x500] sm:$0xff]  ;;  %v2593_v43 = vld [vmem:[#allocation17 + $0x688] sm:$0xff] }
 0x723   :  { %3694 = vmatprep.mubr.bf16.mxu1 %v5153_v50  ;;  %3453 = vmatprep.subr.bf16.mxu0 %v2732_v53  ;;  %v2922_v62 = vunpack.c.l.s8.bf16 %v2544_v23  ;;  %v2929_v1 = vunpack.c.h.s8.bf16 %v2544_v23  ;;  %v2787_v53 = vunpack.c.h.s8.bf16 %v2472_v11  ;;  %v3027_v57 = vunpack.c.h.s8.bf16 %v2593_v43  ;;  %v2486_v23 = vld [vmem:[#allocation17 + $0x330] sm:$0xff] }
 0x724   :  { %4040 = vmatprep.subr.bf16.mxu1 %v2901_v12  ;;  %v2795_v12 = vunpack.c.l.s8.bf16 %v2480_v54 }
 0x725   :  { %3454 = vmatpush1.bf16.msra.mxu0 %v2731_v48  ;;  %v3020_v48 = vunpack.c.l.s8.bf16 %v2593_v43 }
 0x726   :  { %4041 = vmatpush3.bf16.msra.mxu1 %v2845_v35  ;;  %3455 = vmatprep.subr.bf16.mxu0 %v2739_v49  ;;  %v2565_v35 = vld [vmem:[#allocation17 + $0x5a8] sm:$0xff]  ;;  %v2794_v49 = vunpack.c.l.s8.bf16 %v2479_v46 }
 0x727   :  { %4042 = vmatprep.subr.bf16.mxu1 %v2908_v14  ;;  %v2964_v13 = vunpack.c.l.s8.bf16 %v2565_v35  ;;  %v2802_v14 = vunpack.c.h.s8.bf16 %v2480_v54  ;;  %v2514_v54 = vld [vmem:[#allocation17 + $0x410] sm:$0xff] }
 0x729   :  { %3456 = vmatpush1.bf16.msra.mxu0 %v2738_v37  ;;  %v2487_v37 = vld [vmem:[#allocation17 + $0x338] sm:$0xff] }
 0x72a   :  { %4043 = vmatpush3.bf16.msra.mxu1 %v2852_v15  ;;  %3457 = vmatprep.subr.bf16.mxu0 %v2746_v17  ;;  %v2600_v15 = vld [vmem:[#allocation17 + $0x6c0] sm:$0xff]  ;;  %v2801_v17 = vunpack.c.h.s8.bf16 %v2479_v46  ;;  %v2809_v18 = vunpack.c.l.s8.bf16 %v2487_v37 }
 0x72b   :  { %4044 = vmatprep.subr.bf16.mxu1 %v2915_v58  ;;  %v2971_v58 = vunpack.c.h.s8.bf16 %v2565_v35  ;;  %v3041_v36 = vunpack.c.h.s8.bf16 %v2600_v15  ;;  %v2529_v35 = vld [vmem:[#allocation17 + $0x488] sm:$0xff] }
 0x72d   :  { %3458 = vmatpush1.bf16.msra.mxu0 %v2745_v0  ;;  %v3034_v0 = vunpack.c.l.s8.bf16 %v2600_v15  ;;  %v2536_v15 = vld [vmem:[#allocation17 + $0x4c0] sm:$0xff] }
 0x72e   :  { %4045 = vmatpush3.bf16.msra.mxu1 %v2859_v19  ;;  %3459 = vmatprep.subr.bf16.mxu0 %v2753_v22  ;;  %v2572_v19 = vld [vmem:[#allocation17 + $0x5e0] sm:$0xff]  ;;  %v2808_v22 = vunpack.c.l.s8.bf16 %v2486_v23 }
 0x72f   :  { %4046 = vmatprep.subr.bf16.mxu1 %v2922_v62  ;;  %v2978_v28 = vunpack.c.l.s8.bf16 %v2572_v19  ;;  %v2816_v62 = vunpack.c.h.s8.bf16 %v2487_v37  ;;  %v2900_v37 = vunpack.c.h.s8.bf16 %v2529_v35 }
 0x731   :  { %3460 = vmatpush1.bf16.msra.mxu0 %v2752_v3  ;;  %v2494_v3 = vld [vmem:[#allocation17 + $0x370] sm:$0xff] }
 0x732   :  { %4047 = vmatpush3.bf16.msra.mxu1 %v2866_v29  ;;  %3461 = vmatprep.subr.bf16.mxu0 %v2760_v45  ;;  %v2607_v29 = vld [vmem:[#allocation17 + $0x6f8] sm:$0xff]  ;;  %v2815_v45 = vunpack.c.h.s8.bf16 %v2486_v23  ;;  %v2823_v38 = vunpack.c.l.s8.bf16 %v2494_v3 }
 0x733   :  { %4048 = vmatprep.subr.bf16.mxu1 %v2929_v1  ;;  %v2985_v1 = vunpack.c.h.s8.bf16 %v2572_v19  ;;  %v3055_v25 = vunpack.c.h.s8.bf16 %v2607_v29  ;;  %v2543_v19 = vld [vmem:[#allocation17 + $0x4f8] sm:$0xff] }
 0x735   :  { %3462 = vmatpush1.bf16.msra.mxu0 %v2759_v33  ;;  %v3048_v33 = vunpack.c.l.s8.bf16 %v2607_v29  ;;  %v2550_v29 = vld [vmem:[#allocation17 + $0x530] sm:$0xff] }
 0x736   :  { %4049 = vmatpush3.bf16.msra.mxu1 %v2873_v10  ;;  %3463 = vmatprep.subr.bf16.mxu0 %v2767_v47  ;;  %v2579_v10 = vld [vmem:[#allocation17 + $0x618] sm:$0xff]  ;;  %v2822_v47 = vunpack.c.l.s8.bf16 %v2493_v40 }
 0x737   :  { %4050 = vmatprep.subr.bf16.mxu1 %v2936_v59  ;;  %v2992_v60 = vunpack.c.l.s8.bf16 %v2579_v10  ;;  %v2830_v59 = vunpack.c.h.s8.bf16 %v2494_v3  ;;  %v2928_v3 = vunpack.c.h.s8.bf16 %v2543_v19 }
 0x739   :  { %3464 = vmatpush1.bf16.msra.mxu0 %v2766_v2  ;;  %v2501_v2 = vld [vmem:[#allocation17 + $0x3a8] sm:$0xff] }
 0x73a   :  { %4051 = vmatpush3.bf16.msra.mxu1 %v2880_v24  ;;  %3465 = vmatprep.subr.bf16.mxu0 %v2774_v20  ;;  %v2829_v24 = vunpack.c.h.s8.bf16 %v2493_v40  ;;  %v2999_v20 = vunpack.c.h.s8.bf16 %v2579_v10  ;;  %v2557_v10 = vld [vmem:[#allocation17 + $0x568] sm:$0xff] }
 0x73b   :  { %4052 = vmatprep.subr.bf16.mxu1 %v2943_v56  ;;  %v2837_v56 = vunpack.c.l.s8.bf16 %v2501_v2 }
 0x73d   :  { %3466 = vmatpush1.bf16.msra.mxu0 %v2773_v9  ;;  %v2844_v9 = vunpack.c.h.s8.bf16 %v2501_v2  ;;  %v2956_v2 = vunpack.c.h.s8.bf16 %v2557_v10 }
 0x73e   :  { %4053 = vmatpush3.bf16.msra.mxu1 %v2887_v6  ;;  %3467 = vmatprep.subr.bf16.mxu0 %v2781_v7  ;;  %v2508_v6 = vld [vmem:[#allocation17 + $0x3e0] sm:$0xff]  ;;  %v2843_v7 = vunpack.c.h.s8.bf16 %v2500_v61  ;;  %v2563_v61 = vld [vmem:[#allocation17 + $0x598] sm:$0xff] }
 0x73f   :  { %4060 = vmatprep.subr.bf16.mxu1 %v3006_v55  ;;  %v2851_v11 = vunpack.c.l.s8.bf16 %v2508_v6  ;;  %v2507_v55 = vld [vmem:[#allocation17 + $0x3d8] sm:$0xff] }
 0x740   :  { %v2850_v52 = vunpack.c.l.s8.bf16 %v2507_v55 }
 0x741   :  { %3695 = vmatmul.mubr.bf16.vlgmr.msra.gmra.mrb[32].mxu1 %v5164_v39  ;;  %3468 = vmatpush1.bf16.msra.mxu0 %v2780_v26  ;;  %v2858_v26 = vunpack.c.h.s8.bf16 %v2508_v6  ;;  %v2571_v6 = vld [vmem:[#allocation17 + $0x5d8] sm:$0xff] }
 0x742   :  { %4061 = vmatpush3.bf16.msra.mxu1 %v2950_v21  ;;  %3735 = vmatprep.mubr.bf16.mxu1 %v5158_v27  ;;  %v2515_v21 = vld [vmem:[#allocation17 + $0x418] sm:$0xff] }
 0x743   :  { %3469 = vmatprep.subr.bf16.mxu0 %v2788_v44  ;;  %4062 = vmatprep.subr.bf16.mxu1 %v3013_v42  ;;  %v2857_v44 = vunpack.c.h.s8.bf16 %v2507_v55  ;;  %v2865_v42 = vunpack.c.l.s8.bf16 %v2515_v21  ;;  %v2872_v43 = vunpack.c.h.s8.bf16 %v2515_v21  ;;  %v2570_v55 = vld [vmem:[#allocation17 + $0x5d0] sm:$0xff] }
 0x744   :  { %v2578_v21 = vld [vmem:[#allocation17 + $0x610] sm:$0xff] }
 0x745   :  { %3470 = vmatpush1.bf16.msra.mxu0 %v2787_v53  ;;  %v2522_v53 = vld [vmem:[#allocation17 + $0x450] sm:$0xff] }
 0x746   :  { %4063 = vmatpush3.bf16.msra.mxu1 %v2957_v41  ;;  %3471 = vmatprep.subr.bf16.mxu0 %v2795_v12  ;;  %v2879_v41 = vunpack.c.l.s8.bf16 %v2522_v53  ;;  %v2521_v12 = vld [vmem:[#allocation17 + $0x448] sm:$0xff] }
 0x747   :  { %4064 = vmatprep.subr.bf16.mxu1 %v3020_v48  ;;  %v2878_v46 = vunpack.c.l.s8.bf16 %v2521_v12  ;;  %v2886_v48 = vunpack.c.h.s8.bf16 %v2522_v53 }
 0x749   :  { %3472 = vmatpush1.bf16.msra.mxu0 %v2794_v49  ;;  %v2885_v49 = vunpack.c.h.s8.bf16 %v2521_v12 }
 0x74a   :  { %4065 = vmatpush3.bf16.msra.mxu1 %v2964_v13  ;;  %3473 = vmatprep.subr.bf16.mxu0 %v2802_v14  ;;  %v2893_v13 = vunpack.c.l.s8.bf16 %v2529_v35  ;;  %v2528_v14 = vld [vmem:[#allocation17 + $0x480] sm:$0xff] }
 0x74b   :  { %4066 = vmatprep.subr.bf16.mxu1 %v3027_v57  ;;  %v2892_v57 = vunpack.c.l.s8.bf16 %v2528_v14 }
 0x74d   :  { %3474 = vmatpush1.bf16.msra.mxu0 %v2801_v17  ;;  %v2899_v17 = vunpack.c.h.s8.bf16 %v2528_v14 }
 0x74e   :  { %4067 = vmatpush3.bf16.msra.mxu1 %v2971_v58  ;;  %3475 = vmatprep.subr.bf16.mxu0 %v2809_v18  ;;  %v2907_v58 = vunpack.c.l.s8.bf16 %v2536_v15  ;;  %v2535_v18 = vld [vmem:[#allocation17 + $0x4b8] sm:$0xff] }
 0x74f   :  { %4068 = vmatprep.subr.bf16.mxu1 %v3034_v0  ;;  %v2906_v23 = vunpack.c.l.s8.bf16 %v2535_v18  ;;  %v2914_v0 = vunpack.c.h.s8.bf16 %v2536_v15 }
 0x751   :  { %3476 = vmatpush1.bf16.msra.mxu0 %v2808_v22  ;;  %v2913_v22 = vunpack.c.h.s8.bf16 %v2535_v18 }
 0x752   :  { %4069 = vmatpush3.bf16.msra.mxu1 %v2978_v28  ;;  %3477 = vmatprep.subr.bf16.mxu0 %v2816_v62  ;;  %v2921_v28 = vunpack.c.l.s8.bf16 %v2543_v19  ;;  %v2542_v62 = vld [vmem:[#allocation17 + $0x4f0] sm:$0xff]  ;;  %v2998_v19 = vunpack.c.h.s8.bf16 %v2578_v21 }
 0x753   :  { %4070 = vmatprep.subr.bf16.mxu1 %v3041_v36  ;;  %v2920_v36 = vunpack.c.l.s8.bf16 %v2542_v62 }
 0x755   :  { %3478 = vmatpush1.bf16.msra.mxu0 %v2815_v45  ;;  %v2927_v45 = vunpack.c.h.s8.bf16 %v2542_v62 }
 0x756   :  { %4071 = vmatpush3.bf16.msra.mxu1 %v2985_v1  ;;  %3479 = vmatprep.subr.bf16.mxu0 %v2823_v38  ;;  %v2935_v1 = vunpack.c.l.s8.bf16 %v2550_v29  ;;  %v2549_v38 = vld [vmem:[#allocation17 + $0x528] sm:$0xff] }
 0x757   :  { %4072 = vmatprep.subr.bf16.mxu1 %v3048_v33  ;;  %v2934_v40 = vunpack.c.l.s8.bf16 %v2549_v38  ;;  %v2942_v33 = vunpack.c.h.s8.bf16 %v2550_v29 }
 0x759   :  { %3480 = vmatpush1.bf16.msra.mxu0 %v2822_v47  ;;  %v2941_v47 = vunpack.c.h.s8.bf16 %v2549_v38 }
 0x75a   :  { %4073 = vmatpush3.bf16.msra.mxu1 %v2992_v60  ;;  %3481 = vmatprep.subr.bf16.mxu0 %v2830_v59  ;;  %v2949_v60 = vunpack.c.l.s8.bf16 %v2557_v10  ;;  %v2556_v59 = vld [vmem:[#allocation17 + $0x560] sm:$0xff] }
 0x75b   :  { %4074 = vmatprep.subr.bf16.mxu1 %v3055_v25  ;;  %v2948_v25 = vunpack.c.l.s8.bf16 %v2556_v59  ;;  %v2584_v10 = vld [vmem:[#allocation17 + $0x640] sm:$0xff] }
 0x75d   :  { %3482 = vmatpush1.bf16.msra.mxu0 %v2829_v24  ;;  %v2564_v24 = vld [vmem:[#allocation17 + $0x5a0] sm:$0xff] }
 0x75e   :  { %4075 = vmatpush3.bf16.msra.mxu1 %v2999_v20  ;;  %3494 = vmatprep.subr.bf16.mxu0 %v2837_v56  ;;  %v2955_v20 = vunpack.c.h.s8.bf16 %v2556_v59  ;;  %v2963_v56 = vunpack.c.l.s8.bf16 %v2564_v24 }
 0x760   :  { %3484 = vmatmul.mubr.bf16.vlgmr.msra.gmra.mrb[16].mxu0 %v5147_v63  ;;  %v2864_v63 = vunpack.c.l.s8.bf16 %v2514_v54 }
 0x761   :  { %3736 = vmatmul.mubr.bf16.vlgmr.msra.gmra.mrb[36].mxu1 %v5166_v51  ;;  %3495 = vmatpush1.bf16.msra.mxu0 %v2836_v8  ;;  %v2962_v8 = vunpack.c.l.s8.bf16 %v2563_v61 }
 0x762   :  { %3526 = vmatprep.mubr.bf16.mxu0 %v5153_v50  ;;  %3496 = vmatprep.subr.bf16.mxu0 %v2844_v9  ;;  %v2871_v50 = vunpack.c.h.s8.bf16 %v2514_v54  ;;  %v2970_v9 = vunpack.c.h.s8.bf16 %v2564_v24 }
 0x765   :  { %3497 = vmatpush1.bf16.msra.mxu0 %v2843_v7  ;;  %v2969_v7 = vunpack.c.h.s8.bf16 %v2563_v61 }
 0x766   :  { %3498 = vmatprep.subr.bf16.mxu0 %v2851_v11  ;;  %v2977_v11 = vunpack.c.l.s8.bf16 %v2571_v6 }
 0x769   :  { %3499 = vmatpush1.bf16.msra.mxu0 %v2850_v52  ;;  %v2976_v52 = vunpack.c.l.s8.bf16 %v2570_v55 }
 0x76a   :  { %3500 = vmatprep.subr.bf16.mxu0 %v2858_v26  ;;  %v5201_v26 = vld [vmem:[%s5262_s15] sm:$0xff] }
 0x76b   :  { %v3812_v14 = vrot.slane %v5201_v26, %v4909_v31 }
 0x76d   :  { %3501 = vmatpush1.bf16.msra.mxu0 %v2857_v44 }
 0x76e   :  { %3502 = vmatprep.subr.bf16.mxu0 %v2865_v42 }
 0x771   :  { %3503 = vmatpush1.bf16.msra.mxu0 %v2864_v63  ;;  %v2983_v63 = vunpack.c.h.s8.bf16 %v2570_v55 }
 0x772   :  { %3504 = vmatprep.subr.bf16.mxu0 %v2872_v43  ;;  %v3800_v43 = vrot.slane %v5201_v26, %v4870_v4 }
 0x775   :  { %3505 = vmatpush1.bf16.msra.mxu0 %v2871_v50  ;;  %v2991_v50 = vunpack.c.l.s8.bf16 %v2578_v21 }
 0x776   :  { %3506 = vmatprep.subr.bf16.mxu0 %v2879_v41  ;;  %v2577_v41 = vld [vmem:[#allocation17 + $0x608] sm:$0xff] }
 0x777   :  { %v2997_v38 = vunpack.c.h.s8.bf16 %v2577_v41 }
 0x779   :  { %3507 = vmatpush1.bf16.msra.mxu0 %v2878_v46  ;;  %v3808_v46 = vrot.slane %v5201_v26, %v4912_v32 }
 0x77a   :  { %3508 = vmatprep.subr.bf16.mxu0 %v2886_v48  ;;  %v3804_v48 = vrot.slane %v5201_v26, %v4873_v5 }
 0x77d   :  { %3509 = vmatpush1.bf16.msra.mxu0 %v2885_v49 }
 0x77e   :  { %3510 = vmatprep.subr.bf16.mxu0 %v2893_v13 }
 0x781   :  { %3511 = vmatpush1.bf16.msra.mxu0 %v2892_v57 }
 0x782   :  { %3512 = vmatprep.subr.bf16.mxu0 %v2900_v37 }
 0x785   :  { %3513 = vmatpush1.bf16.msra.mxu0 %v2899_v17  ;;  %v2990_v17 = vunpack.c.l.s8.bf16 %v2577_v41 }
 0x786   :  { %3514 = vmatprep.subr.bf16.mxu0 %v2907_v58 }
 0x789   :  { %3515 = vmatpush1.bf16.msra.mxu0 %v2906_v23 }
 0x78a   :  { %3516 = vmatprep.subr.bf16.mxu0 %v2914_v0 }
 0x78d   :  { %3517 = vmatpush1.bf16.msra.mxu0 %v2913_v22 }
 0x78e   :  { %3518 = vmatprep.subr.bf16.mxu0 %v2921_v28 }
 0x791   :  { %3519 = vmatpush1.bf16.msra.mxu0 %v2920_v36 }
 0x792   :  { %3520 = vmatprep.subr.bf16.mxu0 %v2928_v3  ;;  %v2585_v3 = vld [vmem:[#allocation17 + $0x648] sm:$0xff] }
 0x793   :  { %v3012_v59 = vunpack.c.h.s8.bf16 %v2585_v3 }
 0x795   :  { %3521 = vmatpush1.bf16.msra.mxu0 %v2927_v45 }
 0x796   :  { %3522 = vmatprep.subr.bf16.mxu0 %v2935_v1 }
 0x799   :  { %3523 = vmatpush1.bf16.msra.mxu0 %v2934_v40 }
 0x79a   :  { %3524 = vmatprep.subr.bf16.mxu0 %v2942_v33  ;;  %v3005_v33 = vunpack.c.l.s8.bf16 %v2585_v3 }
 0x79d   :  { %3525 = vmatpush1.bf16.msra.mxu0 %v2941_v47 }
 0x79e   :  { %3537 = vmatprep.subr.bf16.mxu0 %v2949_v60  ;;  %v3004_v60 = vunpack.c.l.s8.bf16 %v2584_v10 }
 0x7a0   :  { %3527 = vmatmul.mubr.bf16.vlgmr.msra.gmra.mrb[16].mxu0 %v5164_v39  ;;  %v2984_v39 = vunpack.c.h.s8.bf16 %v2571_v6 }
 0x7a1   :  { %3538 = vmatpush1.bf16.msra.mxu0 %v2948_v25  ;;  %3569 = vmatprep.mubr.bf16.mxu0 %v5158_v27  ;;  %v5196_v27 = vld [vmem:[%s5261_s14] sm:$0xff]  ;;  %s4641_s14 = smov [#allocation19]  }
 0x7a2   :  { %3539 = vmatprep.subr.bf16.mxu0 %v2956_v2  ;;  %v3749_v44 = vrot.slane %v5196_v27, %v4870_v4  ;;  %v3757_v42 = vrot.slane %v5196_v27, %v4912_v32  ;;  %v3753_v54 = vrot.slane %v5196_v27, %v4873_v5  ;;  %v3761_v53 = vrot.slane %v5196_v27, %v4909_v31  ;;  %v2592_v25 = vld [vmem:[#allocation17 + $0x680] sm:$0xff]  ;;  %s3879_s15 = sshll.u32 %s4641_s14, 4  ;;  %s3880_s15 = int_to_ptr.vmem [resolvable:$true] %s3879_s15 }
 0x7a3   :  { %v3011_v2 = vunpack.c.h.s8.bf16 %v2584_v10  ;;  %s4582_s3 = scalar_lea.vmem %s3880_s15, 1792  ;;  %p4587_p11 = scmp.lt.s32.totalorder %s3880_s15, %s3880_s15 }
 0x7a4   :  { %p4583_p10 = scmp.ne.s32.totalorder %s3880_s15, %s4582_s3  ;;  %p4588_p12 = scmp.lt.s32.totalorder %s4582_s3, %s4582_s3 }
 0x7a5   :  { %3540 = vmatpush1.bf16.msra.mxu0 %v2955_v20  ;;  %v3019_v20 = vunpack.c.l.s8.bf16 %v2592_v25 }
 0x7a6   :  { %3541 = vmatprep.subr.bf16.mxu0 %v2963_v56  ;;  %v2591_v56 = vld [vmem:[#allocation17 + $0x678] sm:$0xff]  ;;  %p4589_p13 = por %p4588_p12, %p4587_p11 }
 0x7a7   :  { %v3018_v6 = vunpack.c.l.s8.bf16 %v2591_v56 }
 0x7a8   :  { %p4590_p0 = pnand %p4589_p13, %p4583_p10 }
 0x7a9   :  { %3542 = vmatpush1.bf16.msra.mxu0 %v2962_v8 }
 0x7aa   :  { %3543 = vmatprep.subr.bf16.mxu0 %v2970_v9 }
 0x7ad   :  { %3544 = vmatpush1.bf16.msra.mxu0 %v2969_v7 }
 0x7ae   :  { %3545 = vmatprep.subr.bf16.mxu0 %v2977_v11  ;;  %v3026_v11 = vunpack.c.h.s8.bf16 %v2592_v25 }
 0x7b1   :  { %3546 = vmatpush1.bf16.msra.mxu0 %v2976_v52  ;;  %v2599_v52 = vld [vmem:[#allocation17 + $0x6b8] sm:$0xff] }
 0x7b2   :  { %3547 = vmatprep.subr.bf16.mxu0 %v2984_v39 }
 0x7b3   :  { %v3227_v12 = vpop.f32.mrb[12].mxu0 }
 0x7b4   :  { %v3781_v35 = vmul.f32 %v3749_v44, %v3227_v12  ;;  %v3399_v49 = vpop.f32.mrb[20].mxu1  ;;  %v3229_v13 = vpop.f32.mrb[13].mxu0  ;;  %v2605_v12 = vld [vmem:[#allocation17 + $0x6e8] sm:$0xff] }
 0x7b5   :  { %v3783_v4 = vmul.f32 %v3757_v42, %v3399_v49  ;;  %v3782_v57 = vmul.f32 %v3753_v54, %v3229_v13  ;;  %v3401_v37 = vpop.f32.mrb[21].mxu1  ;;  %v3231_v15 = vpop.f32.mrb[14].mxu0  ;;  %3548 = vmatpush1.bf16.msra.mxu0 %v2983_v63 }
 0x7b6   :  { %v3832_v58 = vadd.f32 %v3800_v43, %v3781_v35  ;;  %v3784_v18 = vmul.f32 %v3761_v53, %v3401_v37  ;;  %v3788_v23 = vmul.f32 %v3749_v44, %v3231_v15  ;;  %v3403_v0 = vpop.f32.mrb[22].mxu1  ;;  %v3233_v32 = vpop.f32.mrb[15].mxu0  ;;  %3549 = vmatprep.subr.bf16.mxu0 %v2991_v50  ;;  %v3025_v44 = vunpack.c.h.s8.bf16 %v2591_v56 }
 0x7b7   :  { %v3834_v5 = vadd.f32 %v3808_v46, %v3783_v4  ;;  %v3833_v22 = vadd.f32 %v3804_v48, %v3782_v57  ;;  %v3790_v28 = vmul.f32 %v3757_v42, %v3403_v0  ;;  %v3789_v62 = vmul.f32 %v3753_v54, %v3233_v32  ;;  %v3405_v36 = vpop.f32.mrb[23].mxu1  ;;  %v2598_v54 = vld [vmem:[#allocation17 + $0x6b0] sm:$0xff] }
 0x7b8   :  { %4334 = vtanh.f32 %v3832_v58  ;;  %v3835_v31 = vadd.f32 %v3812_v14, %v3784_v18  ;;  %v3839_v29 = vadd.f32 %v3800_v43, %v3788_v23  ;;  %v3791_v45 = vmul.f32 %v3761_v53, %v3405_v36  ;;  %v2606_v53 = vld [vmem:[#allocation17 + $0x6f0] sm:$0xff] }
 0x7b9   :  { %4336 = vtanh.f32 %v3834_v5  ;;  %v3841_v1 = vadd.f32 %v3808_v46, %v3790_v28  ;;  %3550 = vmatpush1.bf16.msra.mxu0 %v2990_v17  ;;  %v3840_v40 = vadd.f32 %v3804_v48, %v3789_v62  ;;  %v3033_v42 = vunpack.c.l.s8.bf16 %v2599_v52 }
 0x7ba   :  { %4338 = vtanh.f32 %v3833_v22  ;;  %3551 = vmatprep.subr.bf16.mxu0 %v2998_v19  ;;  %v3842_v47 = vadd.f32 %v3812_v14, %v3791_v45  ;;  %v3032_v63 = vunpack.c.l.s8.bf16 %v2598_v54  ;;  %v3040_v43 = vunpack.c.h.s8.bf16 %v2599_v52 }
 0x7bb   :  { %4340 = vtanh.f32 %v3835_v31  ;;  %v3039_v50 = vunpack.c.h.s8.bf16 %v2598_v54  ;;  %v3047_v41 = vunpack.c.l.s8.bf16 %v2606_v53  ;;  %v3046_v35 = vunpack.c.l.s8.bf16 %v2605_v12 }
 0x7bc   :  { %4342 = vtanh.f32 %v3839_v29  ;;  %v3054_v14 = vunpack.c.h.s8.bf16 %v2606_v53  ;;  %v3053_v37 = vunpack.c.h.s8.bf16 %v2605_v12 }
 0x7bd   :  { %4344 = vtanh.f32 %v3841_v1  ;;  %3552 = vmatpush1.bf16.msra.mxu0 %v2997_v38 }
 0x7be   :  { %4346 = vtanh.f32 %v3840_v40  ;;  %3553 = vmatprep.subr.bf16.mxu0 %v3005_v33 }
 0x7bf   :  { %4348 = vtanh.f32 %v3842_v47  ;;  %v3824_v47 = vrot.slane %v5201_v26, %v5015_v34 }
 0x7c1   :  { %3554 = vmatpush1.bf16.msra.mxu0 %v3004_v60 }
 0x7c2   :  { %v4335_v24 = vpop.eup %4334  ;;  %3555 = vmatprep.subr.bf16.mxu0 %v3012_v59 }
 0x7c3   :  { %v4337_v61 = vpop.eup %4336  ;;  %3860 = vst [vmem:[#allocation19] sm:$0xff] %v4335_v24 }
 0x7c4   :  { %v4339_v8 = vpop.eup %4338  ;;  %3862 = vst [vmem:[#allocation19 + $0x10] sm:$0xff] %v4337_v61 }
 0x7c5   :  { %v4341_v9 = vpop.eup %4340  ;;  %3861 = vst [vmem:[#allocation19 + $0x8] sm:$0xff] %v4339_v8  ;;  %3556 = vmatpush1.bf16.msra.mxu0 %v3011_v2  ;;  %v3765_v8 = vrot.slane %v5196_v27, %v5012_v16 }
 0x7c6   :  { %v4343_v7 = vpop.eup %4342  ;;  %3863 = vst [vmem:[#allocation19 + $0x18] sm:$0xff] %v4341_v9  ;;  %3557 = vmatprep.subr.bf16.mxu0 %v3019_v20  ;;  %v3769_v9 = vrot.slane %v5196_v27, %v5018_v30 }
 0x7c7   :  { %v4345_v55 = vpop.eup %4344  ;;  %3867 = vst [vmem:[#allocation19 + $0x38] sm:$0xff] %v4343_v7  ;;  %v3820_v7 = vrot.slane %v5201_v26, %v5018_v30 }
 0x7c8   :  { %v4347_v39 = vpop.eup %4346  ;;  %3869 = vst [vmem:[#allocation19 + $0x48] sm:$0xff] %v4345_v55 }
 0x7c9   :  { %v4349_v21 = vpop.eup %4348  ;;  %3868 = vst [vmem:[#allocation19 + $0x40] sm:$0xff] %v4347_v39  ;;  %3558 = vmatpush1.bf16.msra.mxu0 %v3018_v6 }
 0x7ca   :  { %3870 = vst [vmem:[#allocation19 + $0x50] sm:$0xff] %v4349_v21  ;;  %3559 = vmatprep.subr.bf16.mxu0 %v3026_v11 }
 0x7cd   :  { %3560 = vmatpush1.bf16.msra.mxu0 %v3025_v44 }
 0x7ce   :  { %3561 = vmatprep.subr.bf16.mxu0 %v3033_v42 }
 0x7d1   :  { %3562 = vmatpush1.bf16.msra.mxu0 %v3032_v63 }
 0x7d2   :  { %3563 = vmatprep.subr.bf16.mxu0 %v3040_v43 }
 0x7d4   :  { %v4010_v46 = vpop.f32.mrb[24].mxu1 }
 0x7d5   :  { %v4011_v48 = vpop.f32.mrb[25].mxu1  ;;  %3564 = vmatpush1.bf16.msra.mxu0 %v3039_v50 }
 0x7d6   :  { %v4012_v49 = vadd.f32 %v4011_v48, %v4010_v46  ;;  %v4013_v13 = vpop.f32.mrb[26].mxu1  ;;  %3565 = vmatprep.subr.bf16.mxu0 %v3047_v41 }
 0x7d7   :  { %v4014_v4 = vpop.f32.mrb[27].mxu1 }
 0x7d8   :  { %v4015_v57 = vadd.f32 %v4014_v4, %v4013_v13 }
 0x7d9   :  { %3566 = vmatpush1.bf16.msra.mxu0 %v3046_v35 }
 0x7da   :  { %3567 = vmatprep.subr.bf16.mxu0 %v3054_v14 }
 0x7dd   :  { %3568 = vmatpush1.bf16.msra.mxu0 %v3053_v37 }
 0x7e0   :  { %3570 = vmatmul.mubr.bf16.vlgmr.msra.gmra.mrb[16].mxu0 %v5166_v51  ;;  %v3773_v51 = vrot.slane %v5196_v27, %v5015_v34  ;;  %v3816_v34 = vrot.slane %v5201_v26, %v5012_v16 }
 0x7f4   :  { %v4032_v15 = vpop.f32.mrb[28].mxu1 }
 0x7f5   :  { %v4033_v17 = vpop.f32.mrb[29].mxu1 }
 0x7f6   :  { %v4034_v58 = vadd.f32 %v4033_v17, %v4032_v15  ;;  %v4035_v18 = vpop.f32.mrb[30].mxu1 }
 0x7f7   :  { %v4036_v23 = vpop.f32.mrb[31].mxu1 }
 0x7f8   :  { %v3656_v0 = vadd.f32 %v4034_v58, %v4012_v49  ;;  %v4037_v32 = vadd.f32 %v4036_v23, %v4035_v18 }
 0x7fa   :  { %v3659_v19 = vadd.f32 %v4037_v32, %v4015_v57 }
 0x814   :  { %v4054_v5 = vpop.f32.mrb[32].mxu1 }
 0x815   :  { %v4055_v22 = vpop.f32.mrb[33].mxu1 }
 0x816   :  { %v4056_v28 = vadd.f32 %v4055_v22, %v4054_v5  ;;  %v4057_v62 = vpop.f32.mrb[34].mxu1 }
 0x817   :  { %v4058_v36 = vpop.f32.mrb[35].mxu1 }
 0x818   :  { %v3697_v3 = vadd.f32 %v4056_v28, %v3656_v0  ;;  %v4059_v31 = vadd.f32 %v4058_v36, %v4057_v62 }
 0x81a   :  { %v3700_v29 = vadd.f32 %v4059_v31, %v3659_v19 }
 0x834   :  { %v4076_v45 = vpop.f32.mrb[36].mxu1 }
 0x835   :  { %v4077_v1 = vpop.f32.mrb[37].mxu1 }
 0x836   :  { %v4078_v38 = vadd.f32 %v4077_v1, %v4076_v45  ;;  %v4079_v40 = vpop.f32.mrb[38].mxu1 }
 0x837   :  { %v4080_v33 = vpop.f32.mrb[39].mxu1 }
 0x838   :  { %v3738_v10 = vadd.f32 %v4078_v38, %v3697_v3  ;;  %v4081_v60 = vadd.f32 %v4080_v33, %v4079_v40 }
 0x83a   :  { %v3787_v59 = vmul.f32 %v3773_v51, %v3738_v10  ;;  %v3741_v25 = vadd.f32 %v4081_v60, %v3700_v29 }
 0x83c   :  { %v3838_v2 = vadd.f32 %v3824_v47, %v3787_v59  ;;  %v3794_v24 = vmul.f32 %v3773_v51, %v3741_v25 }
 0x83e   :  { %4350 = vtanh.f32 %v3838_v2  ;;  %v3845_v20 = vadd.f32 %v3824_v47, %v3794_v24 }
 0x840   :  { %4352 = vtanh.f32 %v3845_v20 }
 0x848   :  { %v4351_v56 = vpop.eup %4350 }
 0x849   :  { %3866 = vst [vmem:[#allocation19 + $0x30] sm:$0xff] %v4351_v56 }
 0x84a   :  { %v4353_v61 = vpop.eup %4352 }
 0x84b   :  { %3873 = vst [vmem:[#allocation19 + $0x68] sm:$0xff] %v4353_v61 }
 0x8b3   :  { %v3571_v6 = vpop.f32.mrb[16].mxu0 }
 0x8b4   :  { %v3785_v11 = vmul.f32 %v3765_v8, %v3571_v6  ;;  %v3573_v55 = vpop.f32.mrb[17].mxu0 }
 0x8b5   :  { %v3786_v52 = vmul.f32 %v3769_v9, %v3573_v55  ;;  %v3575_v39 = vpop.f32.mrb[18].mxu0 }
 0x8b6   :  { %v3836_v21 = vadd.f32 %v3816_v34, %v3785_v11  ;;  %v3792_v44 = vmul.f32 %v3765_v8, %v3575_v39  ;;  %v3577_v42 = vpop.f32.mrb[19].mxu0 }
 0x8b7   :  { %v3837_v54 = vadd.f32 %v3820_v7, %v3786_v52  ;;  %v3793_v63 = vmul.f32 %v3769_v9, %v3577_v42 }
 0x8b8   :  { %4354 = vtanh.f32 %v3836_v21  ;;  %v3843_v43 = vadd.f32 %v3816_v34, %v3792_v44 }
 0x8b9   :  { %4356 = vtanh.f32 %v3837_v54  ;;  %v3844_v27 = vadd.f32 %v3820_v7, %v3793_v63 }
 0x8ba   :  { %4358 = vtanh.f32 %v3843_v43 }
 0x8bb   :  { %4360 = vtanh.f32 %v3844_v27 }
 0x8c2   :  { %v4355_v16 = vpop.eup %4354 }
 0x8c3   :  { %v4357_v53 = vpop.eup %4356  ;;  %3864 = vst [vmem:[#allocation19 + $0x20] sm:$0xff] %v4355_v16 }
 0x8c4   :  { %v4359_v30 = vpop.eup %4358  ;;  %3865 = vst [vmem:[#allocation19 + $0x28] sm:$0xff] %v4357_v53 }
 0x8c5   :  { %v4361_v26 = vpop.eup %4360  ;;  %3871 = vst [vmem:[#allocation19 + $0x58] sm:$0xff] %v4359_v30 }
 0x8c6   :  { %3872 = vst [vmem:[#allocation19 + $0x60] sm:$0xff] %v4361_v26 }
 0x8c7   :  { %4593 = shalt.err (!%p4590_p0)
}
 0x8c8   :  { %s5271_s0 = sld [smem:[#allocation28_spill]] }
 0x8ce   :  { %s4594_s16 = scalar_lea.hbm %s5271_s0, 1792 }
 0x8cf   :  { %p4595_p1 = scmp.ne.s32.totalorder %s5271_s0, %s4594_s16  ;;  %p4598_p2 = scmp.lt.u32.totalorder %s4594_s16, %s5271_s0 }
 0x8d1   :  { %p4600_p3 = pnand %p4598_p2, %p4595_p1 }
 0x8d3   :  { %4603 = shalt.err (!%p4600_p3)
}
 0x8d4   :  { %3885 = dma.vmem_to_hbm [thread:$0]  %s3880_s15, 1792, %s5271_s0, [#allocation4], %s4635_s9, %s4635_s9, %s4636_s18  }
 0x8d5   :  { %4616 = dma.done.wait [#allocation4], 1792  }
 0x8d6   :  { %4617 = vsyncadd [#allocation4], 4294965504 }
 0x8d7   :  { %3889 = vsyncpa [#allocation3], 1 }
 0x8d8   :  { %3890 = vsyncpa [#allocation6], 1 }
 0x8d9   :  { %3891 = vsyncpa [#allocation9], 1 }
 0x8da   :  { %3892 = vsyncpa [#allocation12], 1 }
 0x8db   :  { %3893 = vsyncpa [#allocation15], 1 }
 0x8dc   :  { %3894 = vsyncpa [#allocation18], 1 }
 0x8dd   :  { %3895 = vsyncpa [#allocation4], 1 }

</bundles_post_ra>
